<compile_context>
chip_gen: v6e
topology: v6e:2x2x1
jax: 0.10.0
libtpu: 0.0.40
codegen_flags: <defaults>
</compile_context>

<pallas_src>
import jax
import jax.numpy as jnp
from jax.experimental import pallas as pl
from jax.experimental.pallas import tpu as pltpu

EPS = 1e-5            # nn.BatchNorm2d default
TM_TARGET = 256       # GEMM row-tile target (raise to 512-2048 on 128 MiB-VMEM parts)
LANE_TARGET = 128     # minimum lane width for the elementwise BN/ReLU passes


# ------------------------------ small helpers -------------------------------

def _pick_tile(m, target=TM_TARGET):
    """Largest divisor of m that is <= target and a multiple of 8 (else m)."""
    if m <= target:
        return m
    for t in range(target, 0, -1):
        if m % t == 0 and t % 8 == 0:
            return t
    return m


def _fold_factor(m, c, lane_target=LANE_TARGET):
    """Smallest divisor r of m with r*c >= lane_target (lane-dense rows)."""
    if c >= lane_target:
        return 1
    for r in range(1, min(m, 4096) + 1):
        if m % r == 0 and r * c >= lane_target:
            return r
    return 1


def _parallel1d():
    return pltpu.CompilerParams(dimension_semantics=("parallel",))


# ------------------------------ Pallas kernels -------------------------------

def _gemm_stats_kernel(x_ref, w_ref, y_ref, sum_ref, sq_ref):
    # 1x1 conv as GEMM (bf16 operands, f32 accumulate) + per-tile BN partials.
    y = jnp.dot(x_ref[...], w_ref[...], preferred_element_type=jnp.float32)
    y_ref[...] = y
    sum_ref[0] = jnp.sum(y, axis=0, keepdims=True)
    sq_ref[0] = jnp.sum(y * y, axis=0, keepdims=True)


def _bnact_gemm_stats_kernel(x_ref, scale_ref, shift_ref, w_ref,
                             y_ref, sum_ref, sq_ref):
    # fused: relu(bn(prev conv)) -> 1x1 conv GEMM -> per-tile BN partials.
    a = jnp.maximum(x_ref[...] * scale_ref[...] + shift_ref[...], 0.0)
    y = jnp.dot(a.astype(jnp.bfloat16), w_ref[...],
                preferred_element_type=jnp.float32)
    y_ref[...] = y
    sum_ref[0] = jnp.sum(y, axis=0, keepdims=True)
    sq_ref[0] = jnp.sum(y * y, axis=0, keepdims=True)


def _bn_act_kernel(y_ref, scale_ref, shift_ref, o_ref):
    o_ref[...] = jnp.maximum(y_ref[...] * scale_ref[...] + shift_ref[...], 0.0)


def _bn_add_relu_kernel(y_ref, scale_ref, shift_ref, id_ref, o_ref):
    o_ref[...] = jnp.maximum(
        y_ref[...] * scale_ref[...] + shift_ref[...] + id_ref[...], 0.0)


def _conv3x3_stats_kernel(xpad_ref, w_ref, y_ref, sum_ref, sq_ref):
    # 3x3 stride-1 conv for one image: 9 accumulated GEMMs over shifted views
    # of the zero-padded activation (no HBM im2col), + per-image BN partials.
    _, hp, wp, c = xpad_ref.shape
    ho, wo = hp - 2, wp - 2
    co = w_ref.shape[-1]
    xp = xpad_ref[0]                                   # (hp, wp, c) bf16
    acc = jnp.zeros((ho * wo, co), jnp.float32)
    for dy in range(3):
        for dx in range(3):
            xt = xp[dy:dy + ho, dx:dx + wo, :].reshape(ho * wo, c)
            acc = acc + jnp.dot(xt, w_ref[dy * 3 + dx],
                                preferred_element_type=jnp.float32)
    y_ref[0] = acc
    sum_ref[0] = jnp.sum(acc, axis=0, keepdims=True)
    sq_ref[0] = jnp.sum(acc * acc, axis=0, keepdims=True)


# --------------------------- pallas_call wrappers ----------------------------

def _gemm_stats(x_bf16, w_bf16):
    M, K = x_bf16.shape
    C = w_bf16.shape[1]
    tm = _pick_tile(M)
    nt = M // tm
    return pl.pallas_call(
        _gemm_stats_kernel,
        out_shape=(jax.ShapeDtypeStruct((M, C), jnp.float32),
                   jax.ShapeDtypeStruct((nt, 1, C), jnp.float32),
                   jax.ShapeDtypeStruct((nt, 1, C), jnp.float32)),
        grid=(nt,),
        in_specs=[pl.BlockSpec((tm, K), lambda i: (i, 0)),
                  pl.BlockSpec((K, C), lambda i: (0, 0))],
        out_specs=(pl.BlockSpec((tm, C), lambda i: (i, 0)),
                   pl.BlockSpec((1, 1, C), lambda i: (i, 0, 0)),
                   pl.BlockSpec((1, 1, C), lambda i: (i, 0, 0))),
        compiler_params=_parallel1d(),
    )(x_bf16, w_bf16)


def _bnact_gemm_stats(y_prev_f32, scale, shift, w_bf16):
    M, K = y_prev_f32.shape
    C = w_bf16.shape[1]
    tm = _pick_tile(M)
    nt = M // tm
    return pl.pallas_call(
        _bnact_gemm_stats_kernel,
        out_shape=(jax.ShapeDtypeStruct((M, C), jnp.float32),
                   jax.ShapeDtypeStruct((nt, 1, C), jnp.float32),
                   jax.ShapeDtypeStruct((nt, 1, C), jnp.float32)),
        grid=(nt,),
        in_specs=[pl.BlockSpec((tm, K), lambda i: (i, 0)),
                  pl.BlockSpec((1, K), lambda i: (0, 0)),
                  pl.BlockSpec((1, K), lambda i: (0, 0)),
                  pl.BlockSpec((K, C), lambda i: (0, 0))],
        out_specs=(pl.BlockSpec((tm, C), lambda i: (i, 0)),
                   pl.BlockSpec((1, 1, C), lambda i: (i, 0, 0)),
                   pl.BlockSpec((1, 1, C), lambda i: (i, 0, 0))),
        compiler_params=_parallel1d(),
    )(y_prev_f32, scale, shift, w_bf16)


def _conv3x3_s1_stats(a_nhwc_bf16, w_taps_bf16):
    # a: (N, H, W, C) bf16 ; w_taps: (9, C, Co) bf16 ; stride 1, padding 1.
    N, H, W, C = a_nhwc_bf16.shape
    Co = w_taps_bf16.shape[-1]
    xpad = jnp.pad(a_nhwc_bf16, ((0, 0), (1, 1), (1, 1), (0, 0)))
    y, ssum, ssq = pl.pallas_call(
        _conv3x3_stats_kernel,
        out_shape=(jax.ShapeDtypeStruct((N, H * W, Co), jnp.float32),
                   jax.ShapeDtypeStruct((N, 1, Co), jnp.float32),
                   jax.ShapeDtypeStruct((N, 1, Co), jnp.float32)),
        grid=(N,),
        in_specs=[pl.BlockSpec((1, H + 2, W + 2, C), lambda n: (n, 0, 0, 0)),
                  pl.BlockSpec((9, C, Co), lambda n: (0, 0, 0))],
        out_specs=(pl.BlockSpec((1, H * W, Co), lambda n: (n, 0, 0)),
                   pl.BlockSpec((1, 1, Co), lambda n: (n, 0, 0)),
                   pl.BlockSpec((1, 1, Co), lambda n: (n, 0, 0))),
        compiler_params=_parallel1d(),
    )(xpad, w_taps_bf16)
    return y.reshape(N * H * W, Co), ssum, ssq


def _bn_apply(y2d, scale, shift, identity2d=None):
    # Tiled, lane-dense elementwise pass: relu(y*scale + shift [+ identity]).
    M, C = y2d.shape
    r = _fold_factor(M, C)                 # lane-dense fold: (M, C) -> (M/r, r*C)
    mf, w = M // r, r * C
    y = y2d.reshape(mf, w)
    sc = jnp.tile(scale.reshape(1, C), (1, r))
    sh = jnp.tile(shift.reshape(1, C), (1, r))
    tm = _pick_tile(mf)
    nt = mf // tm
    common = dict(
        out_shape=jax.ShapeDtypeStruct((mf, w), jnp.float32),
        grid=(nt,),
        out_specs=pl.BlockSpec((tm, w), lambda i: (i, 0)),
        compiler_params=_parallel1d(),
    )
    if identity2d is None:
        out = pl.pallas_call(
            _bn_act_kernel,
            in_specs=[pl.BlockSpec((tm, w), lambda i: (i, 0)),
                      pl.BlockSpec((1, w), lambda i: (0, 0)),
                      pl.BlockSpec((1, w), lambda i: (0, 0))],
            **common)(y, sc, sh)
    else:
        ident = identity2d.reshape(mf, w)
        out = pl.pallas_call(
            _bn_add_relu_kernel,
            in_specs=[pl.BlockSpec((tm, w), lambda i: (i, 0)),
                      pl.BlockSpec((1, w), lambda i: (0, 0)),
                      pl.BlockSpec((1, w), lambda i: (0, 0)),
                      pl.BlockSpec((tm, w), lambda i: (i, 0))],
            **common)(y, sc, sh, ident)
    return out.reshape(M, C)


# --------------------------------- glue -------------------------------------

def _finalize_bn(ssum, ssq, count, gamma, beta):
    # Global train-mode BN stats (biased variance) folded into scale/shift.
    s = jnp.sum(ssum[:, 0, :], axis=0)
    q = jnp.sum(ssq[:, 0, :], axis=0)
    mean = s / count
    var = jnp.maximum(q / count - mean * mean, 0.0)
    scale = gamma * jax.lax.rsqrt(var + EPS)
    shift = beta - mean * scale
    return scale.reshape(1, -1).astype(jnp.float32), shift.reshape(1, -1).astype(jnp.float32)


def _im2col_3x3(x_nhwc, stride):
    # stride>1 fallback only (stride-1 path is fused in-kernel, no im2col).
    N, H, W, C = x_nhwc.shape
    Ho = (H + 2 - 3) // stride + 1
    Wo = (W + 2 - 3) // stride + 1
    xp = jnp.pad(x_nhwc, ((0, 0), (1, 1), (1, 1), (0, 0)))
    cols = []
    for dy in range(3):
        for dx in range(3):
            cols.append(xp[:, dy:dy + (Ho - 1) * stride + 1:stride,
                           dx:dx + (Wo - 1) * stride + 1:stride, :])
    patches = jnp.concatenate(cols, axis=-1)           # (kh, kw, c) ordering
    return patches.reshape(N * Ho * Wo, 9 * C), Ho, Wo


def prepare_params(params):
    # One-time weight repack (bf16, GEMM layouts) -- kept out of the hot path.
    # Conv biases are intentionally not used: train-mode BN cancels them.
    w1 = params["w1"]; cmid, cin = w1.shape[0], w1.shape[1]
    w2 = params["w2"]
    w3 = params["w3"]; cout = w3.shape[0]
    return {
        "w1m": jnp.transpose(w1.reshape(cmid, cin), (1, 0)).astype(jnp.bfloat16),
        "w2t": jnp.transpose(w2, (2, 3, 1, 0)).reshape(9, cmid, cmid).astype(jnp.bfloat16),
        "w2m": jnp.transpose(w2, (2, 3, 1, 0)).reshape(9 * cmid, cmid).astype(jnp.bfloat16),
        "w3m": jnp.transpose(w3.reshape(cout, cmid), (1, 0)).astype(jnp.bfloat16),
        "g1": params["g1"], "beta1": params["beta1"],
        "g2": params["g2"], "beta2": params["beta2"],
        "g3": params["g3"], "beta3": params["beta3"],
    }


def block_forward(x_nchw, prep, stride=1, identity_downsample=None):
    N, Cin, H, W = x_nchw.shape
    cmid = prep["w1m"].shape[1]
    cout = prep["w3m"].shape[1]
    x_nhwc = jnp.transpose(x_nchw, (0, 2, 3, 1))

    # conv1 (1x1) -> BN1 stats (phase 1) -> fold -> relu(bn1) (phase 2)
    M1 = N * H * W
    y1, s1, q1 = _gemm_stats(x_nhwc.reshape(M1, Cin).astype(jnp.bfloat16), prep["w1m"])
    sc1, sh1 = _finalize_bn(s1, q1, M1, prep["g1"], prep["beta1"])
    a1 = _bn_apply(y1, sc1, sh1)

    # conv2 (3x3, pad 1) -> BN2 stats
    a1_nhwc = a1.reshape(N, H, W, cmid).astype(jnp.bfloat16)
    if stride == 1:
        y2, s2, q2 = _conv3x3_s1_stats(a1_nhwc, prep["w2t"])
        Ho, Wo = H, W
    else:
        p2, Ho, Wo = _im2col_3x3(a1_nhwc, stride)      # fallback path
        y2, s2, q2 = _gemm_stats(p2, prep["w2m"])
    M2 = N * Ho * Wo
    sc2, sh2 = _finalize_bn(s2, q2, M2, prep["g2"], prep["beta2"])

    # relu(bn2) fused into conv3 (1x1) GEMM -> BN3 stats
    y3, s3, q3 = _bnact_gemm_stats(y2, sc2, sh2, prep["w3m"])
    sc3, sh3 = _finalize_bn(s3, q3, M2, prep["g3"], prep["beta3"])

    # residual + bn3 + relu
    if identity_downsample is not None:
        # TODO(synk): identity_downsample is an external nn.Module in the spec;
        # a user-supplied JAX callable (NHWC -> NHWC) is accepted here instead.
        identity = identity_downsample(x_nhwc).astype(jnp.float32)
    else:
        if stride != 1 or Cin != cout:
            raise ValueError(
                "identity_downsample is required when stride != 1 or "
                "in_channels != out_channels * expansion")
        identity = x_nhwc
    out2d = _bn_apply(y3, sc3, sh3, identity.reshape(M2, cout))
    return jnp.transpose(out2d.reshape(N, Ho, Wo, cout), (0, 3, 1, 2))


# ------------------------ plain-JAX reference (check) ------------------------

def ref_forward(x, params, stride=1):
    def conv(z, w, b, s=1, p=0):
        y = jax.lax.conv_general_dilated(
            z, w, window_strides=(s, s), padding=((p, p), (p, p)),
            dimension_numbers=("NCHW", "OIHW", "NCHW"))
        return y + b.reshape(1, -1, 1, 1)

    def bn(y, g, beta):
        mean = jnp.mean(y, axis=(0, 2, 3), keepdims=True)
        var = jnp.mean((y - mean) ** 2, axis=(0, 2, 3), keepdims=True)
        return (g.reshape(1, -1, 1, 1) * (y - mean) * jax.lax.rsqrt(var + EPS)
                + beta.reshape(1, -1, 1, 1))

    identity = x
    y = jax.nn.relu(bn(conv(x, params["w1"], params["b1"]), params["g1"], params["beta1"]))
    y = jax.nn.relu(bn(conv(y, params["w2"], params["b2"], s=stride, p=1),
                       params["g2"], params["beta2"]))
    y = bn(conv(y, params["w3"], params["b3"]), params["g3"], params["beta3"])
    return jax.nn.relu(y + identity)


# ----------------------------------- main ------------------------------------

if __name__ == "__main__":
    key = jax.random.PRNGKey(0)
    N, H, W = 2, 16, 16
    out_channels = 4
    Cin = out_channels * 4          # expansion=4; Cin == Cout so residual works
    stride = 1
    keys = jax.random.split(key, 12)

    def rnd(k, shape, s=0.1):
        return jax.random.normal(k, shape, jnp.float32) * s

    params = {
        "w1": rnd(keys[0], (out_channels, Cin, 1, 1)),
        "b1": rnd(keys[1], (out_channels,)),
        "g1": 1.0 + rnd(keys[7], (out_channels,), 0.2),
        "beta1": rnd(keys[8], (out_channels,)),
        "w2": rnd(keys[2], (out_channels, out_channels, 3, 3)),
        "b2": rnd(keys[3], (out_channels,)),
        "g2": 1.0 + rnd(keys[9], (out_channels,), 0.2),
        "beta2": rnd(keys[10], (out_channels,)),
        "w3": rnd(keys[4], (out_channels * 4, out_channels, 1, 1)),
        "b3": rnd(keys[5], (out_channels * 4,)),
        "g3": 1.0 + rnd(keys[11], (out_channels * 4,), 0.2),
        "beta3": jnp.zeros((out_channels * 4,), jnp.float32),
    }
    x = jax.random.normal(keys[6], (N, Cin, H, W), jnp.float32)

    prep = prepare_params(params)
    fwd = jax.jit(lambda xx: block_forward(xx, prep, stride=stride))
    out = jax.block_until_ready(fwd(x))
    ref = jax.block_until_ready(ref_forward(x, params, stride=stride))

    assert out.shape == (N, out_channels * 4, H, W), out.shape
    # bf16 MXU operands -> slightly looser tolerance than pure-f32.
    err = float(jnp.max(jnp.abs(out - ref)))
    assert jnp.allclose(out, ref, atol=2e-2, rtol=2e-2), f"mismatch, max err {err}"
    print("KERNEL_OK")
</pallas_src>

<mosaic_0001>
module attributes {stable_mosaic.version = 11 : i64} {
  func.func @_gemm_stats_kernel(%arg0: i32, %arg1: memref<256x16xbf16, #tpu.memory_space<vmem>>, %arg2: memref<16x4xbf16, #tpu.memory_space<vmem>>, %arg3: memref<256x4xf32, #tpu.memory_space<vmem>>, %arg4: memref<1x1x4xf32, #tpu.memory_space<vmem>>, %arg5: memref<1x1x4xf32, #tpu.memory_space<vmem>>) attributes {dimension_semantics = [#tpu.dimension_semantics<parallel>], iteration_bounds = array<i64: 2>, scalar_prefetch = 0 : i64, scratch_operands = 0 : i64, tpu.core_type = #tpu.core_type<tc>, window_params = [{transform_indices = @transform_0, window_bounds = array<i64: 256, 16>}, {pipeline_mode = #tpu.pipeline_mode<synchronous>, transform_indices = @transform_1, window_bounds = array<i64: 16, 4>}, {transform_indices = @transform_2, window_bounds = array<i64: 256, 4>}, {transform_indices = @transform_3, window_bounds = array<i64: 1, 1, 4>}, {transform_indices = @transform_4, window_bounds = array<i64: 1, 1, 4>}]} {
    %c0 = arith.constant 0 : index
    %c0_0 = arith.constant 0 : index
    %0 = vector.load %arg1[%c0, %c0_0] : memref<256x16xbf16, #tpu.memory_space<vmem>>, vector<256x16xbf16>
    %c0_1 = arith.constant 0 : index
    %c0_2 = arith.constant 0 : index
    %1 = vector.load %arg2[%c0_1, %c0_2] : memref<16x4xbf16, #tpu.memory_space<vmem>>, vector<16x4xbf16>
    %cst = arith.constant dense<0.000000e+00> : vector<256x4xf32>
    %2 = tpu.matmul %0, %1, %cst {dimension_numbers = #tpu.dot_dimension_numbers<[1], [0], [0], [1], [0, 0, 1, 1], [], []>} : vector<256x16xbf16>, vector<16x4xbf16>, vector<256x4xf32> -> vector<256x4xf32>
    %c0_3 = arith.constant 0 : index
    %c0_4 = arith.constant 0 : index
    %3 = vector.load %arg3[%c0_3, %c0_4] : memref<256x4xf32, #tpu.memory_space<vmem>>, vector<256x4xf32>
    tpu.vector_store %arg3[%c0_3, %c0_4], %2 {strides = array<i32>} : memref<256x4xf32, #tpu.memory_space<vmem>>, vector<256x4xf32>,
    %cst_5 = arith.constant dense<0.000000e+00> : vector<4xf32>
    %4 = vector.multi_reduction <add>, %2, %cst_5 [0] : vector<256x4xf32> to vector<4xf32>
    %5 = vector.shape_cast %4 : vector<4xf32> to vector<1x4xf32>
    %c0_6 = arith.constant 0 : index
    %c0_7 = arith.constant 0 : index
    %c0_8 = arith.constant 0 : index
    %6 = vector.load %arg4[%c0_6, %c0_7, %c0_8] : memref<1x1x4xf32, #tpu.memory_space<vmem>>, vector<1x1x4xf32>
    %7 = vector.shape_cast %6 : vector<1x1x4xf32> to vector<1x4xf32>
    %8 = vector.shape_cast %5 : vector<1x4xf32> to vector<1x1x4xf32>
    tpu.vector_store %arg4[%c0_6, %c0_7, %c0_8], %8 {strides = array<i32>} : memref<1x1x4xf32, #tpu.memory_space<vmem>>, vector<1x1x4xf32>,
    %9 = arith.mulf %2, %2 : vector<256x4xf32>
    %cst_9 = arith.constant dense<0.000000e+00> : vector<4xf32>
    %10 = vector.multi_reduction <add>, %9, %cst_9 [0] : vector<256x4xf32> to vector<4xf32>
    %11 = vector.shape_cast %10 : vector<4xf32> to vector<1x4xf32>
    %c0_10 = arith.constant 0 : index
    %c0_11 = arith.constant 0 : index
    %c0_12 = arith.constant 0 : index
    %12 = vector.load %arg5[%c0_10, %c0_11, %c0_12] : memref<1x1x4xf32, #tpu.memory_space<vmem>>, vector<1x1x4xf32>
    %13 = vector.shape_cast %12 : vector<1x1x4xf32> to vector<1x4xf32>
    %14 = vector.shape_cast %11 : vector<1x4xf32> to vector<1x1x4xf32>
    tpu.vector_store %arg5[%c0_10, %c0_11, %c0_12], %14 {strides = array<i32>} : memref<1x1x4xf32, #tpu.memory_space<vmem>>, vector<1x1x4xf32>,
    return
  }
  func.func @transform_0(%arg0: i32) -> (i32, i32) {
    %c0_i32 = arith.constant 0 : i32
    %c0_i32_0 = arith.constant 0 : i32
    return %arg0, %c0_i32 : i32, i32
  }
  func.func @transform_1(%arg0: i32) -> (i32, i32) {
    %c0_i32 = arith.constant 0 : i32
    %c0_i32_0 = arith.constant 0 : i32
    %c0_i32_1 = arith.constant 0 : i32
    return %c0_i32, %c0_i32_0 : i32, i32
  }
  func.func @transform_2(%arg0: i32) -> (i32, i32) {
    %c0_i32 = arith.constant 0 : i32
    %c0_i32_0 = arith.constant 0 : i32
    return %arg0, %c0_i32 : i32, i32
  }
  func.func @transform_3(%arg0: i32) -> (i32, i32, i32) {
    %c0_i32 = arith.constant 0 : i32
    %c0_i32_0 = arith.constant 0 : i32
    %c0_i32_1 = arith.constant 0 : i32
    return %arg0, %c0_i32, %c0_i32_0 : i32, i32, i32
  }
  func.func @transform_4(%arg0: i32) -> (i32, i32, i32) {
    %c0_i32 = arith.constant 0 : i32
    %c0_i32_0 = arith.constant 0 : i32
    %c0_i32_1 = arith.constant 0 : i32
    return %arg0, %c0_i32, %c0_i32_0 : i32, i32, i32
  }
}

module attributes {stable_mosaic.version = 11 : i64} {
  func.func @_bn_act_kernel(%arg0: i32, %arg1: memref<16x128xf32, #tpu.memory_space<vmem>>, %arg2: memref<1x128xf32, #tpu.memory_space<vmem>>, %arg3: memref<1x128xf32, #tpu.memory_space<vmem>>, %arg4: memref<16x128xf32, #tpu.memory_space<vmem>>) attributes {dimension_semantics = [#tpu.dimension_semantics<parallel>], iteration_bounds = array<i64: 1>, scalar_prefetch = 0 : i64, scratch_operands = 0 : i64, tpu.core_type = #tpu.core_type<tc>, window_params = [{transform_indices = @transform_0, window_bounds = array<i64: 16, 128>}, {pipeline_mode = #tpu.pipeline_mode<synchronous>, transform_indices = @transform_1, window_bounds = array<i64: 1, 128>}, {pipeline_mode = #tpu.pipeline_mode<synchronous>, transform_indices = @transform_2, window_bounds = array<i64: 1, 128>}, {transform_indices = @transform_3, window_bounds = array<i64: 16, 128>}]} {
    %c0 = arith.constant 0 : index
    %c0_0 = arith.constant 0 : index
    %0 = vector.load %arg1[%c0, %c0_0] : memref<16x128xf32, #tpu.memory_space<vmem>>, vector<16x128xf32>
    %c0_1 = arith.constant 0 : index
    %c0_2 = arith.constant 0 : index
    %1 = vector.load %arg2[%c0_1, %c0_2] : memref<1x128xf32, #tpu.memory_space<vmem>>, vector<1x128xf32>
    %2 = vector.broadcast %1 : vector<1x128xf32> to vector<16x128xf32>
    %3 = arith.mulf %0, %2 : vector<16x128xf32>
    %c0_3 = arith.constant 0 : index
    %c0_4 = arith.constant 0 : index
    %4 = vector.load %arg3[%c0_3, %c0_4] : memref<1x128xf32, #tpu.memory_space<vmem>>, vector<1x128xf32>
    %5 = vector.broadcast %4 : vector<1x128xf32> to vector<16x128xf32>
    %6 = arith.addf %3, %5 : vector<16x128xf32>
    %cst = arith.constant 0.000000e+00 : f32
    %7 = vector.broadcast %cst : f32 to vector<16x128xf32>
    %8 = arith.maximumf %6, %7 : vector<16x128xf32>
    %c0_5 = arith.constant 0 : index
    %c0_6 = arith.constant 0 : index
    %9 = vector.load %arg4[%c0_5, %c0_6] : memref<16x128xf32, #tpu.memory_space<vmem>>, vector<16x128xf32>
    tpu.vector_store %arg4[%c0_5, %c0_6], %8 {strides = array<i32>} : memref<16x128xf32, #tpu.memory_space<vmem>>, vector<16x128xf32>,
    return
  }
  func.func @transform_0(%arg0: i32) -> (i32, i32) {
    %c0_i32 = arith.constant 0 : i32
    %c0_i32_0 = arith.constant 0 : i32
    return %arg0, %c0_i32 : i32, i32
  }
  func.func @transform_1(%arg0: i32) -> (i32, i32) {
    %c0_i32 = arith.constant 0 : i32
    %c0_i32_0 = arith.constant 0 : i32
    %c0_i32_1 = arith.constant 0 : i32
    return %c0_i32, %c0_i32_0 : i32, i32
  }
  func.func @transform_2(%arg0: i32) -> (i32, i32) {
    %c0_i32 = arith.constant 0 : i32
    %c0_i32_0 = arith.constant 0 : i32
    %c0_i32_1 = arith.constant 0 : i32
    return %c0_i32, %c0_i32_0 : i32, i32
  }
  func.func @transform_3(%arg0: i32) -> (i32, i32) {
    %c0_i32 = arith.constant 0 : i32
    %c0_i32_0 = arith.constant 0 : i32
    return %arg0, %c0_i32 : i32, i32
  }
}

module attributes {stable_mosaic.version = 11 : i64} {
  func.func @_conv3x3_stats_kernel(%arg0: i32, %arg1: memref<1x18x18x4xbf16, #tpu.memory_space<vmem>>, %arg2: memref<9x4x4xbf16, #tpu.memory_space<vmem>>, %arg3: memref<1x256x4xf32, #tpu.memory_space<vmem>>, %arg4: memref<1x1x4xf32, #tpu.memory_space<vmem>>, %arg5: memref<1x1x4xf32, #tpu.memory_space<vmem>>) attributes {dimension_semantics = [#tpu.dimension_semantics<parallel>], iteration_bounds = array<i64: 2>, scalar_prefetch = 0 : i64, scratch_operands = 0 : i64, tpu.core_type = #tpu.core_type<tc>, window_params = [{transform_indices = @transform_0, window_bounds = array<i64: 1, 18, 18, 4>}, {pipeline_mode = #tpu.pipeline_mode<synchronous>, transform_indices = @transform_1, window_bounds = array<i64: 9, 4, 4>}, {transform_indices = @transform_2, window_bounds = array<i64: 1, 256, 4>}, {transform_indices = @transform_3, window_bounds = array<i64: 1, 1, 4>}, {transform_indices = @transform_4, window_bounds = array<i64: 1, 1, 4>}]} {
    %c0 = arith.constant 0 : index
    %c0_0 = arith.constant 0 : index
    %c0_1 = arith.constant 0 : index
    %c0_2 = arith.constant 0 : index
    %0 = vector.load %arg1[%c0, %c0_0, %c0_1, %c0_2] : memref<1x18x18x4xbf16, #tpu.memory_space<vmem>>, vector<1x18x18x4xbf16>
    %1 = vector.shape_cast %0 : vector<1x18x18x4xbf16> to vector<18x18x4xbf16>
    %cst = arith.constant 0.000000e+00 : f32
    %2 = vector.broadcast %cst : f32 to vector<256x4xf32>
    %3 = vector.extract_strided_slice %1 {offsets = [0, 0, 0], sizes = [16, 16, 4], strides = [1, 1, 1]} : vector<18x18x4xbf16> to vector<16x16x4xbf16>
    %4 = vector.shape_cast %3 : vector<16x16x4xbf16> to vector<256x4xbf16>
    %c0_3 = arith.constant 0 : index
    %c0_4 = arith.constant 0 : index
    %c0_5 = arith.constant 0 : index
    %5 = vector.load %arg2[%c0_3, %c0_4, %c0_5] : memref<9x4x4xbf16, #tpu.memory_space<vmem>>, vector<1x4x4xbf16>
    %6 = vector.shape_cast %5 : vector<1x4x4xbf16> to vector<4x4xbf16>
    %cst_6 = arith.constant dense<0.000000e+00> : vector<256x4xf32>
    %7 = tpu.matmul %4, %6, %cst_6 {dimension_numbers = #tpu.dot_dimension_numbers<[1], [0], [0], [1], [0, 0, 1, 1], [], []>} : vector<256x4xbf16>, vector<4x4xbf16>, vector<256x4xf32> -> vector<256x4xf32>
    %8 = arith.addf %2, %7 : vector<256x4xf32>
    %9 = vector.extract_strided_slice %1 {offsets = [0, 1, 0], sizes = [16, 16, 4], strides = [1, 1, 1]} : vector<18x18x4xbf16> to vector<16x16x4xbf16>
    %10 = vector.shape_cast %9 : vector<16x16x4xbf16> to vector<256x4xbf16>
    %c1 = arith.constant 1 : index
    %c0_7 = arith.constant 0 : index
    %c0_8 = arith.constant 0 : index
    %11 = vector.load %arg2[%c1, %c0_7, %c0_8] : memref<9x4x4xbf16, #tpu.memory_space<vmem>>, vector<1x4x4xbf16>
    %12 = vector.shape_cast %11 : vector<1x4x4xbf16> to vector<4x4xbf16>
    %cst_9 = arith.constant dense<0.000000e+00> : vector<256x4xf32>
    %13 = tpu.matmul %10, %12, %cst_9 {dimension_numbers = #tpu.dot_dimension_numbers<[1], [0], [0], [1], [0, 0, 1, 1], [], []>} : vector<256x4xbf16>, vector<4x4xbf16>, vector<256x4xf32> -> vector<256x4xf32>
    %14 = arith.addf %8, %13 : vector<256x4xf32>
    %15 = vector.extract_strided_slice %1 {offsets = [0, 2, 0], sizes = [16, 16, 4], strides = [1, 1, 1]} : vector<18x18x4xbf16> to vector<16x16x4xbf16>
    %16 = vector.shape_cast %15 : vector<16x16x4xbf16> to vector<256x4xbf16>
    %c2 = arith.constant 2 : index
    %c0_10 = arith.constant 0 : index
    %c0_11 = arith.constant 0 : index
    %17 = vector.load %arg2[%c2, %c0_10, %c0_11] : memref<9x4x4xbf16, #tpu.memory_space<vmem>>, vector<1x4x4xbf16>
    %18 = vector.shape_cast %17 : vector<1x4x4xbf16> to vector<4x4xbf16>
    %cst_12 = arith.constant dense<0.000000e+00> : vector<256x4xf32>
    %19 = tpu.matmul %16, %18, %cst_12 {dimension_numbers = #tpu.dot_dimension_numbers<[1], [0], [0], [1], [0, 0, 1, 1], [], []>} : vector<256x4xbf16>, vector<4x4xbf16>, vector<256x4xf32> -> vector<256x4xf32>
    %20 = arith.addf %14, %19 : vector<256x4xf32>
    %21 = vector.extract_strided_slice %1 {offsets = [1, 0, 0], sizes = [16, 16, 4], strides = [1, 1, 1]} : vector<18x18x4xbf16> to vector<16x16x4xbf16>
    %22 = vector.shape_cast %21 : vector<16x16x4xbf16> to vector<256x4xbf16>
    %c3 = arith.constant 3 : index
    %c0_13 = arith.constant 0 : index
    %c0_14 = arith.constant 0 : index
    %23 = vector.load %arg2[%c3, %c0_13, %c0_14] : memref<9x4x4xbf16, #tpu.memory_space<vmem>>, vector<1x4x4xbf16>
    %24 = vector.shape_cast %23 : vector<1x4x4xbf16> to vector<4x4xbf16>
    %cst_15 = arith.constant dense<0.000000e+00> : vector<256x4xf32>
    %25 = tpu.matmul %22, %24, %cst_15 {dimension_numbers = #tpu.dot_dimension_numbers<[1], [0], [0], [1], [0, 0, 1, 1], [], []>} : vector<256x4xbf16>, vector<4x4xbf16>, vector<256x4xf32> -> vector<256x4xf32>
    %26 = arith.addf %20, %25 : vector<256x4xf32>
    %27 = vector.extract_strided_slice %1 {offsets = [1, 1, 0], sizes = [16, 16, 4], strides = [1, 1, 1]} : vector<18x18x4xbf16> to vector<16x16x4xbf16>
    %28 = vector.shape_cast %27 : vector<16x16x4xbf16> to vector<256x4xbf16>
    %c4 = arith.constant 4 : index
    %c0_16 = arith.constant 0 : index
    %c0_17 = arith.constant 0 : index
    %29 = vector.load %arg2[%c4, %c0_16, %c0_17] : memref<9x4x4xbf16, #tpu.memory_space<vmem>>, vector<1x4x4xbf16>
    %30 = vector.shape_cast %29 : vector<1x4x4xbf16> to vector<4x4xbf16>
    %cst_18 = arith.constant dense<0.000000e+00> : vector<256x4xf32>
    %31 = tpu.matmul %28, %30, %cst_18 {dimension_numbers = #tpu.dot_dimension_numbers<[1], [0], [0], [1], [0, 0, 1, 1], [], []>} : vector<256x4xbf16>, vector<4x4xbf16>, vector<256x4xf32> -> vector<256x4xf32>
    %32 = arith.addf %26, %31 : vector<256x4xf32>
    %33 = vector.extract_strided_slice %1 {offsets = [1, 2, 0], sizes = [16, 16, 4], strides = [1, 1, 1]} : vector<18x18x4xbf16> to vector<16x16x4xbf16>
    %34 = vector.shape_cast %33 : vector<16x16x4xbf16> to vector<256x4xbf16>
    %c5 = arith.constant 5 : index
    %c0_19 = arith.constant 0 : index
    %c0_20 = arith.constant 0 : index
    %35 = vector.load %arg2[%c5, %c0_19, %c0_20] : memref<9x4x4xbf16, #tpu.memory_space<vmem>>, vector<1x4x4xbf16>
    %36 = vector.shape_cast %35 : vector<1x4x4xbf16> to vector<4x4xbf16>
    %cst_21 = arith.constant dense<0.000000e+00> : vector<256x4xf32>
    %37 = tpu.matmul %34, %36, %cst_21 {dimension_numbers = #tpu.dot_dimension_numbers<[1], [0], [0], [1], [0, 0, 1, 1], [], []>} : vector<256x4xbf16>, vector<4x4xbf16>, vector<256x4xf32> -> vector<256x4xf32>
    %38 = arith.addf %32, %37 : vector<256x4xf32>
    %39 = vector.extract_strided_slice %1 {offsets = [2, 0, 0], sizes = [16, 16, 4], strides = [1, 1, 1]} : vector<18x18x4xbf16> to vector<16x16x4xbf16>
    %40 = vector.shape_cast %39 : vector<16x16x4xbf16> to vector<256x4xbf16>
    %c6 = arith.constant 6 : index
    %c0_22 = arith.constant 0 : index
    %c0_23 = arith.constant 0 : index
    %41 = vector.load %arg2[%c6, %c0_22, %c0_23] : memref<9x4x4xbf16, #tpu.memory_space<vmem>>, vector<1x4x4xbf16>
    %42 = vector.shape_cast %41 : vector<1x4x4xbf16> to vector<4x4xbf16>
    %cst_24 = arith.constant dense<0.000000e+00> : vector<256x4xf32>
    %43 = tpu.matmul %40, %42, %cst_24 {dimension_numbers = #tpu.dot_dimension_numbers<[1], [0], [0], [1], [0, 0, 1, 1], [], []>} : vector<256x4xbf16>, vector<4x4xbf16>, vector<256x4xf32> -> vector<256x4xf32>
    %44 = arith.addf %38, %43 : vector<256x4xf32>
    %45 = vector.extract_strided_slice %1 {offsets = [2, 1, 0], sizes = [16, 16, 4], strides = [1, 1, 1]} : vector<18x18x4xbf16> to vector<16x16x4xbf16>
    %46 = vector.shape_cast %45 : vector<16x16x4xbf16> to vector<256x4xbf16>
    %c7 = arith.constant 7 : index
    %c0_25 = arith.constant 0 : index
    %c0_26 = arith.constant 0 : index
    %47 = vector.load %arg2[%c7, %c0_25, %c0_26] : memref<9x4x4xbf16, #tpu.memory_space<vmem>>, vector<1x4x4xbf16>
    %48 = vector.shape_cast %47 : vector<1x4x4xbf16> to vector<4x4xbf16>
    %cst_27 = arith.constant dense<0.000000e+00> : vector<256x4xf32>
    %49 = tpu.matmul %46, %48, %cst_27 {dimension_numbers = #tpu.dot_dimension_numbers<[1], [0], [0], [1], [0, 0, 1, 1], [], []>} : vector<256x4xbf16>, vector<4x4xbf16>, vector<256x4xf32> -> vector<256x4xf32>
    %50 = arith.addf %44, %49 : vector<256x4xf32>
    %51 = vector.extract_strided_slice %1 {offsets = [2, 2, 0], sizes = [16, 16, 4], strides = [1, 1, 1]} : vector<18x18x4xbf16> to vector<16x16x4xbf16>
    %52 = vector.shape_cast %51 : vector<16x16x4xbf16> to vector<256x4xbf16>
    %c8 = arith.constant 8 : index
    %c0_28 = arith.constant 0 : index
    %c0_29 = arith.constant 0 : index
    %53 = vector.load %arg2[%c8, %c0_28, %c0_29] : memref<9x4x4xbf16, #tpu.memory_space<vmem>>, vector<1x4x4xbf16>
    %54 = vector.shape_cast %53 : vector<1x4x4xbf16> to vector<4x4xbf16>
    %cst_30 = arith.constant dense<0.000000e+00> : vector<256x4xf32>
    %55 = tpu.matmul %52, %54, %cst_30 {dimension_numbers = #tpu.dot_dimension_numbers<[1], [0], [0], [1], [0, 0, 1, 1], [], []>} : vector<256x4xbf16>, vector<4x4xbf16>, vector<256x4xf32> -> vector<256x4xf32>
    %56 = arith.addf %50, %55 : vector<256x4xf32>
    %c0_31 = arith.constant 0 : index
    %c0_32 = arith.constant 0 : index
    %c0_33 = arith.constant 0 : index
    %57 = vector.load %arg3[%c0_31, %c0_32, %c0_33] : memref<1x256x4xf32, #tpu.memory_space<vmem>>, vector<1x256x4xf32>
    %58 = vector.shape_cast %57 : vector<1x256x4xf32> to vector<256x4xf32>
    %59 = vector.shape_cast %56 : vector<256x4xf32> to vector<1x256x4xf32>
    tpu.vector_store %arg3[%c0_31, %c0_32, %c0_33], %59 {strides = array<i32>} : memref<1x256x4xf32, #tpu.memory_space<vmem>>, vector<1x256x4xf32>,
    %cst_34 = arith.constant dense<0.000000e+00> : vector<4xf32>
    %60 = vector.multi_reduction <add>, %56, %cst_34 [0] : vector<256x4xf32> to vector<4xf32>
    %61 = vector.shape_cast %60 : vector<4xf32> to vector<1x4xf32>
    %c0_35 = arith.constant 0 : index
    %c0_36 = arith.constant 0 : index
    %c0_37 = arith.constant 0 : index
    %62 = vector.load %arg4[%c0_35, %c0_36, %c0_37] : memref<1x1x4xf32, #tpu.memory_space<vmem>>, vector<1x1x4xf32>
    %63 = vector.shape_cast %62 : vector<1x1x4xf32> to vector<1x4xf32>
    %64 = vector.shape_cast %61 : vector<1x4xf32> to vector<1x1x4xf32>
    tpu.vector_store %arg4[%c0_35, %c0_36, %c0_37], %64 {strides = array<i32>} : memref<1x1x4xf32, #tpu.memory_space<vmem>>, vector<1x1x4xf32>,
    %65 = arith.mulf %56, %56 : vector<256x4xf32>
    %cst_38 = arith.constant dense<0.000000e+00> : vector<4xf32>
    %66 = vector.multi_reduction <add>, %65, %cst_38 [0] : vector<256x4xf32> to vector<4xf32>
    %67 = vector.shape_cast %66 : vector<4xf32> to vector<1x4xf32>
    %c0_39 = arith.constant 0 : index
    %c0_40 = arith.constant 0 : index
    %c0_41 = arith.constant 0 : index
    %68 = vector.load %arg5[%c0_39, %c0_40, %c0_41] : memref<1x1x4xf32, #tpu.memory_space<vmem>>, vector<1x1x4xf32>
    %69 = vector.shape_cast %68 : vector<1x1x4xf32> to vector<1x4xf32>
    %70 = vector.shape_cast %67 : vector<1x4xf32> to vector<1x1x4xf32>
    tpu.vector_store %arg5[%c0_39, %c0_40, %c0_41], %70 {strides = array<i32>} : memref<1x1x4xf32, #tpu.memory_space<vmem>>, vector<1x1x4xf32>,
    return
  }
  func.func @transform_0(%arg0: i32) -> (i32, i32, i32, i32) {
    %c0_i32 = arith.constant 0 : i32
    %c0_i32_0 = arith.constant 0 : i32
    %c0_i32_1 = arith.constant 0 : i32
    %c0_i32_2 = arith.constant 0 : i32
    return %arg0, %c0_i32, %c0_i32_0, %c0_i32_1 : i32, i32, i32, i32
  }
  func.func @transform_1(%arg0: i32) -> (i32, i32, i32) {
    %c0_i32 = arith.constant 0 : i32
    %c0_i32_0 = arith.constant 0 : i32
    %c0_i32_1 = arith.constant 0 : i32
    %c0_i32_2 = arith.constant 0 : i32
    return %c0_i32, %c0_i32_0, %c0_i32_1 : i32, i32, i32
  }
  func.func @transform_2(%arg0: i32) -> (i32, i32, i32) {
    %c0_i32 = arith.constant 0 : i32
    %c0_i32_0 = arith.constant 0 : i32
    %c0_i32_1 = arith.constant 0 : i32
    return %arg0, %c0_i32, %c0_i32_0 : i32, i32, i32
  }
  func.func @transform_3(%arg0: i32) -> (i32, i32, i32) {
    %c0_i32 = arith.constant 0 : i32
    %c0_i32_0 = arith.constant 0 : i32
    %c0_i32_1 = arith.constant 0 : i32
    return %arg0, %c0_i32, %c0_i32_0 : i32, i32, i32
  }
  func.func @transform_4(%arg0: i32) -> (i32, i32, i32) {
    %c0_i32 = arith.constant 0 : i32
    %c0_i32_0 = arith.constant 0 : i32
    %c0_i32_1 = arith.constant 0 : i32
    return %arg0, %c0_i32, %c0_i32_0 : i32, i32, i32
  }
}

module attributes {stable_mosaic.version = 11 : i64} {
  func.func @_bnact_gemm_stats_kernel(%arg0: i32, %arg1: memref<256x4xf32, #tpu.memory_space<vmem>>, %arg2: memref<1x4xf32, #tpu.memory_space<vmem>>, %arg3: memref<1x4xf32, #tpu.memory_space<vmem>>, %arg4: memref<4x16xbf16, #tpu.memory_space<vmem>>, %arg5: memref<256x16xf32, #tpu.memory_space<vmem>>, %arg6: memref<1x1x16xf32, #tpu.memory_space<vmem>>, %arg7: memref<1x1x16xf32, #tpu.memory_space<vmem>>) attributes {dimension_semantics = [#tpu.dimension_semantics<parallel>], iteration_bounds = array<i64: 2>, scalar_prefetch = 0 : i64, scratch_operands = 0 : i64, tpu.core_type = #tpu.core_type<tc>, window_params = [{transform_indices = @transform_0, window_bounds = array<i64: 256, 4>}, {pipeline_mode = #tpu.pipeline_mode<synchronous>, transform_indices = @transform_1, window_bounds = array<i64: 1, 4>}, {pipeline_mode = #tpu.pipeline_mode<synchronous>, transform_indices = @transform_2, window_bounds = array<i64: 1, 4>}, {pipeline_mode = #tpu.pipeline_mode<synchronous>, transform_indices = @transform_3, window_bounds = array<i64: 4, 16>}, {transform_indices = @transform_4, window_bounds = array<i64: 256, 16>}, {transform_indices = @transform_5, window_bounds = array<i64: 1, 1, 16>}, {transform_indices = @transform_6, window_bounds = array<i64: 1, 1, 16>}]} {
    %c0 = arith.constant 0 : index
    %c0_0 = arith.constant 0 : index
    %0 = vector.load %arg1[%c0, %c0_0] : memref<256x4xf32, #tpu.memory_space<vmem>>, vector<256x4xf32>
    %c0_1 = arith.constant 0 : index
    %c0_2 = arith.constant 0 : index
    %1 = vector.load %arg2[%c0_1, %c0_2] : memref<1x4xf32, #tpu.memory_space<vmem>>, vector<1x4xf32>
    %2 = vector.broadcast %1 : vector<1x4xf32> to vector<256x4xf32>
    %3 = arith.mulf %0, %2 : vector<256x4xf32>
    %c0_3 = arith.constant 0 : index
    %c0_4 = arith.constant 0 : index
    %4 = vector.load %arg3[%c0_3, %c0_4] : memref<1x4xf32, #tpu.memory_space<vmem>>, vector<1x4xf32>
    %5 = vector.broadcast %4 : vector<1x4xf32> to vector<256x4xf32>
    %6 = arith.addf %3, %5 : vector<256x4xf32>
    %cst = arith.constant 0.000000e+00 : f32
    %7 = vector.broadcast %cst : f32 to vector<256x4xf32>
    %8 = arith.maximumf %6, %7 : vector<256x4xf32>
    %9 = arith.truncf %8 : vector<256x4xf32> to vector<256x4xbf16>
    %c0_5 = arith.constant 0 : index
    %c0_6 = arith.constant 0 : index
    %10 = vector.load %arg4[%c0_5, %c0_6] : memref<4x16xbf16, #tpu.memory_space<vmem>>, vector<4x16xbf16>
    %cst_7 = arith.constant dense<0.000000e+00> : vector<256x16xf32>
    %11 = tpu.matmul %9, %10, %cst_7 {dimension_numbers = #tpu.dot_dimension_numbers<[1], [0], [0], [1], [0, 0, 1, 1], [], []>} : vector<256x4xbf16>, vector<4x16xbf16>, vector<256x16xf32> -> vector<256x16xf32>
    %c0_8 = arith.constant 0 : index
    %c0_9 = arith.constant 0 : index
    %12 = vector.load %arg5[%c0_8, %c0_9] : memref<256x16xf32, #tpu.memory_space<vmem>>, vector<256x16xf32>
    tpu.vector_store %arg5[%c0_8, %c0_9], %11 {strides = array<i32>} : memref<256x16xf32, #tpu.memory_space<vmem>>, vector<256x16xf32>,
    %cst_10 = arith.constant dense<0.000000e+00> : vector<16xf32>
    %13 = vector.multi_reduction <add>, %11, %cst_10 [0] : vector<256x16xf32> to vector<16xf32>
    %14 = vector.shape_cast %13 : vector<16xf32> to vector<1x16xf32>
    %c0_11 = arith.constant 0 : index
    %c0_12 = arith.constant 0 : index
    %c0_13 = arith.constant 0 : index
    %15 = vector.load %arg6[%c0_11, %c0_12, %c0_13] : memref<1x1x16xf32, #tpu.memory_space<vmem>>, vector<1x1x16xf32>
    %16 = vector.shape_cast %15 : vector<1x1x16xf32> to vector<1x16xf32>
    %17 = vector.shape_cast %14 : vector<1x16xf32> to vector<1x1x16xf32>
    tpu.vector_store %arg6[%c0_11, %c0_12, %c0_13], %17 {strides = array<i32>} : memref<1x1x16xf32, #tpu.memory_space<vmem>>, vector<1x1x16xf32>,
    %18 = arith.mulf %11, %11 : vector<256x16xf32>
    %cst_14 = arith.constant dense<0.000000e+00> : vector<16xf32>
    %19 = vector.multi_reduction <add>, %18, %cst_14 [0] : vector<256x16xf32> to vector<16xf32>
    %20 = vector.shape_cast %19 : vector<16xf32> to vector<1x16xf32>
    %c0_15 = arith.constant 0 : index
    %c0_16 = arith.constant 0 : index
    %c0_17 = arith.constant 0 : index
    %21 = vector.load %arg7[%c0_15, %c0_16, %c0_17] : memref<1x1x16xf32, #tpu.memory_space<vmem>>, vector<1x1x16xf32>
    %22 = vector.shape_cast %21 : vector<1x1x16xf32> to vector<1x16xf32>
    %23 = vector.shape_cast %20 : vector<1x16xf32> to vector<1x1x16xf32>
    tpu.vector_store %arg7[%c0_15, %c0_16, %c0_17], %23 {strides = array<i32>} : memref<1x1x16xf32, #tpu.memory_space<vmem>>, vector<1x1x16xf32>,
    return
  }
  func.func @transform_0(%arg0: i32) -> (i32, i32) {
    %c0_i32 = arith.constant 0 : i32
    %c0_i32_0 = arith.constant 0 : i32
    return %arg0, %c0_i32 : i32, i32
  }
  func.func @transform_1(%arg0: i32) -> (i32, i32) {
    %c0_i32 = arith.constant 0 : i32
    %c0_i32_0 = arith.constant 0 : i32
    %c0_i32_1 = arith.constant 0 : i32
    return %c0_i32, %c0_i32_0 : i32, i32
  }
  func.func @transform_2(%arg0: i32) -> (i32, i32) {
    %c0_i32 = arith.constant 0 : i32
    %c0_i32_0 = arith.constant 0 : i32
    %c0_i32_1 = arith.constant 0 : i32
    return %c0_i32, %c0_i32_0 : i32, i32
  }
  func.func @transform_3(%arg0: i32) -> (i32, i32) {
    %c0_i32 = arith.constant 0 : i32
    %c0_i32_0 = arith.constant 0 : i32
    %c0_i32_1 = arith.constant 0 : i32
    return %c0_i32, %c0_i32_0 : i32, i32
  }
  func.func @transform_4(%arg0: i32) -> (i32, i32) {
    %c0_i32 = arith.constant 0 : i32
    %c0_i32_0 = arith.constant 0 : i32
    return %arg0, %c0_i32 : i32, i32
  }
  func.func @transform_5(%arg0: i32) -> (i32, i32, i32) {
    %c0_i32 = arith.constant 0 : i32
    %c0_i32_0 = arith.constant 0 : i32
    %c0_i32_1 = arith.constant 0 : i32
    return %arg0, %c0_i32, %c0_i32_0 : i32, i32, i32
  }
  func.func @transform_6(%arg0: i32) -> (i32, i32, i32) {
    %c0_i32 = arith.constant 0 : i32
    %c0_i32_0 = arith.constant 0 : i32
    %c0_i32_1 = arith.constant 0 : i32
    return %arg0, %c0_i32, %c0_i32_0 : i32, i32, i32
  }
}

module attributes {stable_mosaic.version = 11 : i64} {
  func.func @_bn_add_relu_kernel(%arg0: i32, %arg1: memref<64x128xf32, #tpu.memory_space<vmem>>, %arg2: memref<1x128xf32, #tpu.memory_space<vmem>>, %arg3: memref<1x128xf32, #tpu.memory_space<vmem>>, %arg4: memref<64x128xf32, #tpu.memory_space<vmem>>, %arg5: memref<64x128xf32, #tpu.memory_space<vmem>>) attributes {dimension_semantics = [#tpu.dimension_semantics<parallel>], iteration_bounds = array<i64: 1>, scalar_prefetch = 0 : i64, scratch_operands = 0 : i64, tpu.core_type = #tpu.core_type<tc>, window_params = [{transform_indices = @transform_0, window_bounds = array<i64: 64, 128>}, {pipeline_mode = #tpu.pipeline_mode<synchronous>, transform_indices = @transform_1, window_bounds = array<i64: 1, 128>}, {pipeline_mode = #tpu.pipeline_mode<synchronous>, transform_indices = @transform_2, window_bounds = array<i64: 1, 128>}, {transform_indices = @transform_3, window_bounds = array<i64: 64, 128>}, {transform_indices = @transform_4, window_bounds = array<i64: 64, 128>}]} {
    %c0 = arith.constant 0 : index
    %c0_0 = arith.constant 0 : index
    %0 = vector.load %arg1[%c0, %c0_0] : memref<64x128xf32, #tpu.memory_space<vmem>>, vector<64x128xf32>
    %c0_1 = arith.constant 0 : index
    %c0_2 = arith.constant 0 : index
    %1 = vector.load %arg2[%c0_1, %c0_2] : memref<1x128xf32, #tpu.memory_space<vmem>>, vector<1x128xf32>
    %2 = vector.broadcast %1 : vector<1x128xf32> to vector<64x128xf32>
    %3 = arith.mulf %0, %2 : vector<64x128xf32>
    %c0_3 = arith.constant 0 : index
    %c0_4 = arith.constant 0 : index
    %4 = vector.load %arg3[%c0_3, %c0_4] : memref<1x128xf32, #tpu.memory_space<vmem>>, vector<1x128xf32>
    %5 = vector.broadcast %4 : vector<1x128xf32> to vector<64x128xf32>
    %6 = arith.addf %3, %5 : vector<64x128xf32>
    %c0_5 = arith.constant 0 : index
    %c0_6 = arith.constant 0 : index
    %7 = vector.load %arg4[%c0_5, %c0_6] : memref<64x128xf32, #tpu.memory_space<vmem>>, vector<64x128xf32>
    %8 = arith.addf %6, %7 : vector<64x128xf32>
    %cst = arith.constant 0.000000e+00 : f32
    %9 = vector.broadcast %cst : f32 to vector<64x128xf32>
    %10 = arith.maximumf %8, %9 : vector<64x128xf32>
    %c0_7 = arith.constant 0 : index
    %c0_8 = arith.constant 0 : index
    %11 = vector.load %arg5[%c0_7, %c0_8] : memref<64x128xf32, #tpu.memory_space<vmem>>, vector<64x128xf32>
    tpu.vector_store %arg5[%c0_7, %c0_8], %10 {strides = array<i32>} : memref<64x128xf32, #tpu.memory_space<vmem>>, vector<64x128xf32>,
    return
  }
  func.func @transform_0(%arg0: i32) -> (i32, i32) {
    %c0_i32 = arith.constant 0 : i32
    %c0_i32_0 = arith.constant 0 : i32
    return %arg0, %c0_i32 : i32, i32
  }
  func.func @transform_1(%arg0: i32) -> (i32, i32) {
    %c0_i32 = arith.constant 0 : i32
    %c0_i32_0 = arith.constant 0 : i32
    %c0_i32_1 = arith.constant 0 : i32
    return %c0_i32, %c0_i32_0 : i32, i32
  }
  func.func @transform_2(%arg0: i32) -> (i32, i32) {
    %c0_i32 = arith.constant 0 : i32
    %c0_i32_0 = arith.constant 0 : i32
    %c0_i32_1 = arith.constant 0 : i32
    return %c0_i32, %c0_i32_0 : i32, i32
  }
  func.func @transform_3(%arg0: i32) -> (i32, i32) {
    %c0_i32 = arith.constant 0 : i32
    %c0_i32_0 = arith.constant 0 : i32
    return %arg0, %c0_i32 : i32, i32
  }
  func.func @transform_4(%arg0: i32) -> (i32, i32) {
    %c0_i32 = arith.constant 0 : i32
    %c0_i32_0 = arith.constant 0 : i32
    return %arg0, %c0_i32 : i32, i32
  }
}

</mosaic_0001>

<bundles_post_ra>
// kernel: _lambda_.5
= control target key start
LH: loop header
LB: loop body
LE: loop exit
PB: predicated region body
PF: predicated region fallthrough
CT: control target
= control target key end

     0   :  { %s1016_s15 = smov 0   ;;  %s1311_s0 = inlined_call_operand.vmem [shape: bf16[512,16], index: 0, kind: input, shape index: {}]   ;;  %s1312_s1 = inlined_call_operand.vmem [shape: bf16[16,4], index: 1, kind: input, shape index: {}]   ;;  %s1313_s2 = inlined_call_operand.vmem [shape: f32[512,4], index: 2, kind: output, shape index: {0}]   ;;  %s1314_s3 = inlined_call_operand.vmem [shape: f32[2,1,4], index: 3, kind: output, shape index: {1}]   ;;  %s1315_s4 = inlined_call_operand.vmem [shape: f32[2,1,4], index: 4, kind: output, shape index: {2}]  }
   0x1 LB: > { %s1022_s16 = sadd.s32 4294967295, %s989_s15   ;;  %p865_p0 = scmp.ge.s32.totalorder %s989_s15, 1  ;;  %s989_s15 = sphi %s1016_s15, %s15_s15  }
   0x2   : > { %p168_p1 = scmp.lt.s32.totalorder %s989_s15, 3 }
   0x4   : > { %p169_p2 = pnand %p865_p0, %p168_p1 }
   0x5   : > { %s866_s19 = sshll.u32 (!%p169_p2), %s1022_s16, 5  ;;  %p212_p4 = scmp.lt.s32.totalorder (!%p169_p2), %s1022_s16, 1 }
   0x6   : > { %172 = sbr.rel (%p169_p2) target bundleno = 293 (0x125), region = 28  ;;  %p201_p3 = scmp.lt.s32.totalorder (!%p169_p2), %s866_s19, 63 }
   0xb   : > { %v966_v0 = vld [vmem:[%s1312_s1] sm:$0xff]   ;;  %s1317_s19 = smov (!%p201_p3, %s866_s19), 63  ;;  %vm339_vm0 = vcmask 130048   ;;  %vm549_vm1 = vcmask 31744   ;;  %s1319_s16 = smov (!%p212_p4, %s1022_s16), 1  ;;  %vm651_vm2 = vcmask 24576  }
   0xc   : > { %922 = vmatprep.subr.bf16.mxu0 %v966_v0  ;;  %956 = vmatprep.subr.bf16.mxu1 %v966_v0  ;;  %s867_s20 = sshll.u32 %s1317_s19, 2  ;;  %s869_s24 = sshll.u32 %s1317_s19, 3 }
   0xd   : > { %923 = vmatpush3.bf16.msra.mxu0 %v966_v0  ;;  %957 = vmatpush3.bf16.msra.mxu1 %v966_v0  ;;  %s1036_s23 = scalar_lea.vmem %s1311_s0, %s867_s20  ;;  %s1074_s27 = scalar_lea.vmem %s1313_s2, %s869_s24 }
   0xe   : > { %v967_v1 = vld [vmem:[%s1036_s23] sm:$0xff]   ;;  %v968_v2 = vld [vmem:[%s1036_s23 + $0x8] sm:$0xff]   ;;  %v969_v3 = vld [vmem:[%s1036_s23 + $0x10] sm:$0xff]   ;;  %s214_s30 = scalar_lea.vmem %s1314_s3, %s1319_s16  ;;  %s217_s7 = scalar_lea.vmem %s1315_s4, %s1319_s16 }
   0xf   : > { %924 = vmatprep.mubr.msk.bf16.mxu0 %vm339_vm0, %v967_v1  ;;  %v970_v4 = vld [vmem:[%s1036_s23 + $0x18] sm:$0xff]   ;;  %v971_v5 = vld [vmem:[%s1036_s23 + $0x20] sm:$0xff]   ;;  %v976_v7 = vld [vmem:[%s1036_s23 + $0x48] sm:$0xff]  }
  0x10   : > { %925 = vmatmul.mubr.msk.bf16.vlgmr.msra.gmra.mxu0 %vm339_vm0, %v968_v2  ;;  %v975_v6 = vld [vmem:[%s1036_s23 + $0x40] sm:$0xff]   ;;  %v977_v8 = vld [vmem:[%s1036_s23 + $0x50] sm:$0xff]   ;;  %v972_v9 = vld [vmem:[%s1036_s23 + $0x28] sm:$0xff]  }
  0x11   : > { %928 = vmatprep.mubr.msk.bf16.mxu0 %vm339_vm0, %v969_v3  ;;  %940 = vmatprep.mubr.msk.bf16.mxu1 %vm339_vm0, %v975_v6  ;;  %v978_v10 = vld [vmem:[%s1036_s23 + $0x58] sm:$0xff]   ;;  %v973_v11 = vld [vmem:[%s1036_s23 + $0x30] sm:$0xff]   ;;  %v979_v12 = vld [vmem:[%s1036_s23 + $0x60] sm:$0xff]  }
  0x12   : > { %941 = vmatmul.mubr.msk.bf16.vlgmr.msra.gmra.mxu1 %vm339_vm0, %v976_v7  ;;  %v974_v13 = vld [vmem:[%s1036_s23 + $0x38] sm:$0xff]   ;;  %v980_v14 = vld [vmem:[%s1036_s23 + $0x68] sm:$0xff]   ;;  %v981_v15 = vld [vmem:[%s1036_s23 + $0x70] sm:$0xff]  }
  0x13   : > { %944 = vmatprep.mubr.msk.bf16.mxu1 %vm339_vm0, %v977_v8  ;;  %v982_v16 = vld [vmem:[%s1036_s23 + $0x78] sm:$0xff]  }
  0x18   : > { %929 = vmatmul.mubr.msk.bf16.gmra.mxu0 %vm339_vm0, %v970_v4 }
  0x19   : > { %932 = vmatprep.mubr.msk.bf16.mxu0 %vm339_vm0, %v971_v5 }
  0x1a   : > { %945 = vmatmul.mubr.msk.bf16.gmra.mxu1 %vm339_vm0, %v978_v10 }
  0x1b   : > { %948 = vmatprep.mubr.msk.bf16.mxu1 %vm339_vm0, %v979_v12 }
  0x20   : > { %933 = vmatmul.mubr.msk.bf16.gmra.mxu0 %vm339_vm0, %v972_v9 }
  0x21   : > { %936 = vmatprep.mubr.msk.bf16.mxu0 %vm339_vm0, %v973_v11 }
  0x22   : > { %949 = vmatmul.mubr.msk.bf16.gmra.mxu1 %vm339_vm0, %v980_v14 }
  0x23   : > { %952 = vmatprep.mubr.msk.bf16.mxu1 %vm339_vm0, %v981_v15 }
  0x28   : > { %937 = vmatmul.mubr.msk.bf16.gmra.mxu0 %vm339_vm0, %v974_v13 }
  0x2a   : > { %953 = vmatmul.mubr.msk.bf16.gmra.mxu1 %vm339_vm0, %v982_v16 }
  0xd0   : > { %v926_v17 = vpop.f32.mrf.mxu0 }
  0xd1   : > { %552 = vst.msk [vmem:[%s1074_s27 + $0x10] sm:$0xff] %vm549_vm1, %v926_v17  ;;  %v655_v22 = vmul.f32 %v926_v17, %v926_v17  ;;  %v585_v29 = vsel %vm549_vm1, %v926_v17, 0.0 }
  0xd2   : > { %v422_v18 = vpop.f32.mrf.mxu0  ;;  %v1086_v28 = vpop.f32.mrf.mxu1 }
  0xd3   : > { %550 = vst.msk [vmem:[%s1074_s27] sm:$0xff] %vm549_vm1, %v422_v18  ;;  %v653_v20 = vmul.f32 %v422_v18, %v422_v18  ;;  %v582_v23 = vsel %vm549_vm1, %v422_v18, 0.0  ;;  %568 = vst.msk [vmem:[%s1074_s27 + $0x90] sm:$0xff] %vm549_vm1, %v1086_v28  ;;  %v688_v37 = vsel %vm549_vm1, %v655_v22, 0.0 }
  0xd4   : > { %v927_v19 = vpop.f32.mrf.mxu0  ;;  %v1096_v36 = vpop.f32.mrf.mxu1 }
  0xd5   : > { %553 = vst.msk [vmem:[%s1074_s27 + $0x18] sm:$0xff] %vm549_vm1, %v927_v19  ;;  %v685_v30 = vsel %vm549_vm1, %v653_v20, 0.0  ;;  %v656_v31 = vmul.f32 %v927_v19, %v927_v19  ;;  %v587_v38 = vsel %vm549_vm1, %v927_v19, 0.0  ;;  %566 = vst.msk [vmem:[%s1074_s27 + $0x80] sm:$0xff] %vm549_vm1, %v1096_v36 }
  0xd6   : > { %v425_v21 = vpop.f32.mrf.mxu0  ;;  %v1105_v43 = vpop.f32.mrf.mxu1 }
  0xd7   : > { %551 = vst.msk [vmem:[%s1074_s27 + $0x8] sm:$0xff] %vm549_vm1, %v425_v21  ;;  %v583_v24 = vsel %vm549_vm1, %v425_v21, 0.0  ;;  %v654_v25 = vmul.f32 %v425_v21, %v425_v21  ;;  %v690_v44 = vsel %vm549_vm1, %v656_v31, 0.0  ;;  %569 = vst.msk [vmem:[%s1074_s27 + $0x98] sm:$0xff] %vm549_vm1, %v1105_v43 }
  0xd8   : > { %v584_v26 = vadd.f32 %v583_v24, %v582_v23  ;;  %v930_v27 = vpop.f32.mrf.mxu0  ;;  %v1114_v49 = vpop.f32.mrf.mxu1 }
  0xd9   : > { %v686_v32 = vsel %vm549_vm1, %v654_v25, 0.0  ;;  %556 = vst.msk [vmem:[%s1074_s27 + $0x30] sm:$0xff] %vm549_vm1, %v930_v27  ;;  %v659_v50 = vmul.f32 %v930_v27, %v930_v27  ;;  %567 = vst.msk [vmem:[%s1074_s27 + $0x88] sm:$0xff] %vm549_vm1, %v1114_v49  ;;  %v593_v58 = vsel %vm549_vm1, %v930_v27, 0.0 }
  0xda   : > { %v586_v33 = vadd.f32 %v585_v29, %v584_v26  ;;  %v687_v34 = vadd.f32 %v686_v32, %v685_v30  ;;  %v438_v35 = vpop.f32.mrf.mxu0  ;;  %v1123_v57 = vpop.f32.mrf.mxu1 }
  0xdb   : > { %554 = vst.msk [vmem:[%s1074_s27 + $0x20] sm:$0xff] %vm549_vm1, %v438_v35  ;;  %v657_v39 = vmul.f32 %v438_v35, %v438_v35  ;;  %v589_v45 = vsel %vm549_vm1, %v438_v35, 0.0  ;;  %572 = vst.msk [vmem:[%s1074_s27 + $0xb0] sm:$0xff] %vm549_vm1, %v1123_v57  ;;  %v696_v1 = vsel %vm549_vm1, %v659_v50, 0.0 }
  0xdc   : > { %v689_v40 = vadd.f32 %v688_v37, %v687_v34  ;;  %v588_v41 = vadd.f32 %v587_v38, %v586_v33  ;;  %v931_v42 = vpop.f32.mrf.mxu0  ;;  %v1132_v0 = vpop.f32.mrf.mxu1 }
  0xdd   : > { %557 = vst.msk [vmem:[%s1074_s27 + $0x38] sm:$0xff] %vm549_vm1, %v931_v42  ;;  %v692_v51 = vsel %vm549_vm1, %v657_v39, 0.0  ;;  %v660_v59 = vmul.f32 %v931_v42, %v931_v42  ;;  %v595_v2 = vsel %vm549_vm1, %v931_v42, 0.0  ;;  %570 = vst.msk [vmem:[%s1074_s27 + $0xa0] sm:$0xff] %vm549_vm1, %v1132_v0 }
  0xde   : > { %v590_v46 = vadd.f32 %v589_v45, %v588_v41  ;;  %v691_v47 = vadd.f32 %v690_v44, %v689_v40  ;;  %v441_v48 = vpop.f32.mrf.mxu0  ;;  %v1141_v7 = vpop.f32.mrf.mxu1 }
  0xdf   : > { %555 = vst.msk [vmem:[%s1074_s27 + $0x28] sm:$0xff] %vm549_vm1, %v441_v48  ;;  %v591_v52 = vsel %vm549_vm1, %v441_v48, 0.0  ;;  %v658_v53 = vmul.f32 %v441_v48, %v441_v48  ;;  %v698_v8 = vsel %vm549_vm1, %v660_v59, 0.0  ;;  %573 = vst.msk [vmem:[%s1074_s27 + $0xb8] sm:$0xff] %vm549_vm1, %v1141_v7 }
  0xe0   : > { %v693_v54 = vadd.f32 %v692_v51, %v691_v47  ;;  %v592_v55 = vadd.f32 %v591_v52, %v590_v46  ;;  %v934_v56 = vpop.f32.mrf.mxu0  ;;  %v1150_v13 = vpop.f32.mrf.mxu1 }
  0xe1   : > { %v694_v60 = vsel %vm549_vm1, %v658_v53, 0.0  ;;  %560 = vst.msk [vmem:[%s1074_s27 + $0x50] sm:$0xff] %vm549_vm1, %v934_v56  ;;  %v663_v14 = vmul.f32 %v934_v56, %v934_v56  ;;  %571 = vst.msk [vmem:[%s1074_s27 + $0xa8] sm:$0xff] %vm549_vm1, %v1150_v13  ;;  %v601_v22 = vsel %vm549_vm1, %v934_v56, 0.0 }
  0xe2   : > { %v594_v61 = vadd.f32 %v593_v58, %v592_v55  ;;  %v695_v62 = vadd.f32 %v694_v60, %v693_v54  ;;  %v454_v63 = vpop.f32.mrf.mxu0  ;;  %v1159_v21 = vpop.f32.mrf.mxu1 }
  0xe3   : > { %558 = vst.msk [vmem:[%s1074_s27 + $0x40] sm:$0xff] %vm549_vm1, %v454_v63  ;;  %v661_v3 = vmul.f32 %v454_v63, %v454_v63  ;;  %v597_v9 = vsel %vm549_vm1, %v454_v63, 0.0  ;;  %576 = vst.msk [vmem:[%s1074_s27 + $0xd0] sm:$0xff] %vm549_vm1, %v1159_v21  ;;  %v704_v30 = vsel %vm549_vm1, %v663_v14, 0.0 }
  0xe4   : > { %v697_v4 = vadd.f32 %v696_v1, %v695_v62  ;;  %v596_v5 = vadd.f32 %v595_v2, %v594_v61  ;;  %v935_v6 = vpop.f32.mrf.mxu0  ;;  %v1168_v29 = vpop.f32.mrf.mxu1  ;;  %v669_v62 = vmul.f32 %v1096_v36, %v1096_v36 }
  0xe5   : > { %561 = vst.msk [vmem:[%s1074_s27 + $0x58] sm:$0xff] %vm549_vm1, %v935_v6  ;;  %v700_v15 = vsel %vm549_vm1, %v661_v3, 0.0  ;;  %v664_v23 = vmul.f32 %v935_v6, %v935_v6  ;;  %v603_v31 = vsel %vm549_vm1, %v935_v6, 0.0  ;;  %574 = vst.msk [vmem:[%s1074_s27 + $0xc0] sm:$0xff] %vm549_vm1, %v1168_v29 }
  0xe6   : > { %v598_v10 = vadd.f32 %v597_v9, %v596_v5  ;;  %v699_v11 = vadd.f32 %v698_v8, %v697_v4  ;;  %v457_v12 = vpop.f32.mrf.mxu0  ;;  %v1177_v37 = vpop.f32.mrf.mxu1  ;;  %v613_v4 = vsel %vm549_vm1, %v1096_v36, 0.0  ;;  %v670_v5 = vmul.f32 %v1114_v49, %v1114_v49 }
  0xe7   : > { %559 = vst.msk [vmem:[%s1074_s27 + $0x48] sm:$0xff] %vm549_vm1, %v457_v12  ;;  %v599_v16 = vsel %vm549_vm1, %v457_v12, 0.0  ;;  %v662_v17 = vmul.f32 %v457_v12, %v457_v12  ;;  %v706_v38 = vsel %vm549_vm1, %v664_v23, 0.0  ;;  %577 = vst.msk [vmem:[%s1074_s27 + $0xd8] sm:$0xff] %vm549_vm1, %v1177_v37  ;;  %v615_v12 = vsel %vm549_vm1, %v1114_v49, 0.0 }
  0xe8   : > { %v701_v18 = vadd.f32 %v700_v15, %v699_v11  ;;  %v600_v19 = vadd.f32 %v599_v16, %v598_v10  ;;  %v938_v20 = vpop.f32.mrf.mxu0  ;;  %v1186_v44 = vpop.f32.mrf.mxu1  ;;  %v671_v10 = vmul.f32 %v1086_v28, %v1086_v28  ;;  %v716_v11 = vsel %vm549_vm1, %v669_v62, 0.0 }
  0xe9   : > { %v702_v24 = vsel %vm549_vm1, %v662_v17, 0.0  ;;  %564 = vst.msk [vmem:[%s1074_s27 + $0x70] sm:$0xff] %vm549_vm1, %v938_v20  ;;  %v667_v45 = vmul.f32 %v938_v20, %v938_v20  ;;  %575 = vst.msk [vmem:[%s1074_s27 + $0xc8] sm:$0xff] %vm549_vm1, %v1186_v44  ;;  %v609_v53 = vsel %vm549_vm1, %v938_v20, 0.0  ;;  %v617_v15 = vsel %vm549_vm1, %v1086_v28, 0.0 }
  0xea   : > { %v602_v25 = vadd.f32 %v601_v22, %v600_v19  ;;  %v703_v26 = vadd.f32 %v702_v24, %v701_v18  ;;  %v470_v27 = vpop.f32.mrf.mxu0  ;;  %v1195_v52 = vpop.f32.mrf.mxu1  ;;  %v672_v16 = vmul.f32 %v1105_v43, %v1105_v43  ;;  %v718_v17 = vsel %vm549_vm1, %v670_v5, 0.0 }
  0xeb   : > { %562 = vst.msk [vmem:[%s1074_s27 + $0x60] sm:$0xff] %vm549_vm1, %v470_v27  ;;  %v665_v32 = vmul.f32 %v470_v27, %v470_v27  ;;  %v605_v39 = vsel %vm549_vm1, %v470_v27, 0.0  ;;  %580 = vst.msk [vmem:[%s1074_s27 + $0xf0] sm:$0xff] %vm549_vm1, %v1195_v52  ;;  %v712_v60 = vsel %vm549_vm1, %v667_v45, 0.0  ;;  %v720_v20 = vsel %vm549_vm1, %v671_v10, 0.0 }
  0xec   : > { %v705_v33 = vadd.f32 %v704_v30, %v703_v26  ;;  %v604_v34 = vadd.f32 %v603_v31, %v602_v25  ;;  %v939_v35 = vpop.f32.mrf.mxu0  ;;  %v1202_v59 = vpop.f32.mrf.mxu1  ;;  %v619_v49 = vsel %vm549_vm1, %v1105_v43, 0.0  ;;  %v673_v22 = vmul.f32 %v1132_v0, %v1132_v0 }
  0xed   : > { %565 = vst.msk [vmem:[%s1074_s27 + $0x78] sm:$0xff] %vm549_vm1, %v939_v35  ;;  %v708_v46 = vsel %vm549_vm1, %v665_v32, 0.0  ;;  %v668_v54 = vmul.f32 %v939_v35, %v939_v35  ;;  %v611_v61 = vsel %vm549_vm1, %v939_v35, 0.0  ;;  %578 = vst.msk [vmem:[%s1074_s27 + $0xe0] sm:$0xff] %vm549_vm1, %v1202_v59  ;;  %v722_v25 = vsel %vm549_vm1, %v672_v16, 0.0 }
  0xee   : > { %v606_v40 = vadd.f32 %v605_v39, %v604_v34  ;;  %v707_v41 = vadd.f32 %v706_v38, %v705_v33  ;;  %v473_v42 = vpop.f32.mrf.mxu0  ;;  %v1211_v2 = vpop.f32.mrf.mxu1  ;;  %v621_v28 = vsel %vm549_vm1, %v1132_v0, 0.0  ;;  %v674_v26 = vmul.f32 %v1150_v13, %v1150_v13 }
  0xef   : > { %563 = vst.msk [vmem:[%s1074_s27 + $0x68] sm:$0xff] %vm549_vm1, %v473_v42  ;;  %v607_v47 = vsel %vm549_vm1, %v473_v42, 0.0  ;;  %v666_v48 = vmul.f32 %v473_v42, %v473_v42  ;;  %v714_v3 = vsel %vm549_vm1, %v668_v54, 0.0  ;;  %581 = vst.msk [vmem:[%s1074_s27 + $0xf8] sm:$0xff] %vm549_vm1, %v1211_v2  ;;  %v675_v31 = vmul.f32 %v1123_v57, %v1123_v57 }
  0xf0   : > { %v709_v50 = vadd.f32 %v708_v46, %v707_v41  ;;  %v608_v51 = vadd.f32 %v607_v47, %v606_v40  ;;  %v1221_v9 = vpop.f32.mrf.mxu1  ;;  %v724_v43 = vsel %vm549_vm1, %v673_v22, 0.0  ;;  %v623_v32 = vsel %vm549_vm1, %v1150_v13, 0.0 }
  0xf1   : > { %v710_v55 = vsel %vm549_vm1, %v666_v48, 0.0  ;;  %579 = vst.msk [vmem:[%s1074_s27 + $0xe8] sm:$0xff] %vm549_vm1, %v1221_v9  ;;  %v625_v35 = vsel %vm549_vm1, %v1123_v57, 0.0  ;;  %v676_v0 = vmul.f32 %v1141_v7, %v1141_v7  ;;  %v726_v38 = vsel %vm549_vm1, %v674_v26, 0.0 }
  0xf2   : > { %v610_v56 = vadd.f32 %v609_v53, %v608_v51  ;;  %v711_v58 = vadd.f32 %v710_v55, %v709_v50  ;;  %v728_v41 = vsel %vm549_vm1, %v675_v31, 0.0  ;;  %v627_v42 = vsel %vm549_vm1, %v1141_v7, 0.0 }
  0xf3   : > { %v677_v13 = vmul.f32 %v1168_v29, %v1168_v29  ;;  %v730_v47 = vsel %vm549_vm1, %v676_v0, 0.0  ;;  %v629_v57 = vsel %vm549_vm1, %v1168_v29, 0.0  ;;  %v678_v48 = vmul.f32 %v1186_v44, %v1186_v44 }
  0xf4   : > { %v612_v63 = vadd.f32 %v611_v61, %v610_v56  ;;  %v713_v1 = vadd.f32 %v712_v60, %v711_v58  ;;  %v679_v53 = vmul.f32 %v1159_v21, %v1159_v21  ;;  %v631_v54 = vsel %vm549_vm1, %v1186_v44, 0.0 }
  0xf5   : > { %v732_v7 = vsel %vm549_vm1, %v677_v13, 0.0  ;;  %v633_v58 = vsel %vm549_vm1, %v1159_v21, 0.0  ;;  %v680_v29 = vmul.f32 %v1177_v37, %v1177_v37  ;;  %v734_v60 = vsel %vm549_vm1, %v678_v48, 0.0 }
  0xf6   : > { %v715_v6 = vadd.f32 %v714_v3, %v713_v1  ;;  %v614_v8 = vadd.f32 %v613_v4, %v612_v63  ;;  %v736_v63 = vsel %vm549_vm1, %v679_v53, 0.0  ;;  %v635_v1 = vsel %vm549_vm1, %v1177_v37, 0.0 }
  0xf7   : > { %v681_v44 = vmul.f32 %v1202_v59, %v1202_v59  ;;  %v738_v5 = vsel %vm549_vm1, %v680_v29, 0.0  ;;  %v637_v21 = vsel %vm549_vm1, %v1202_v59, 0.0  ;;  %v684_v59 = vmul.f32 %v1211_v2, %v1211_v2 }
  0xf8   : > { %v616_v36 = vadd.f32 %v615_v12, %v614_v8  ;;  %v717_v14 = vadd.f32 %v716_v11, %v715_v6  ;;  %v682_v6 = vmul.f32 %v1221_v9, %v1221_v9  ;;  %v683_v11 = vmul.f32 %v1195_v52, %v1195_v52 }
  0xf9   : > { %v740_v37 = vsel %vm549_vm1, %v681_v44, 0.0  ;;  %v639_v12 = vsel %vm549_vm1, %v1221_v9, 0.0  ;;  %v746_v22 = vsel %vm549_vm1, %v684_v59, 0.0 }
  0xfa   : > { %v618_v18 = vadd.f32 %v617_v15, %v616_v36  ;;  %v719_v19 = vadd.f32 %v718_v17, %v717_v14  ;;  %v641_v15 = vsel %vm549_vm1, %v1195_v52, 0.0  ;;  %v742_v16 = vsel %vm549_vm1, %v682_v6, 0.0 }
  0xfc   : > { %v721_v23 = vadd.f32 %v720_v20, %v719_v19  ;;  %v620_v24 = vadd.f32 %v619_v49, %v618_v18  ;;  %v744_v19 = vsel %vm549_vm1, %v683_v11, 0.0  ;;  %v643_v20 = vsel %vm549_vm1, %v1211_v2, 0.0 }
  0xfe   : > { %v622_v27 = vadd.f32 %v621_v28, %v620_v24  ;;  %v723_v30 = vadd.f32 %v722_v25, %v721_v23 }
 0x100   : > { %v725_v33 = vadd.f32 %v724_v43, %v723_v30  ;;  %v624_v34 = vadd.f32 %v623_v32, %v622_v27 }
 0x102   : > { %v626_v39 = vadd.f32 %v625_v35, %v624_v34  ;;  %v727_v40 = vadd.f32 %v726_v38, %v725_v33 }
 0x104   : > { %v729_v45 = vadd.f32 %v728_v41, %v727_v40  ;;  %v628_v46 = vadd.f32 %v627_v42, %v626_v39 }
 0x106   : > { %v630_v50 = vadd.f32 %v629_v57, %v628_v46  ;;  %v731_v51 = vadd.f32 %v730_v47, %v729_v45 }
 0x108   : > { %v733_v55 = vadd.f32 %v732_v7, %v731_v51  ;;  %v632_v56 = vadd.f32 %v631_v54, %v630_v50 }
 0x10a   : > { %v634_v61 = vadd.f32 %v633_v58, %v632_v56  ;;  %v735_v62 = vadd.f32 %v734_v60, %v733_v55 }
 0x10c   : > { %v737_v3 = vadd.f32 %v736_v63, %v735_v62  ;;  %v636_v4 = vadd.f32 %v635_v1, %v634_v61 }
 0x10e   : > { %v638_v8 = vadd.f32 %v637_v21, %v636_v4  ;;  %v739_v10 = vadd.f32 %v738_v5, %v737_v3 }
 0x110   : > { %v741_v36 = vadd.f32 %v740_v37, %v739_v10  ;;  %v640_v14 = vadd.f32 %v639_v12, %v638_v8 }
 0x112   : > { %v642_v17 = vadd.f32 %v641_v15, %v640_v14  ;;  %v743_v18 = vadd.f32 %v742_v16, %v741_v36 }
 0x114   : > { %v644_v49 = vadd.f32 %v643_v20, %v642_v17  ;;  %v745_v9 = vadd.f32 %v744_v19, %v743_v18 }
 0x116   : > { %v645_v23 = vrot.slane %v644_v49, 4  ;;  %v747_v24 = vadd.f32 %v746_v22, %v745_v9 }
 0x118   : > { %v646_v52 = vadd.f32 %v645_v23, %v644_v49  ;;  %v748_v25 = vrot.slane %v747_v24, 4 }
 0x11a   : > { %v647_v28 = vrot.slane %v646_v52, 2  ;;  %v749_v26 = vadd.f32 %v748_v25, %v747_v24 }
 0x11c   : > { %v648_v27 = vadd.f32 %v647_v28, %v646_v52  ;;  %v750_v30 = vrot.slane %v749_v26, 2 }
 0x11e   : > { %v649_v31 = vrot.slane %v648_v27, 1  ;;  %v751_v43 = vadd.f32 %v750_v30, %v749_v26 }
 0x120   : > { %v650_v2 = vadd.f32 %v649_v31, %v648_v27  ;;  %v752_v32 = vrot.slane %v751_v43, 1 }
 0x122   : > { %652 = vst.msk [vmem:[%s214_s30] sm:$0x1] %vm651_vm2, %v650_v2  ;;  %v753_v33 = vadd.f32 %v752_v32, %v751_v43 }
 0x124   : > { %754 = vst.msk [vmem:[%s217_s7] sm:$0x1] %vm651_vm2, %v753_v33 }
 0x125 PF: > { %s15_s15 = sadd.s32 1, %s989_s15  }
 0x126   : > { %p12_p5 = scmp.ge.s32.totalorder %s15_s15, 4  }
 0x128   :  { %14 = sbr.rel (!%p12_p5) target bundleno = 1 (0x1), region = 82 }

// kernel: _lambda_.6
= control target key start
LH: loop header
LB: loop body
LE: loop exit
PB: predicated region body
PF: predicated region fallthrough
CT: control target
= control target key end

     0   :  { %s82_s0 = inlined_call_operand.vmem [shape: f32[16,128], index: 0, kind: input, shape index: {}]   ;;  %s83_s1 = inlined_call_operand.vmem [shape: f32[1,128], index: 1, kind: input, shape index: {}]   ;;  %s84_s2 = inlined_call_operand.vmem [shape: f32[1,128], index: 2, kind: input, shape index: {}]   ;;  %s85_s3 = inlined_call_operand.vmem [shape: f32[16,128], index: 3, kind: output, shape index: {}]  }
   0x1   :  { %v14_v0 = vld [vmem:[%s82_s0] sm:$0xff]  ;;  %v15_v4 = vld [vmem:[%s82_s0 + $0x8] sm:$0xff] }
   0x2   :  { %v42_v1 = vld [vmem:[%s83_s1] ss:$0 sm:$0xff] }
   0x3   :  { %v43_v2 = vld [vmem:[%s84_s2] ss:$0 sm:$0xff]  ;;  %v23_v3 = vmul.f32 %v42_v1, %v14_v0  ;;  %v24_v5 = vmul.f32 %v42_v1, %v15_v4 }
   0x5   :  { %v32_v6 = vadd.f32 %v43_v2, %v23_v3  ;;  %v33_v7 = vadd.f32 %v43_v2, %v24_v5 }
   0x7   :  { %v34_v8 = vmax.f32 %v32_v6, 0.0  ;;  %v35_v9 = vmax.f32 %v33_v7, 0.0 }
   0x9   :  { %36 = vst [vmem:[%s85_s3] sm:$0xff] %v34_v8  ;;  %37 = vst [vmem:[%s85_s3 + $0x8] sm:$0xff] %v35_v9 }

// kernel: _lambda_.8
= control target key start
LH: loop header
LB: loop body
LE: loop exit
PB: predicated region body
PF: predicated region fallthrough
CT: control target
= control target key end

     0   :  { %s1093_s21 = smov 0   ;;  %s1466_s0 = inlined_call_operand.vmem [shape: f32[512,4], index: 0, kind: input, shape index: {}]   ;;  %s1467_s1 = inlined_call_operand.vmem [shape: f32[1,4], index: 1, kind: input, shape index: {}]   ;;  %s1468_s2 = inlined_call_operand.vmem [shape: f32[1,4], index: 2, kind: input, shape index: {}]   ;;  %s1469_s3 = inlined_call_operand.vmem [shape: bf16[4,16], index: 3, kind: input, shape index: {}]   ;;  %s1470_s4 = inlined_call_operand.vmem [shape: f32[512,16], index: 4, kind: output, shape index: {0}]   ;;  %s1471_s5 = inlined_call_operand.vmem [shape: f32[2,1,16], index: 5, kind: output, shape index: {1}]   ;;  %s1472_s6 = inlined_call_operand.vmem [shape: f32[2,1,16], index: 6, kind: output, shape index: {2}]  }
   0x1 LB: > { %s1099_s22 = sadd.s32 4294967295, %s1056_s21   ;;  %p962_p0 = scmp.ge.s32.totalorder %s1056_s21, 1  ;;  %s1056_s21 = sphi %s1093_s21, %s17_s21  }
   0x2   : > { %p218_p1 = scmp.lt.s32.totalorder %s1056_s21, 3 }
   0x4   : > { %p219_p2 = pnand %p962_p0, %p218_p1 }
   0x5   : > { %s963_s25 = sshll.u32 (!%p219_p2), %s1099_s22, 5  ;;  %p266_p4 = scmp.lt.s32.totalorder (!%p219_p2), %s1099_s22, 1 }
   0x6   : > { %222 = sbr.rel (%p219_p2) target bundleno = 301 (0x12d), region = 36  ;;  %p255_p3 = scmp.lt.s32.totalorder (!%p219_p2), %s963_s25, 63 }
   0xb   : > { %v431_v0 = vld [vmem:[%s1469_s3] sm:$0x3]  ;;  %vm481_vm0 = vcmask 1041408   ;;  %s1474_s25 = smov (!%p255_p3, %s963_s25), 63  ;;  %vm432_vm1 = vcmask 31744   ;;  %vm646_vm2 = vcmask 130048  }
   0xc   : > { %1040 = vmatprep.subr.msk.bf16.mxu0 %vm481_vm0, %v431_v0  ;;  %v483_v1 = vsel %vm481_vm0, %v431_v0, 0  ;;  %1041 = vmatprep.subr.msk.bf16.mxu1 %vm481_vm0, %v431_v0  ;;  %s964_s26 = sshll.u32 %s1474_s25, 3  ;;  %v1113_v2 = vld [vmem:[%s1467_s1] ss:$0 sm:$0xff]  ;;  %s1476_s22 = smov (!%p266_p4, %s1099_s22), 1  ;;  %vm748_vm3 = vcmask 122880  }
   0xd   : > { %1005 = vmatpush3.bf16.msra.mxu0 %v483_v1  ;;  %1039 = vmatpush3.bf16.msra.mxu1 %v483_v1  ;;  %s1120_s7 = scalar_lea.vmem %s1466_s0, %s964_s26  ;;  %v1125_v3 = vld [vmem:[%s1468_s2] ss:$0 sm:$0xff]  ;;  %s1247_s12 = scalar_lea.vmem %s1470_s4, %s964_s26 }
   0xe   : > { %v273_v4 = vld [vmem:[%s1120_s7] sm:$0xff]  ;;  %v274_v5 = vld [vmem:[%s1120_s7 + $0x8] sm:$0xff]  ;;  %v275_v6 = vld [vmem:[%s1120_s7 + $0x10] sm:$0xff]  ;;  %s268_s15 = scalar_lea.vmem %s1471_s5, %s1476_s22  ;;  %s271_s18 = scalar_lea.vmem %s1472_s6, %s1476_s22 }
   0xf   : > { %v312_v7 = vmul.f32 %v1113_v2, %v273_v4  ;;  %v313_v8 = vmul.f32 %v1113_v2, %v274_v5  ;;  %v276_v9 = vld [vmem:[%s1120_s7 + $0x18] sm:$0xff]  ;;  %v314_v10 = vmul.f32 %v1113_v2, %v275_v6  ;;  %v277_v11 = vld [vmem:[%s1120_s7 + $0x20] sm:$0xff]  ;;  %v278_v12 = vld [vmem:[%s1120_s7 + $0x28] sm:$0xff] }
  0x10   : > { %v315_v13 = vmul.f32 %v1113_v2, %v276_v9  ;;  %v316_v14 = vmul.f32 %v1113_v2, %v277_v11  ;;  %v317_v15 = vmul.f32 %v1113_v2, %v278_v12  ;;  %v279_v16 = vld [vmem:[%s1120_s7 + $0x30] sm:$0xff]  ;;  %v280_v17 = vld [vmem:[%s1120_s7 + $0x38] sm:$0xff]  ;;  %v281_v26 = vld [vmem:[%s1120_s7 + $0x40] sm:$0xff] }
  0x11   : > { %v351_v18 = vadd.f32 %v1125_v3, %v312_v7  ;;  %v352_v19 = vadd.f32 %v1125_v3, %v313_v8  ;;  %v353_v20 = vadd.f32 %v1125_v3, %v314_v10  ;;  %v318_v21 = vmul.f32 %v1113_v2, %v279_v16  ;;  %v282_v27 = vld [vmem:[%s1120_s7 + $0x48] sm:$0xff]  ;;  %v283_v32 = vld [vmem:[%s1120_s7 + $0x50] sm:$0xff]  ;;  %v284_v37 = vld [vmem:[%s1120_s7 + $0x58] sm:$0xff] }
  0x12   : > { %v354_v22 = vadd.f32 %v1125_v3, %v315_v13  ;;  %v355_v23 = vadd.f32 %v1125_v3, %v316_v14  ;;  %v356_v24 = vadd.f32 %v1125_v3, %v317_v15  ;;  %v319_v25 = vmul.f32 %v1113_v2, %v280_v17  ;;  %v285_v38 = vld [vmem:[%s1120_s7 + $0x60] sm:$0xff]  ;;  %v286_v43 = vld [vmem:[%s1120_s7 + $0x68] sm:$0xff]  ;;  %v287_v44 = vld [vmem:[%s1120_s7 + $0x70] sm:$0xff] }
  0x13   : > { %v383_v28 = vmax.f32 %v351_v18, 0.0  ;;  %v384_v29 = vmax.f32 %v352_v19, 0.0  ;;  %v385_v30 = vmax.f32 %v353_v20, 0.0  ;;  %v357_v31 = vadd.f32 %v1125_v3, %v318_v21  ;;  %v288_v53 = vld [vmem:[%s1120_s7 + $0x78] sm:$0xff]  ;;  %v289_v57 = vld [vmem:[%s1120_s7 + $0x80] sm:$0xff]  ;;  %v290_v62 = vld [vmem:[%s1120_s7 + $0x88] sm:$0xff] }
  0x14   : > { %v386_v33 = vmax.f32 %v354_v22, 0.0  ;;  %v387_v34 = vmax.f32 %v355_v23, 0.0  ;;  %v388_v35 = vmax.f32 %v356_v24, 0.0  ;;  %v358_v36 = vadd.f32 %v1125_v3, %v319_v25  ;;  %v291_v1 = vld [vmem:[%s1120_s7 + $0x90] sm:$0xff]  ;;  %v292_v4 = vld [vmem:[%s1120_s7 + $0x98] sm:$0xff]  ;;  %v293_v8 = vld [vmem:[%s1120_s7 + $0xa0] sm:$0xff] }
  0x15   : > { %v415_v39 = vpack.c.bf16 %v384_v29, %v383_v28  ;;  %v389_v40 = vmax.f32 %v357_v31, 0.0  ;;  %v320_v41 = vmul.f32 %v1113_v2, %v281_v26  ;;  %v321_v42 = vmul.f32 %v1113_v2, %v282_v27  ;;  %v294_v13 = vld [vmem:[%s1120_s7 + $0xa8] sm:$0xff]  ;;  %v295_v18 = vld [vmem:[%s1120_s7 + $0xb0] sm:$0xff]  ;;  %v296_v23 = vld [vmem:[%s1120_s7 + $0xb8] sm:$0xff] }
  0x16   : > { %v416_v45 = vpack.c.bf16 %v386_v33, %v385_v30  ;;  %v417_v46 = vpack.c.bf16 %v388_v35, %v387_v34  ;;  %v390_v47 = vmax.f32 %v358_v36, 0.0  ;;  %v322_v48 = vmul.f32 %v1113_v2, %v283_v32  ;;  %v297_v28 = vld [vmem:[%s1120_s7 + $0xc0] sm:$0xff]  ;;  %v298_v33 = vld [vmem:[%s1120_s7 + $0xc8] sm:$0xff] }
  0x17   : > { %1006 = vmatprep.mubr.msk.bf16.mxu0 %vm432_vm1, %v415_v39  ;;  %v359_v49 = vadd.f32 %v1125_v3, %v320_v41  ;;  %v360_v50 = vadd.f32 %v1125_v3, %v321_v42  ;;  %v323_v51 = vmul.f32 %v1113_v2, %v284_v37  ;;  %v324_v52 = vmul.f32 %v1113_v2, %v285_v38  ;;  %v299_v38 = vld [vmem:[%s1120_s7 + $0xd0] sm:$0xff] }
  0x18   : > { %1007 = vmatmul.mubr.msk.bf16.vlgmr.msra.gmra.mxu0 %vm432_vm1, %v416_v45  ;;  %v361_v54 = vadd.f32 %v1125_v3, %v322_v48  ;;  %v325_v55 = vmul.f32 %v1113_v2, %v286_v43  ;;  %v326_v56 = vmul.f32 %v1113_v2, %v287_v44  ;;  %v327_v0 = vmul.f32 %v1113_v2, %v288_v53  ;;  %v300_v43 = vld [vmem:[%s1120_s7 + $0xd8] sm:$0xff]  ;;  %v301_v48 = vld [vmem:[%s1120_s7 + $0xe0] sm:$0xff] }
  0x19   : > { %1010 = vmatprep.mubr.msk.bf16.mxu0 %vm432_vm1, %v417_v46  ;;  %v391_v58 = vmax.f32 %v359_v49, 0.0  ;;  %v392_v59 = vmax.f32 %v360_v50, 0.0  ;;  %v362_v60 = vadd.f32 %v1125_v3, %v323_v51  ;;  %v363_v61 = vadd.f32 %v1125_v3, %v324_v52  ;;  %v302_v49 = vld [vmem:[%s1120_s7 + $0xe8] sm:$0xff] }
  0x1a   : > { %v364_v63 = vadd.f32 %v1125_v3, %v325_v55  ;;  %v418_v5 = vpack.c.bf16 %v390_v47, %v389_v40  ;;  %v393_v6 = vmax.f32 %v361_v54, 0.0  ;;  %v328_v7 = vmul.f32 %v1113_v2, %v289_v57 }
  0x1b   : > { %v419_v9 = vpack.c.bf16 %v392_v59, %v391_v58  ;;  %v394_v10 = vmax.f32 %v362_v60, 0.0  ;;  %v1183_v11 = vadd.f32 %v1125_v3, %v326_v56  ;;  %v329_v12 = vmul.f32 %v1113_v2, %v290_v62 }
  0x1c   : > { %v395_v14 = vmax.f32 %v363_v61, 0.0  ;;  %v367_v15 = vadd.f32 %v1125_v3, %v328_v7  ;;  %v330_v16 = vmul.f32 %v1113_v2, %v291_v1  ;;  %v331_v17 = vmul.f32 %v1113_v2, %v292_v4 }
  0x1d   : > { %v396_v19 = vmax.f32 %v364_v63, 0.0  ;;  %v366_v20 = vadd.f32 %v1125_v3, %v327_v0  ;;  %v368_v21 = vadd.f32 %v1125_v3, %v329_v12  ;;  %v332_v22 = vmul.f32 %v1113_v2, %v293_v8  ;;  %v303_v8 = vld [vmem:[%s1120_s7 + $0xf0] sm:$0xff] }
  0x1e   : > { %v399_v24 = vmax.f32 %v367_v15, 0.0  ;;  %v369_v25 = vadd.f32 %v1125_v3, %v330_v16  ;;  %v370_v26 = vadd.f32 %v1125_v3, %v331_v17  ;;  %v333_v27 = vmul.f32 %v1113_v2, %v294_v13 }
  0x1f   : > { %v420_v29 = vpack.c.bf16 %v394_v10, %v393_v6  ;;  %v400_v30 = vmax.f32 %v368_v21, 0.0  ;;  %v371_v31 = vadd.f32 %v1125_v3, %v332_v22  ;;  %v334_v32 = vmul.f32 %v1113_v2, %v295_v18 }
  0x20   : > { %1011 = vmatmul.mubr.msk.bf16.gmra.mxu0 %vm432_vm1, %v418_v5  ;;  %v401_v34 = vmax.f32 %v369_v25, 0.0  ;;  %v402_v35 = vmax.f32 %v370_v26, 0.0  ;;  %v372_v36 = vadd.f32 %v1125_v3, %v333_v27  ;;  %v335_v37 = vmul.f32 %v1113_v2, %v296_v23 }
  0x21   : > { %1014 = vmatprep.mubr.msk.bf16.mxu0 %vm432_vm1, %v419_v9  ;;  %v423_v39 = vpack.c.bf16 %v400_v30, %v399_v24  ;;  %v403_v40 = vmax.f32 %v371_v31, 0.0  ;;  %v373_v41 = vadd.f32 %v1125_v3, %v334_v32  ;;  %v336_v42 = vmul.f32 %v1113_v2, %v297_v28  ;;  %v304_v9 = vld [vmem:[%s1120_s7 + $0xf8] sm:$0xff] }
  0x22   : > { %v424_v44 = vpack.c.bf16 %v402_v35, %v401_v34  ;;  %v404_v45 = vmax.f32 %v372_v36, 0.0  ;;  %v374_v46 = vadd.f32 %v1125_v3, %v335_v37  ;;  %v337_v47 = vmul.f32 %v1113_v2, %v298_v33 }
  0x23   : > { %v421_v50 = vpack.c.bf16 %v396_v19, %v395_v14  ;;  %1022 = vmatprep.mubr.msk.bf16.mxu1 %vm432_vm1, %v423_v39  ;;  %v405_v51 = vmax.f32 %v373_v41, 0.0  ;;  %v375_v52 = vadd.f32 %v1125_v3, %v336_v42  ;;  %v338_v53 = vmul.f32 %v1113_v2, %v299_v38 }
  0x24   : > { %1023 = vmatmul.mubr.msk.bf16.vlgmr.msra.gmra.mxu1 %vm432_vm1, %v424_v44  ;;  %v425_v54 = vpack.c.bf16 %v404_v45, %v403_v40  ;;  %v406_v55 = vmax.f32 %v374_v46, 0.0  ;;  %v376_v56 = vadd.f32 %v1125_v3, %v337_v47  ;;  %v339_v57 = vmul.f32 %v1113_v2, %v300_v43 }
  0x25   : > { %v407_v58 = vmax.f32 %v375_v52, 0.0  ;;  %v340_v59 = vmul.f32 %v1113_v2, %v301_v48  ;;  %v341_v60 = vmul.f32 %v1113_v2, %v302_v49  ;;  %v397_v62 = vmax.f32 %v1183_v11, 0.0 }
  0x26   : > { %1026 = vmatprep.mubr.msk.bf16.mxu1 %vm432_vm1, %v425_v54  ;;  %v408_v61 = vmax.f32 %v376_v56, 0.0  ;;  %v398_v63 = vmax.f32 %v366_v20, 0.0  ;;  %v426_v0 = vpack.c.bf16 %v406_v55, %v405_v51  ;;  %v377_v1 = vadd.f32 %v1125_v3, %v338_v53 }
  0x27   : > { %v378_v4 = vadd.f32 %v1125_v3, %v339_v57  ;;  %v379_v6 = vadd.f32 %v1125_v3, %v340_v59  ;;  %v380_v7 = vadd.f32 %v1125_v3, %v341_v60  ;;  %v342_v13 = vmul.f32 %v1113_v2, %v303_v8 }
  0x28   : > { %1015 = vmatmul.mubr.msk.bf16.gmra.mxu0 %vm432_vm1, %v420_v29  ;;  %v427_v5 = vpack.c.bf16 %v408_v61, %v407_v58  ;;  %v422_v10 = vpack.c.bf16 %v398_v63, %v397_v62  ;;  %v409_v12 = vmax.f32 %v377_v1, 0.0  ;;  %v343_v14 = vmul.f32 %v1113_v2, %v304_v9 }
  0x29   : > { %1018 = vmatprep.mubr.msk.bf16.mxu0 %vm432_vm1, %v421_v50  ;;  %v410_v11 = vmax.f32 %v378_v4, 0.0  ;;  %v411_v15 = vmax.f32 %v379_v6, 0.0  ;;  %v412_v16 = vmax.f32 %v380_v7, 0.0  ;;  %v381_v18 = vadd.f32 %v1125_v3, %v342_v13 }
  0x2a   : > { %v382_v19 = vadd.f32 %v1125_v3, %v343_v14 }
  0x2b   : > { %v428_v17 = vpack.c.bf16 %v410_v11, %v409_v12  ;;  %v429_v20 = vpack.c.bf16 %v412_v16, %v411_v15  ;;  %v413_v21 = vmax.f32 %v381_v18, 0.0 }
  0x2c   : > { %1027 = vmatmul.mubr.msk.bf16.gmra.mxu1 %vm432_vm1, %v426_v0  ;;  %v414_v22 = vmax.f32 %v382_v19, 0.0 }
  0x2d   : > { %1030 = vmatprep.mubr.msk.bf16.mxu1 %vm432_vm1, %v427_v5 }
  0x2e   : > { %v430_v23 = vpack.c.bf16 %v414_v22, %v413_v21 }
  0x30   : > { %1019 = vmatmul.mubr.msk.bf16.gmra.mxu0 %vm432_vm1, %v422_v10 }
  0x34   : > { %1031 = vmatmul.mubr.msk.bf16.gmra.mxu1 %vm432_vm1, %v428_v17 }
  0x35   : > { %1034 = vmatprep.mubr.msk.bf16.mxu1 %vm432_vm1, %v429_v20 }
  0x3c   : > { %1035 = vmatmul.mubr.msk.bf16.gmra.mxu1 %vm432_vm1, %v430_v23 }
  0xd8   : > { %v1008_v2 = vpop.f32.mrf.mxu0 }
  0xd9   : > { %649 = vst.msk [vmem:[%s1247_s12 + $0x10] sm:$0xff] %vm646_vm2, %v1008_v2  ;;  %v752_v27 = vmul.f32 %v1008_v2, %v1008_v2  ;;  %v682_v33 = vsel %vm646_vm2, %v1008_v2, 0.0 }
  0xda   : > { %v519_v3 = vpop.f32.mrf.mxu0 }
  0xdb   : > { %647 = vst.msk [vmem:[%s1247_s12] sm:$0xff] %vm646_vm2, %v519_v3  ;;  %v750_v25 = vmul.f32 %v519_v3, %v519_v3  ;;  %v679_v28 = vsel %vm646_vm2, %v519_v3, 0.0  ;;  %v785_v40 = vsel %vm646_vm2, %v752_v27, 0.0 }
  0xdc   : > { %v1009_v24 = vpop.f32.mrf.mxu0 }
  0xdd   : > { %650 = vst.msk [vmem:[%s1247_s12 + $0x18] sm:$0xff] %vm646_vm2, %v1009_v24  ;;  %v782_v34 = vsel %vm646_vm2, %v750_v25, 0.0  ;;  %v753_v35 = vmul.f32 %v1009_v24, %v1009_v24  ;;  %v684_v41 = vsel %vm646_vm2, %v1009_v24, 0.0 }
  0xde   : > { %v522_v26 = vpop.f32.mrf.mxu0 }
  0xdf   : > { %648 = vst.msk [vmem:[%s1247_s12 + $0x8] sm:$0xff] %vm646_vm2, %v522_v26  ;;  %v680_v29 = vsel %vm646_vm2, %v522_v26, 0.0  ;;  %v751_v30 = vmul.f32 %v522_v26, %v522_v26  ;;  %v787_v46 = vsel %vm646_vm2, %v753_v35, 0.0 }
  0xe0   : > { %v681_v31 = vadd.f32 %v680_v29, %v679_v28  ;;  %v1012_v32 = vpop.f32.mrf.mxu0 }
  0xe1   : > { %v783_v36 = vsel %vm646_vm2, %v751_v30, 0.0  ;;  %653 = vst.msk [vmem:[%s1247_s12 + $0x30] sm:$0xff] %vm646_vm2, %v1012_v32  ;;  %v756_v52 = vmul.f32 %v1012_v32, %v1012_v32  ;;  %v690_v60 = vsel %vm646_vm2, %v1012_v32, 0.0 }
  0xe2   : > { %v683_v37 = vadd.f32 %v682_v33, %v681_v31  ;;  %v784_v38 = vadd.f32 %v783_v36, %v782_v34  ;;  %v535_v39 = vpop.f32.mrf.mxu0 }
  0xe3   : > { %651 = vst.msk [vmem:[%s1247_s12 + $0x20] sm:$0xff] %vm646_vm2, %v535_v39  ;;  %v754_v42 = vmul.f32 %v535_v39, %v535_v39  ;;  %v686_v47 = vsel %vm646_vm2, %v535_v39, 0.0  ;;  %v793_v5 = vsel %vm646_vm2, %v756_v52, 0.0 }
  0xe4   : > { %v786_v43 = vadd.f32 %v785_v40, %v784_v38  ;;  %v685_v44 = vadd.f32 %v684_v41, %v683_v37  ;;  %v1013_v45 = vpop.f32.mrf.mxu0  ;;  %v1272_v48 = vpop.f32.mrf.mxu1 }
  0xe5   : > { %654 = vst.msk [vmem:[%s1247_s12 + $0x38] sm:$0xff] %vm646_vm2, %v1013_v45  ;;  %665 = vst.msk [vmem:[%s1247_s12 + $0x90] sm:$0xff] %vm646_vm2, %v1272_v48  ;;  %v789_v53 = vsel %vm646_vm2, %v754_v42, 0.0  ;;  %v757_v61 = vmul.f32 %v1013_v45, %v1013_v45  ;;  %v692_v6 = vsel %vm646_vm2, %v1013_v45, 0.0 }
  0xe6   : > { %v687_v49 = vadd.f32 %v686_v47, %v685_v44  ;;  %v788_v50 = vadd.f32 %v787_v46, %v786_v43  ;;  %v538_v51 = vpop.f32.mrf.mxu0  ;;  %v1281_v56 = vpop.f32.mrf.mxu1 }
  0xe7   : > { %652 = vst.msk [vmem:[%s1247_s12 + $0x28] sm:$0xff] %vm646_vm2, %v538_v51  ;;  %v688_v54 = vsel %vm646_vm2, %v538_v51, 0.0  ;;  %v755_v55 = vmul.f32 %v538_v51, %v538_v51  ;;  %663 = vst.msk [vmem:[%s1247_s12 + $0x80] sm:$0xff] %vm646_vm2, %v1281_v56  ;;  %v795_v11 = vsel %vm646_vm2, %v757_v61, 0.0  ;;  %v766_v61 = vmul.f32 %v1281_v56, %v1281_v56 }
  0xe8   : > { %v790_v57 = vadd.f32 %v789_v53, %v788_v50  ;;  %v689_v58 = vadd.f32 %v688_v54, %v687_v49  ;;  %v1016_v59 = vpop.f32.mrf.mxu0  ;;  %v1290_v63 = vpop.f32.mrf.mxu1 }
  0xe9   : > { %v791_v62 = vsel %vm646_vm2, %v755_v55, 0.0  ;;  %657 = vst.msk [vmem:[%s1247_s12 + $0x50] sm:$0xff] %vm646_vm2, %v1016_v59  ;;  %666 = vst.msk [vmem:[%s1247_s12 + $0x98] sm:$0xff] %vm646_vm2, %v1290_v63  ;;  %v760_v18 = vmul.f32 %v1016_v59, %v1016_v59  ;;  %v698_v24 = vsel %vm646_vm2, %v1016_v59, 0.0 }
  0xea   : > { %v691_v0 = vadd.f32 %v690_v60, %v689_v58  ;;  %v792_v1 = vadd.f32 %v791_v62, %v790_v57  ;;  %v551_v4 = vpop.f32.mrf.mxu0  ;;  %v1299_v8 = vpop.f32.mrf.mxu1 }
  0xeb   : > { %655 = vst.msk [vmem:[%s1247_s12 + $0x40] sm:$0xff] %vm646_vm2, %v551_v4  ;;  %v758_v7 = vmul.f32 %v551_v4, %v551_v4  ;;  %664 = vst.msk [vmem:[%s1247_s12 + $0x88] sm:$0xff] %vm646_vm2, %v1299_v8  ;;  %v694_v13 = vsel %vm646_vm2, %v551_v4, 0.0  ;;  %v801_v31 = vsel %vm646_vm2, %v760_v18, 0.0  ;;  %v769_v18 = vmul.f32 %v1290_v63, %v1290_v63 }
  0xec   : > { %v794_v9 = vadd.f32 %v793_v5, %v792_v1  ;;  %v693_v10 = vadd.f32 %v692_v6, %v691_v0  ;;  %v1017_v12 = vpop.f32.mrf.mxu0  ;;  %v1308_v14 = vpop.f32.mrf.mxu1  ;;  %v710_v5 = vsel %vm646_vm2, %v1281_v56, 0.0  ;;  %v767_v6 = vmul.f32 %v1299_v8, %v1299_v8 }
  0xed   : > { %658 = vst.msk [vmem:[%s1247_s12 + $0x58] sm:$0xff] %vm646_vm2, %v1017_v12  ;;  %669 = vst.msk [vmem:[%s1247_s12 + $0xb0] sm:$0xff] %vm646_vm2, %v1308_v14  ;;  %v797_v19 = vsel %vm646_vm2, %v758_v7, 0.0  ;;  %v761_v25 = vmul.f32 %v1017_v12, %v1017_v12  ;;  %v700_v32 = vsel %vm646_vm2, %v1017_v12, 0.0  ;;  %v768_v12 = vmul.f32 %v1272_v48, %v1272_v48 }
  0xee   : > { %v695_v15 = vadd.f32 %v694_v13, %v693_v10  ;;  %v796_v16 = vadd.f32 %v795_v11, %v794_v9  ;;  %v554_v17 = vpop.f32.mrf.mxu0  ;;  %v1317_v22 = vpop.f32.mrf.mxu1  ;;  %v813_v11 = vsel %vm646_vm2, %v766_v61, 0.0  ;;  %v712_v13 = vsel %vm646_vm2, %v1299_v8, 0.0 }
  0xef   : > { %656 = vst.msk [vmem:[%s1247_s12 + $0x48] sm:$0xff] %vm646_vm2, %v554_v17  ;;  %v696_v20 = vsel %vm646_vm2, %v554_v17, 0.0  ;;  %v759_v21 = vmul.f32 %v554_v17, %v554_v17  ;;  %667 = vst.msk [vmem:[%s1247_s12 + $0xa0] sm:$0xff] %vm646_vm2, %v1317_v22  ;;  %v803_v38 = vsel %vm646_vm2, %v761_v25, 0.0  ;;  %v714_v17 = vsel %vm646_vm2, %v1272_v48, 0.0 }
  0xf0   : > { %v798_v23 = vadd.f32 %v797_v19, %v796_v16  ;;  %v697_v2 = vadd.f32 %v696_v20, %v695_v15  ;;  %v1020_v3 = vpop.f32.mrf.mxu0  ;;  %v1326_v27 = vpop.f32.mrf.mxu1  ;;  %v815_v19 = vsel %vm646_vm2, %v767_v6, 0.0  ;;  %v817_v8 = vsel %vm646_vm2, %v768_v12, 0.0 }
  0xf1   : > { %v799_v26 = vsel %vm646_vm2, %v759_v21, 0.0  ;;  %661 = vst.msk [vmem:[%s1247_s12 + $0x70] sm:$0xff] %vm646_vm2, %v1020_v3  ;;  %670 = vst.msk [vmem:[%s1247_s12 + $0xb8] sm:$0xff] %vm646_vm2, %v1326_v27  ;;  %v764_v44 = vmul.f32 %v1020_v3, %v1020_v3  ;;  %v706_v52 = vsel %vm646_vm2, %v1020_v3, 0.0  ;;  %v770_v48 = vmul.f32 %v1317_v22, %v1317_v22 }
  0xf2   : > { %v699_v28 = vadd.f32 %v698_v24, %v697_v2  ;;  %v800_v29 = vadd.f32 %v799_v26, %v798_v23  ;;  %v567_v30 = vpop.f32.mrf.mxu0  ;;  %v1335_v34 = vpop.f32.mrf.mxu1  ;;  %v716_v2 = vsel %vm646_vm2, %v1290_v63, 0.0  ;;  %v819_v26 = vsel %vm646_vm2, %v769_v18, 0.0 }
  0xf3   : > { %659 = vst.msk [vmem:[%s1247_s12 + $0x60] sm:$0xff] %vm646_vm2, %v567_v30  ;;  %v762_v33 = vmul.f32 %v567_v30, %v567_v30  ;;  %668 = vst.msk [vmem:[%s1247_s12 + $0xa8] sm:$0xff] %vm646_vm2, %v1335_v34  ;;  %v702_v39 = vsel %vm646_vm2, %v567_v30, 0.0  ;;  %v809_v59 = vsel %vm646_vm2, %v764_v44, 0.0  ;;  %v772_v63 = vmul.f32 %v1308_v14, %v1308_v14 }
  0xf4   : > { %v802_v35 = vadd.f32 %v801_v31, %v800_v29  ;;  %v701_v36 = vadd.f32 %v700_v32, %v699_v28  ;;  %v1021_v37 = vpop.f32.mrf.mxu0  ;;  %v1344_v40 = vpop.f32.mrf.mxu1  ;;  %v718_v28 = vsel %vm646_vm2, %v1317_v22, 0.0  ;;  %v771_v29 = vmul.f32 %v1335_v34, %v1335_v34 }
  0xf5   : > { %662 = vst.msk [vmem:[%s1247_s12 + $0x78] sm:$0xff] %vm646_vm2, %v1021_v37  ;;  %673 = vst.msk [vmem:[%s1247_s12 + $0xd0] sm:$0xff] %vm646_vm2, %v1344_v40  ;;  %v805_v45 = vsel %vm646_vm2, %v762_v33, 0.0  ;;  %v765_v53 = vmul.f32 %v1021_v37, %v1021_v37  ;;  %v708_v60 = vsel %vm646_vm2, %v1021_v37, 0.0  ;;  %v821_v32 = vsel %vm646_vm2, %v770_v48, 0.0 }
  0xf6   : > { %v703_v41 = vadd.f32 %v702_v39, %v701_v36  ;;  %v804_v42 = vadd.f32 %v803_v38, %v802_v35  ;;  %v570_v43 = vpop.f32.mrf.mxu0  ;;  %v1353_v49 = vpop.f32.mrf.mxu1  ;;  %v720_v33 = vsel %vm646_vm2, %v1335_v34, 0.0  ;;  %v722_v37 = vsel %vm646_vm2, %v1308_v14, 0.0 }
  0xf7   : > { %660 = vst.msk [vmem:[%s1247_s12 + $0x68] sm:$0xff] %vm646_vm2, %v570_v43  ;;  %v704_v46 = vsel %vm646_vm2, %v570_v43, 0.0  ;;  %v763_v47 = vmul.f32 %v570_v43, %v570_v43  ;;  %671 = vst.msk [vmem:[%s1247_s12 + $0xc0] sm:$0xff] %vm646_vm2, %v1353_v49  ;;  %v811_v4 = vsel %vm646_vm2, %v765_v53, 0.0  ;;  %v773_v22 = vmul.f32 %v1326_v27, %v1326_v27 }
  0xf8   : > { %v806_v50 = vadd.f32 %v805_v45, %v804_v42  ;;  %v705_v51 = vadd.f32 %v704_v46, %v703_v41  ;;  %v1360_v55 = vpop.f32.mrf.mxu1  ;;  %v823_v38 = vsel %vm646_vm2, %v771_v29, 0.0  ;;  %v825_v42 = vsel %vm646_vm2, %v772_v63, 0.0 }
  0xf9   : > { %v807_v54 = vsel %vm646_vm2, %v763_v47, 0.0  ;;  %674 = vst.msk [vmem:[%s1247_s12 + $0xd8] sm:$0xff] %vm646_vm2, %v1360_v55  ;;  %v724_v43 = vsel %vm646_vm2, %v1326_v27, 0.0  ;;  %v774_v34 = vmul.f32 %v1353_v49, %v1353_v49  ;;  %v827_v46 = vsel %vm646_vm2, %v773_v22, 0.0 }
  0xfa   : > { %v707_v57 = vadd.f32 %v706_v52, %v705_v51  ;;  %v808_v58 = vadd.f32 %v807_v54, %v806_v50  ;;  %v618_v62 = vpop.f32.mrf.mxu1  ;;  %v726_v14 = vsel %vm646_vm2, %v1353_v49, 0.0  ;;  %v776_v52 = vmul.f32 %v1344_v40, %v1344_v40 }
  0xfb   : > { %672 = vst.msk [vmem:[%s1247_s12 + $0xc8] sm:$0xff] %vm646_vm2, %v618_v62  ;;  %v775_v47 = vmul.f32 %v618_v62, %v618_v62  ;;  %v829_v53 = vsel %vm646_vm2, %v774_v34, 0.0  ;;  %v728_v27 = vsel %vm646_vm2, %v618_v62, 0.0 }
  0xfc   : > { %v709_v0 = vadd.f32 %v708_v60, %v707_v57  ;;  %v810_v1 = vadd.f32 %v809_v59, %v808_v58  ;;  %v1376_v7 = vpop.f32.mrf.mxu1  ;;  %v730_v58 = vsel %vm646_vm2, %v1344_v40, 0.0  ;;  %v777_v59 = vmul.f32 %v1360_v55, %v1360_v55 }
  0xfd   : > { %677 = vst.msk [vmem:[%s1247_s12 + $0xf0] sm:$0xff] %vm646_vm2, %v1376_v7  ;;  %v831_v49 = vsel %vm646_vm2, %v775_v47, 0.0 }
  0xfe   : > { %v812_v9 = vadd.f32 %v811_v4, %v810_v1  ;;  %v711_v10 = vadd.f32 %v710_v5, %v709_v0  ;;  %v631_v56 = vpop.f32.mrf.mxu1  ;;  %v833_v0 = vsel %vm646_vm2, %v776_v52, 0.0  ;;  %v732_v1 = vsel %vm646_vm2, %v1360_v55, 0.0 }
  0xff   : > { %675 = vst.msk [vmem:[%s1247_s12 + $0xe0] sm:$0xff] %vm646_vm2, %v631_v56  ;;  %v778_v4 = vmul.f32 %v631_v56, %v631_v56  ;;  %v835_v6 = vsel %vm646_vm2, %v777_v59, 0.0 }
 0x100   : > { %v713_v15 = vadd.f32 %v712_v13, %v711_v10  ;;  %v814_v16 = vadd.f32 %v813_v11, %v812_v9  ;;  %v1393_v20 = vpop.f32.mrf.mxu1  ;;  %v734_v9 = vsel %vm646_vm2, %v631_v56, 0.0  ;;  %v780_v11 = vmul.f32 %v1376_v7, %v1376_v7 }
 0x101   : > { %678 = vst.msk [vmem:[%s1247_s12 + $0xf8] sm:$0xff] %vm646_vm2, %v1393_v20  ;;  %v837_v13 = vsel %vm646_vm2, %v778_v4, 0.0  ;;  %v781_v18 = vmul.f32 %v1393_v20, %v1393_v20 }
 0x102   : > { %v715_v21 = vadd.f32 %v714_v17, %v713_v15  ;;  %v816_v23 = vadd.f32 %v815_v19, %v814_v16  ;;  %v634_v3 = vpop.f32.mrf.mxu1  ;;  %v738_v17 = vsel %vm646_vm2, %v1376_v7, 0.0 }
 0x103   : > { %676 = vst.msk [vmem:[%s1247_s12 + $0xe8] sm:$0xff] %vm646_vm2, %v634_v3  ;;  %v779_v40 = vmul.f32 %v634_v3, %v634_v3  ;;  %v736_v15 = vsel %vm646_vm2, %v634_v3, 0.0  ;;  %v843_v3 = vsel %vm646_vm2, %v781_v18, 0.0 }
 0x104   : > { %v818_v24 = vadd.f32 %v817_v8, %v816_v23  ;;  %v717_v25 = vadd.f32 %v716_v2, %v715_v21  ;;  %v841_v23 = vsel %vm646_vm2, %v780_v11, 0.0  ;;  %v740_v8 = vsel %vm646_vm2, %v1393_v20, 0.0 }
 0x105   : > { %v839_v56 = vsel %vm646_vm2, %v779_v40, 0.0 }
 0x106   : > { %v719_v30 = vadd.f32 %v718_v28, %v717_v25  ;;  %v820_v31 = vadd.f32 %v819_v26, %v818_v24 }
 0x108   : > { %v822_v35 = vadd.f32 %v821_v32, %v820_v31  ;;  %v721_v36 = vadd.f32 %v720_v33, %v719_v30 }
 0x10a   : > { %v723_v39 = vadd.f32 %v722_v37, %v721_v36  ;;  %v824_v41 = vadd.f32 %v823_v38, %v822_v35 }
 0x10c   : > { %v826_v44 = vadd.f32 %v825_v42, %v824_v41  ;;  %v725_v45 = vadd.f32 %v724_v43, %v723_v39 }
 0x10e   : > { %v727_v50 = vadd.f32 %v726_v14, %v725_v45  ;;  %v828_v51 = vadd.f32 %v827_v46, %v826_v44 }
 0x110   : > { %v830_v54 = vadd.f32 %v829_v53, %v828_v51  ;;  %v729_v57 = vadd.f32 %v728_v27, %v727_v50 }
 0x112   : > { %v731_v60 = vadd.f32 %v730_v58, %v729_v57  ;;  %v832_v61 = vadd.f32 %v831_v49, %v830_v54 }
 0x114   : > { %v834_v5 = vadd.f32 %v833_v0, %v832_v61  ;;  %v733_v62 = vadd.f32 %v732_v1, %v731_v60 }
 0x116   : > { %v735_v10 = vadd.f32 %v734_v9, %v733_v62  ;;  %v836_v12 = vadd.f32 %v835_v6, %v834_v5 }
 0x118   : > { %v838_v16 = vadd.f32 %v837_v13, %v836_v12  ;;  %v737_v55 = vadd.f32 %v736_v15, %v735_v10 }
 0x11a   : > { %v739_v19 = vadd.f32 %v738_v17, %v737_v55  ;;  %v840_v21 = vadd.f32 %v839_v56, %v838_v16 }
 0x11c   : > { %v741_v2 = vadd.f32 %v740_v8, %v739_v19  ;;  %v842_v48 = vadd.f32 %v841_v23, %v840_v21 }
 0x11e   : > { %v742_v24 = vrot.slane %v741_v2, 4  ;;  %v844_v25 = vadd.f32 %v843_v3, %v842_v48 }
 0x120   : > { %v743_v7 = vadd.f32 %v742_v24, %v741_v2  ;;  %v845_v26 = vrot.slane %v844_v25, 4 }
 0x122   : > { %v744_v28 = vrot.slane %v743_v7, 2  ;;  %v846_v29 = vadd.f32 %v845_v26, %v844_v25 }
 0x124   : > { %v745_v30 = vadd.f32 %v744_v28, %v743_v7  ;;  %v847_v31 = vrot.slane %v846_v29, 2 }
 0x126   : > { %v746_v63 = vrot.slane %v745_v30, 1  ;;  %v848_v32 = vadd.f32 %v847_v31, %v846_v29 }
 0x128   : > { %v747_v20 = vadd.f32 %v746_v63, %v745_v30  ;;  %v849_v33 = vrot.slane %v848_v32, 1 }
 0x12a   : > { %749 = vst.msk [vmem:[%s268_s15] sm:$0x1] %vm748_vm3, %v747_v20  ;;  %v850_v35 = vadd.f32 %v849_v33, %v848_v32 }
 0x12c   : > { %851 = vst.msk [vmem:[%s271_s18] sm:$0x1] %vm748_vm3, %v850_v35 }
 0x12d PF: > { %s17_s21 = sadd.s32 1, %s1056_s21  }
 0x12e   : > { %p14_p5 = scmp.ge.s32.totalorder %s17_s21, 4  }
 0x130   :  { %16 = sbr.rel (!%p14_p5) target bundleno = 1 (0x1), region = 90 }

// kernel: _lambda_.9
= control target key start
LH: loop header
LB: loop body
LE: loop exit
PB: predicated region body
PF: predicated region fallthrough
CT: control target
= control target key end

     0   :  { %s196_s0 = inlined_call_operand.vmem [shape: f32[64,128], index: 0, kind: input, shape index: {}]   ;;  %s197_s1 = inlined_call_operand.vmem [shape: f32[1,128], index: 1, kind: input, shape index: {}]   ;;  %s198_s2 = inlined_call_operand.vmem [shape: f32[1,128], index: 2, kind: input, shape index: {}]   ;;  %s199_s3 = inlined_call_operand.vmem [shape: f32[64,128], index: 3, kind: input, shape index: {}]   ;;  %s200_s4 = inlined_call_operand.vmem [shape: f32[64,128], index: 4, kind: output, shape index: {}]  }
   0x1   :  { %v17_v0 = vld [vmem:[%s196_s0] sm:$0xff]  ;;  %v18_v4 = vld [vmem:[%s196_s0 + $0x8] sm:$0xff]  ;;  %v19_v7 = vld [vmem:[%s196_s0 + $0x10] sm:$0xff] }
   0x2   :  { %v91_v1 = vld [vmem:[%s197_s1] ss:$0 sm:$0xff]  ;;  %v20_v8 = vld [vmem:[%s196_s0 + $0x18] sm:$0xff]  ;;  %v56_v10 = vld [vmem:[%s199_s3 + $0x8] sm:$0xff] }
   0x3   :  { %v92_v2 = vld [vmem:[%s198_s2] ss:$0 sm:$0xff]  ;;  %v32_v3 = vmul.f32 %v91_v1, %v17_v0  ;;  %v33_v6 = vmul.f32 %v91_v1, %v18_v4  ;;  %v34_v11 = vmul.f32 %v91_v1, %v19_v7  ;;  %v57_v12 = vld [vmem:[%s199_s3 + $0x10] sm:$0xff]  ;;  %v35_v13 = vmul.f32 %v91_v1, %v20_v8  ;;  %v58_v16 = vld [vmem:[%s199_s3 + $0x18] sm:$0xff] }
   0x4   :  { %v55_v5 = vld [vmem:[%s199_s3] sm:$0xff]  ;;  %v22_v18 = vld [vmem:[%s196_s0 + $0x28] sm:$0xff]  ;;  %v23_v19 = vld [vmem:[%s196_s0 + $0x30] sm:$0xff] }
   0x5   :  { %v47_v9 = vadd.f32 %v92_v2, %v32_v3  ;;  %v21_v14 = vld [vmem:[%s196_s0 + $0x20] sm:$0xff]  ;;  %v48_v15 = vadd.f32 %v92_v2, %v33_v6  ;;  %v49_v21 = vadd.f32 %v92_v2, %v34_v11  ;;  %v50_v22 = vadd.f32 %v92_v2, %v35_v13  ;;  %v24_v25 = vld [vmem:[%s196_s0 + $0x38] sm:$0xff]  ;;  %v60_v28 = vld [vmem:[%s199_s3 + $0x28] sm:$0xff] }
   0x6   :  { %v36_v17 = vmul.f32 %v91_v1, %v21_v14  ;;  %v59_v23 = vld [vmem:[%s199_s3 + $0x20] sm:$0xff]  ;;  %v37_v24 = vmul.f32 %v91_v1, %v22_v18  ;;  %v38_v29 = vmul.f32 %v91_v1, %v23_v19  ;;  %v39_v30 = vmul.f32 %v91_v1, %v24_v25  ;;  %v61_v35 = vld [vmem:[%s199_s3 + $0x30] sm:$0xff]  ;;  %v62_v36 = vld [vmem:[%s199_s3 + $0x38] sm:$0xff] }
   0x7   :  { %v63_v20 = vadd.f32 %v55_v5, %v47_v9  ;;  %v64_v26 = vadd.f32 %v56_v10, %v48_v15  ;;  %v65_v32 = vadd.f32 %v57_v12, %v49_v21  ;;  %v66_v33 = vadd.f32 %v58_v16, %v50_v22 }
   0x8   :  { %v51_v27 = vadd.f32 %v92_v2, %v36_v17  ;;  %v52_v34 = vadd.f32 %v92_v2, %v37_v24  ;;  %v53_v39 = vadd.f32 %v92_v2, %v38_v29  ;;  %v54_v40 = vadd.f32 %v92_v2, %v39_v30 }
   0x9   :  { %v71_v31 = vmax.f32 %v63_v20, 0.0  ;;  %v72_v37 = vmax.f32 %v64_v26, 0.0  ;;  %v73_v41 = vmax.f32 %v65_v32, 0.0  ;;  %v74_v42 = vmax.f32 %v66_v33, 0.0 }
   0xa   :  { %v67_v38 = vadd.f32 %v59_v23, %v51_v27  ;;  %v68_v43 = vadd.f32 %v60_v28, %v52_v34  ;;  %v69_v45 = vadd.f32 %v61_v35, %v53_v39  ;;  %v70_v46 = vadd.f32 %v62_v36, %v54_v40 }
   0xb   :  { %79 = vst [vmem:[%s200_s4] sm:$0xff] %v71_v31  ;;  %80 = vst [vmem:[%s200_s4 + $0x8] sm:$0xff] %v72_v37 }
   0xc   :  { %v75_v44 = vmax.f32 %v67_v38, 0.0  ;;  %81 = vst [vmem:[%s200_s4 + $0x10] sm:$0xff] %v73_v41  ;;  %82 = vst [vmem:[%s200_s4 + $0x18] sm:$0xff] %v74_v42  ;;  %v76_v47 = vmax.f32 %v68_v43, 0.0  ;;  %v77_v48 = vmax.f32 %v69_v45, 0.0  ;;  %v78_v49 = vmax.f32 %v70_v46, 0.0 }
   0xe   :  { %83 = vst [vmem:[%s200_s4 + $0x20] sm:$0xff] %v75_v44  ;;  %84 = vst [vmem:[%s200_s4 + $0x28] sm:$0xff] %v76_v47 }
   0xf   :  { %85 = vst [vmem:[%s200_s4 + $0x30] sm:$0xff] %v77_v48  ;;  %86 = vst [vmem:[%s200_s4 + $0x38] sm:$0xff] %v78_v49 }

// kernel: _lambda_.7
= control target key start
LH: loop header
LB: loop body
LE: loop exit
PB: predicated region body
PF: predicated region fallthrough
CT: control target
= control target key end

     0   :  { %s4007_s15 = smov 0   ;;  %s5627_s0 = inlined_call_operand.vmem [shape: bf16[2,18,18,4], index: 0, kind: input, shape index: {}]   ;;  %s5628_s1 = inlined_call_operand.vmem [shape: bf16[9,4,4], index: 1, kind: input, shape index: {}]   ;;  %s5629_s2 = inlined_call_operand.vmem [shape: f32[2,256,4], index: 2, kind: output, shape index: {0}]   ;;  %s5630_s3 = inlined_call_operand.vmem [shape: f32[2,1,4], index: 3, kind: output, shape index: {1}]   ;;  %s5631_s4 = inlined_call_operand.vmem [shape: f32[2,1,4], index: 4, kind: output, shape index: {2}]  }
   0x1 LB: > { %s3241_s16 = sadd.s32 4294967295, %s3980_s15   ;;  %p3245_p0 = scmp.ge.s32.totalorder %s3980_s15, 1  ;;  %s3980_s15 = sphi %s4007_s15, %s15_s15  }
   0x2   : > { %p167_p1 = scmp.lt.s32.totalorder %s3980_s15, 3 }
   0x4   : > { %p168_p2 = pnand %p3245_p0, %p167_p1 }
   0x6   : > { %171 = sbr.rel (%p168_p2) target bundleno = 573 (0x23d), region = 28 }
   0xb   : > { %v3249_v0 = vld [vmem:[%s5628_s1 + $0x2] sm:$0x3]  ;;  %vm757_vm0 = vcmask 1041408   ;;  %p199_p3 = scmp.lt.s32.totalorder %s3241_s16, 1  ;;  %v270_v2 = vld [vmem:[%s5628_s1] sm:$0x3] }
   0xc   : > { %3938 = vmatprep.subr.msk.bf16.mxu1 %vm757_vm0, %v3249_v0  ;;  %3937 = vmatprep.subr.msk.bf16.mxu0 %vm757_vm0, %v3249_v0  ;;  %v759_v1 = vsel %vm757_vm0, %v3249_v0, 0  ;;  %v3330_v3 = vld [vmem:[%s5628_s1 + $0x4] sm:$0x3]  ;;  %vm271_vm1 = vsmask.f32 3328  ;;  %v4038_v4 = vsel %vm757_vm0, %v270_v2, 0 }
   0xd   : > { %3936 = vmatpush3.bf16.msra.mxu1 %v759_v1  ;;  %3630 = vmatpush3.bf16.msra.mxu0 %v759_v1  ;;  %s5833_s16 = smov (!%p199_p3, %s3241_s16), 1  ;;  %vm272_vm2 = vsmask.f32 7440  ;;  %v4041_v5 = vsel %vm757_vm0, %v3330_v3, 0  ;;  %vm708_vm3 = vcmask 31744   ;;  %v5675_v32 = vmov 0 }
   0xe   : > { %3939 = vmatprep.subr.msk.bf16.mxu1 %vm757_vm0, %v270_v2  ;;  %3940 = vmatprep.subr.msk.bf16.mxu0 %vm757_vm0, %v3330_v3  ;;  %s3947_s23 = smul.u32 216, %s5833_s16  ;;  %vm4080_vm4 = vmor %vm271_vm1, %vm272_vm2  ;;  %vm1230_vm5 = vcmask 1042432   ;;  %vm1231_vm6 = vcmask 1046532   ;;  %s3475_s13 = sshll.u32 %s5833_s16, 8  ;;  %vm3032_vm8 = vcmask 24576  }
   0xf   : > { %v5676_v32 = vsel %vm4080_vm4, 4294967295, %v5675_v32  ;;  %vm4403_vm7 = vmor %vm1230_vm5, %vm1231_vm6  ;;  %s5359_s18 = scalar_lea.vmem %s5629_s2, %s3475_s13  ;;  %s211_s21 = scalar_lea.vmem %s5630_s3, %s5833_s16 }
  0x10   : > { %s4035_s26 = scalar_lea.vmem %s5627_s0, %s3947_s23  ;;  %5677 = vst [vmem:[#allocation2_spill] sm:$0xff] %v5676_v32  ;;  %s214_s24 = scalar_lea.vmem %s5631_s4, %s5833_s16 }
  0x11   : > { %v4044_v6 = vld [vmem:[%s4035_s26] sm:$0xf]  ;;  %v4047_v7 = vld [vmem:[%s4035_s26 + $0x4] sm:$0xf]  ;;  %v4050_v8 = vld [vmem:[%s4035_s26 + $0x8] sm:$0x1] }
  0x12   : > { %v275_v9 = vshrl.u32 %v4044_v6, 16  ;;  %v278_v10 = vshll.u32 %v4044_v6, 16  ;;  %v284_v11 = vshll.u32 %v4047_v7, 16  ;;  %v288_v12 = vshrl.u32 %v4047_v7, 16  ;;  %v4057_v13 = vld [vmem:[%s4035_s26 + $0x60] sm:$0xf] }
  0x13   : > { %v294_v14 = vshll.u32 %v4050_v8, 16  ;;  %v4062_v16 = vld [vmem:[%s4035_s26 + $0x64] sm:$0xf]  ;;  %v4065_v17 = vld [vmem:[%s4035_s26 + $0x68] sm:$0x1]  ;;  %v467_v23 = vshrl.u32 %v4057_v13, 16 }
  0x14   : > { %v277_v18 = vrot.slane %v275_v9, 4  ;;  %v280_v19 = vrot.slane %v278_v10, 5  ;;  %v286_v20 = vrot.slane %v284_v11, 5  ;;  %v290_v21 = vrot.slane %v288_v12, 4  ;;  %v4073_v30 = vld [vmem:[%s4035_s26 + $0xc] sm:$0xf] }
  0x15   : > { %v296_v22 = vrot.slane %v294_v14, 5  ;;  %v470_v24 = vshll.u32 %v4057_v13, 16  ;;  %v476_v25 = vshll.u32 %v4062_v16, 16  ;;  %v480_v28 = vshrl.u32 %v4062_v16, 16  ;;  %v4076_v31 = vld [vmem:[%s4035_s26 + $0x10] sm:$0xf] }
  0x16   : > { %v281_v26 = vor.u32 %v280_v19, %v277_v18  ;;  %v291_v27 = vor.u32 %v290_v21, %v286_v20  ;;  %v486_v29 = vshll.u32 %v4065_v17, 16  ;;  %v469_v33 = vrot.slane %v467_v23, 4  ;;  %v4087_v42 = vld [vmem:[%s4035_s26 + $0x14] sm:$0x1]  ;;  %v4098_v54 = vld [vmem:[%s4035_s26 + $0x6c] sm:$0xf] }
  0x17   : > { %v472_v34 = vrot.slane %v470_v24, 5  ;;  %v478_v35 = vrot.slane %v476_v25, 5  ;;  %v482_v39 = vrot.slane %v480_v28, 4  ;;  %v299_v43 = vshrl.u32 %v4073_v30, 16  ;;  %5678 = vst [vmem:[#allocation3_spill] sm:$0xff] %v4098_v54 }
  0x18   : > { %v282_v37 = vrot.slane %v281_v26, 4  ;;  %v292_v38 = vrot.slane %v291_v27, 4  ;;  %v488_v40 = vrot.slane %v486_v29, 5  ;;  %v302_v44 = vshll.u32 %v4073_v30, 16  ;;  %v4102_v59 = vld [vmem:[%s4035_s26 + $0x70] sm:$0xf] }
  0x19   : > { %v473_v41 = vor.u32 %v472_v34, %v469_v33  ;;  %v308_v45 = vshll.u32 %v4076_v31, 16  ;;  %v483_v48 = vor.u32 %v482_v39, %v478_v35  ;;  %v312_v49 = vshrl.u32 %v4076_v31, 16  ;;  %v4110_v0 = vld [vmem:[%s4035_s26 + $0x74] sm:$0x1]  ;;  %v4116_v10 = vld [vmem:[%s4035_s26 + $0x18] sm:$0xf] }
  0x1a   : > { %v287_v46 = vsel %vm4080_vm4, %v282_v37, %v286_v20  ;;  %v297_v47 = vsel %vm4080_vm4, %v292_v38, %v296_v22  ;;  %v301_v52 = vrot.slane %v299_v43, 4  ;;  %v304_v53 = vrot.slane %v302_v44, 5  ;;  %5679 = vst [vmem:[#allocation4_spill] sm:$0xff] %v4110_v0  ;;  %v4125_v23 = vld [vmem:[%s4035_s26 + $0x1c] sm:$0xf] }
  0x1b   : > { %v3250_v50 = vcombine.low %v287_v46, %v297_v47  ;;  %v474_v51 = vrot.slane %v473_v41, 4  ;;  %v484_v55 = vrot.slane %v483_v48, 4  ;;  %v310_v56 = vrot.slane %v308_v45, 5  ;;  %v4132_v27 = vld [vmem:[%s4035_s26 + $0x20] sm:$0x1] }
  0x1c   : > { %v314_v57 = vrot.slane %v312_v49, 4  ;;  %v318_v58 = vshll.u32 %v4087_v42, 16  ;;  %v305_v61 = vor.u32 %v304_v53, %v301_v52  ;;  %v491_v9 = vshrl.u32 %v4098_v54, 16  ;;  %v4139_v37 = vld [vmem:[%s4035_s26 + $0x78] sm:$0xf] }
  0x1d   : > { %3631 = vmatprep.mubr.msk.bf16.mxu0 %vm708_vm3, %v3250_v50  ;;  %v479_v60 = vsel %vm4080_vm4, %v474_v51, %v478_v35  ;;  %v489_v1 = vsel %vm4080_vm4, %v484_v55, %v488_v40  ;;  %v494_v14 = vshll.u32 %v4098_v54, 16  ;;  %v500_v18 = vshll.u32 %v4102_v59, 16  ;;  %5681 = vst [vmem:[#allocation6_spill] sm:$0xff] %v4139_v37  ;;  %v4147_v43 = vld [vmem:[%s5628_s1 + $0x8] sm:$0x3] }
  0x1e   : > { %v315_v2 = vor.u32 %v314_v57, %v310_v56  ;;  %v320_v3 = vrot.slane %v318_v58, 5  ;;  %v4118_v11 = vcombine.low %v479_v60, %v489_v1  ;;  %v306_v12 = vrot.slane %v305_v61, 4  ;;  %v4152_v48 = vld [vmem:[%s4035_s26 + $0x7c] sm:$0xf]  ;;  %v4160_v58 = vld [vmem:[%s4035_s26 + $0x80] sm:$0x1] }
  0x1f   : > { %v493_v20 = vrot.slane %v491_v9, 4  ;;  %v504_v21 = vshrl.u32 %v4102_v59, 16  ;;  %v510_v22 = vshll.u32 %v4110_v0, 16  ;;  %v496_v25 = vrot.slane %v494_v14, 5  ;;  %5683 = vst [vmem:[#allocation8_spill] sm:$0xff] %v4152_v48  ;;  %5684 = vst [vmem:[#allocation9_spill] sm:$0xff] %v4160_v58 }
  0x20   : > { %5680 = vst [vmem:[#allocation5_spill] sm:$0xff] %v4118_v11  ;;  %v316_v19 = vrot.slane %v315_v2, 4  ;;  %3647 = vmatprep.mubr.msk.bf16.mxu1 %vm708_vm3, %v4118_v11  ;;  %v311_v24 = vsel %vm4080_vm4, %v306_v12, %v310_v56  ;;  %v502_v26 = vrot.slane %v500_v18, 5  ;;  %v323_v28 = vshrl.u32 %v4116_v10, 16  ;;  %v4174_v18 = vld [vmem:[%s4035_s26 + $0x28] sm:$0xf] }
  0x21   : > { %v506_v33 = vrot.slane %v504_v21, 4  ;;  %v512_v34 = vrot.slane %v510_v22, 5  ;;  %v326_v35 = vshll.u32 %v4116_v10, 16  ;;  %v497_v39 = vor.u32 %v496_v25, %v493_v20 }
  0x22   : > { %v321_v29 = vsel %vm4080_vm4, %v316_v19, %v320_v3  ;;  %v325_v40 = vrot.slane %v323_v28, 4  ;;  %v332_v41 = vshll.u32 %v4125_v23, 16  ;;  %v336_v46 = vshrl.u32 %v4125_v23, 16  ;;  %v4166_v3 = vld [vmem:[%s4035_s26 + $0x24] sm:$0xf] }
  0x23   : > { %v4141_v38 = vcombine.low %v311_v24, %v321_v29  ;;  %v507_v44 = vor.u32 %v506_v33, %v502_v26  ;;  %v328_v45 = vrot.slane %v326_v35, 5  ;;  %v342_v47 = vshll.u32 %v4132_v27, 16  ;;  %v4182_v24 = vld [vmem:[%s5628_s1 + $0x6] sm:$0x3]  ;;  %v4187_v29 = vld [vmem:[%s4035_s26 + $0x2c] sm:$0x1] }
  0x24   : > { %v498_v49 = vrot.slane %v497_v39, 4  ;;  %v334_v50 = vrot.slane %v332_v41, 5  ;;  %v515_v51 = vshrl.u32 %v4139_v37, 16  ;;  %v518_v52 = vshll.u32 %v4139_v37, 16  ;;  %v4195_v41 = vld [vmem:[%s4035_s26 + $0x84] sm:$0xf] }
  0x25   : > { %5682 = vst [vmem:[#allocation7_spill] sm:$0xff] %v4141_v38  ;;  %3632 = vmatmul.mubr.msk.bf16.vlgmr.msra.gmra.mxu0 %vm708_vm3, %v4141_v38  ;;  %v508_v53 = vrot.slane %v507_v44, 4  ;;  %v329_v55 = vor.u32 %v328_v45, %v325_v40  ;;  %v338_v56 = vrot.slane %v336_v46, 4  ;;  %v344_v57 = vrot.slane %v342_v47, 5  ;;  %v4342_v38 = vld [vmem:[%s4035_s26 + $0xb0] sm:$0x1] }
  0x26   : > { %3698 = vmatpush3.bf16.msra.mxu0 %v4041_v5  ;;  %v503_v60 = vsel %vm4080_vm4, %v498_v49, %v502_v26  ;;  %v517_v61 = vrot.slane %v515_v51, 4  ;;  %v520_v1 = vrot.slane %v518_v52, 5  ;;  %v524_v2 = vshll.u32 %v4152_v48, 16  ;;  %v4202_v49 = vld [vmem:[%s4035_s26 + $0x88] sm:$0xf]  ;;  %5696 = vst [vmem:[#allocation21_spill] sm:$0xff] %v4342_v38 }
  0x27   : > { %3942 = vmatprep.subr.msk.bf16.mxu0 %vm757_vm0, %v4147_v43  ;;  %v513_v5 = vsel %vm4080_vm4, %v508_v53, %v512_v34  ;;  %v330_v9 = vrot.slane %v329_v55, 4  ;;  %v339_v12 = vor.u32 %v338_v56, %v334_v50  ;;  %v528_v14 = vshrl.u32 %v4152_v48, 16  ;;  %v4364_v48 = vld [vmem:[%s4035_s26 + $0x5c] sm:$0x1] }
  0x28   : > { %v4176_v19 = vcombine.low %v503_v60, %v513_v5  ;;  %v521_v20 = vor.u32 %v520_v1, %v517_v61  ;;  %v526_v21 = vrot.slane %v524_v2, 5  ;;  %v534_v22 = vshll.u32 %v4160_v58, 16 }
  0x29   : > { %v335_v25 = vsel %vm4080_vm4, %v330_v9, %v334_v50  ;;  %v340_v26 = vrot.slane %v339_v12, 4  ;;  %v530_v28 = vrot.slane %v528_v14, 4  ;;  %v347_v33 = vshrl.u32 %v4166_v3, 16  ;;  %v4221_v9 = vld [vmem:[%s4035_s26 + $0x30] sm:$0xf] }
  0x2a   : > { %5685 = vst [vmem:[#allocation10_spill] sm:$0xff] %v4176_v19  ;;  %3648 = vmatmul.mubr.msk.bf16.vlgmr.msra.gmra.mxu1 %vm708_vm3, %v4176_v19  ;;  %v522_v34 = vrot.slane %v521_v20, 4  ;;  %v536_v35 = vrot.slane %v534_v22, 5  ;;  %v350_v39 = vshll.u32 %v4166_v3, 16  ;;  %v356_v40 = vshll.u32 %v4174_v18, 16 }
  0x2b   : > { %3664 = vmatpush3.bf16.msra.mxu1 %v4038_v4  ;;  %v345_v44 = vsel %vm4080_vm4, %v340_v26, %v344_v57  ;;  %v531_v45 = vor.u32 %v530_v28, %v526_v21  ;;  %v349_v46 = vrot.slane %v347_v33, 4  ;;  %v360_v47 = vshrl.u32 %v4174_v18, 16  ;;  %v4212_v57 = vld [vmem:[%s4035_s26 + $0x8c] sm:$0x1]  ;;  %v4226_v22 = vld [vmem:[%s4035_s26 + $0x34] sm:$0xf] }
  0x2c   : > { %v4204_v50 = vcombine.low %v335_v25, %v345_v44  ;;  %v527_v51 = vsel %vm4080_vm4, %v522_v34, %v526_v21  ;;  %v352_v52 = vrot.slane %v350_v39, 5  ;;  %v358_v53 = vrot.slane %v356_v40, 5  ;;  %3941 = vmatprep.subr.msk.bf16.mxu1 %vm757_vm0, %v4182_v24 }
  0x2d   : > { %v532_v4 = vrot.slane %v531_v45, 4  ;;  %v362_v55 = vrot.slane %v360_v47, 4  ;;  %v366_v56 = vshll.u32 %v4187_v29, 16  ;;  %v539_v60 = vshrl.u32 %v4195_v41, 16 }
  0x2e   : > { %5686 = vst [vmem:[#allocation11_spill] sm:$0xff] %v4204_v50  ;;  %3635 = vmatprep.mubr.msk.bf16.mxu0 %vm708_vm3, %v4204_v50  ;;  %v353_v61 = vor.u32 %v352_v52, %v349_v46  ;;  %v542_v1 = vshll.u32 %v4195_v41, 16  ;;  %v548_v2 = vshll.u32 %v4202_v49, 16  ;;  %v552_v5 = vshrl.u32 %v4202_v49, 16  ;;  %v4237_v46 = vld [vmem:[%s4035_s26 + $0x38] sm:$0x1] }
  0x2f   : > { %v537_v12 = vsel %vm4080_vm4, %v532_v4, %v536_v35  ;;  %v363_v14 = vor.u32 %v362_v55, %v358_v53  ;;  %v368_v20 = vrot.slane %v366_v56, 5  ;;  %v541_v21 = vrot.slane %v539_v60, 4  ;;  %v4242_v52 = vld [vmem:[%s4035_s26 + $0x90] sm:$0xf] }
  0x30   : > { %v4228_v25 = vcombine.low %v527_v51, %v537_v12  ;;  %v354_v26 = vrot.slane %v353_v61, 4  ;;  %v544_v28 = vrot.slane %v542_v1, 5  ;;  %v550_v33 = vrot.slane %v548_v2, 5  ;;  %v4247_v61 = vld [vmem:[%s4035_s26 + $0x94] sm:$0xf] }
  0x31   : > { %v364_v34 = vrot.slane %v363_v14, 4  ;;  %v554_v39 = vrot.slane %v552_v5, 4  ;;  %v558_v40 = vshll.u32 %v4212_v57, 16  ;;  %v371_v44 = vshrl.u32 %v4221_v9, 16 }
  0x32   : > { %5687 = vst [vmem:[#allocation12_spill] sm:$0xff] %v4228_v25  ;;  %3651 = vmatprep.mubr.msk.bf16.mxu1 %vm708_vm3, %v4228_v25  ;;  %v359_v35 = vsel %vm4080_vm4, %v354_v26, %v358_v53  ;;  %v545_v45 = vor.u32 %v544_v28, %v541_v21  ;;  %v374_v47 = vshll.u32 %v4221_v9, 16  ;;  %v380_v51 = vshll.u32 %v4226_v22, 16  ;;  %v4293_v25 = vld [vmem:[%s4035_s26 + $0xa0] sm:$0xf] }
  0x33   : > { %v369_v4 = vsel %vm4080_vm4, %v364_v34, %v368_v20  ;;  %v555_v55 = vor.u32 %v554_v39, %v550_v33  ;;  %v560_v56 = vrot.slane %v558_v40, 5  ;;  %v373_v60 = vrot.slane %v371_v44, 4  ;;  %v4259_v34 = vld [vmem:[%s4035_s26 + $0x98] sm:$0x1]  ;;  %v4264_v44 = vld [vmem:[%s4035_s26 + $0x3c] sm:$0xf] }
  0x34   : > { %v4249_v53 = vcombine.low %v359_v35, %v369_v4  ;;  %v546_v1 = vrot.slane %v545_v45, 4  ;;  %v376_v2 = vrot.slane %v374_v47, 5  ;;  %v382_v5 = vrot.slane %v380_v51, 5  ;;  %v4269_v4 = vld [vmem:[%s4035_s26 + $0x40] sm:$0xf] }
  0x35   : > { %v556_v12 = vrot.slane %v555_v55, 4  ;;  %v384_v14 = vshrl.u32 %v4226_v22, 16  ;;  %v390_v21 = vshll.u32 %v4237_v46, 16  ;;  %v563_v20 = vshrl.u32 %v4242_v52, 16 }
  0x36   : > { %5688 = vst [vmem:[#allocation13_spill] sm:$0xff] %v4249_v53  ;;  %3636 = vmatmul.mubr.msk.bf16.gmra.mxu0 %vm708_vm3, %v4249_v53  ;;  %v551_v26 = vsel %vm4080_vm4, %v546_v1, %v550_v33  ;;  %v377_v28 = vor.u32 %v376_v2, %v373_v60  ;;  %v566_v39 = vshll.u32 %v4242_v52, 16  ;;  %v572_v40 = vshll.u32 %v4247_v61, 16 }
  0x37   : > { %v561_v35 = vsel %vm4080_vm4, %v556_v12, %v560_v56  ;;  %v386_v45 = vrot.slane %v384_v14, 4  ;;  %v392_v47 = vrot.slane %v390_v21, 5  ;;  %v565_v51 = vrot.slane %v563_v20, 4  ;;  %v4281_v14 = vld [vmem:[%s4035_s26 + $0x44] sm:$0x1] }
  0x38   : > { %v4271_v33 = vcombine.low %v551_v26, %v561_v35  ;;  %v378_v55 = vrot.slane %v377_v28, 4  ;;  %v568_v60 = vrot.slane %v566_v39, 5  ;;  %v574_v1 = vrot.slane %v572_v40, 5  ;;  %v4286_v26 = vld [vmem:[%s4035_s26 + $0x9c] sm:$0xf] }
  0x39   : > { %v387_v2 = vor.u32 %v386_v45, %v382_v5  ;;  %v576_v36 = vshrl.u32 %v4247_v61, 16  ;;  %v582_v63 = vshll.u32 %v4259_v34, 16  ;;  %v395_v15 = vshrl.u32 %v4264_v44, 16 }
  0x3a   : > { %5689 = vst [vmem:[#allocation14_spill] sm:$0xff] %v4271_v33  ;;  %3652 = vmatmul.mubr.msk.bf16.gmra.mxu1 %vm708_vm3, %v4271_v33  ;;  %v383_v56 = vsel %vm4080_vm4, %v378_v55, %v382_v5  ;;  %v569_v12 = vor.u32 %v568_v60, %v565_v51  ;;  %v398_v21 = vshll.u32 %v4264_v44, 16  ;;  %v404_v20 = vshll.u32 %v4269_v4, 16 }
  0x3b   : > { %v388_v28 = vrot.slane %v387_v2, 4  ;;  %v578_v39 = vrot.slane %v576_v36, 4  ;;  %v584_v40 = vrot.slane %v582_v63, 5  ;;  %v397_v35 = vrot.slane %v395_v15, 4 }
  0x3c   : > { %v570_v45 = vrot.slane %v569_v12, 4  ;;  %v400_v62 = vrot.slane %v398_v21, 5  ;;  %v406_v33 = vrot.slane %v404_v20, 5  ;;  %v408_v5 = vshrl.u32 %v4269_v4, 16  ;;  %v4301_v21 = vld [vmem:[%s4035_s26 + $0xa4] sm:$0x1] }
  0x3d   : > { %v393_v51 = vsel %vm4080_vm4, %v388_v28, %v392_v47  ;;  %v579_v55 = vor.u32 %v578_v39, %v574_v1  ;;  %v414_v60 = vshll.u32 %v4281_v14, 16  ;;  %v587_v2 = vshrl.u32 %v4286_v26, 16  ;;  %5691 = vst [vmem:[#allocation16_spill] sm:$0xff] %v4301_v21  ;;  %v4304_v20 = vld [vmem:[%s4035_s26 + $0x48] sm:$0xf] }
  0x3e   : > { %v4296_v36 = vcombine.low %v383_v56, %v393_v51  ;;  %v575_v15 = vsel %vm4080_vm4, %v570_v45, %v574_v1  ;;  %v401_v63 = vor.u32 %v400_v62, %v397_v35  ;;  %v410_v12 = vrot.slane %v408_v5, 4 }
  0x3f   : > { %v580_v47 = vrot.slane %v579_v55, 4  ;;  %v416_v28 = vrot.slane %v414_v60, 5  ;;  %v589_v39 = vrot.slane %v587_v2, 4  ;;  %v590_v19 = vshll.u32 %v4286_v26, 16  ;;  %v4315_v55 = vld [vmem:[%s4035_s26 + $0x4c] sm:$0xf] }
  0x40   : > { %5690 = vst [vmem:[#allocation15_spill] sm:$0xff] %v4296_v36  ;;  %3639 = vmatprep.mubr.msk.bf16.mxu0 %vm708_vm3, %v4296_v36  ;;  %v402_v56 = vrot.slane %v401_v63, 4  ;;  %v411_v51 = vor.u32 %v410_v12, %v406_v33  ;;  %v596_v1 = vshll.u32 %v4293_v25, 16  ;;  %v600_v62 = vshrl.u32 %v4293_v25, 16  ;;  %v4323_v36 = vld [vmem:[%s4035_s26 + $0x50] sm:$0x1] }
  0x41   : > { %v585_v35 = vsel %vm4080_vm4, %v580_v47, %v584_v40  ;;  %v592_v45 = vrot.slane %v590_v19, 5  ;;  %v606_v5 = vshll.u32 %v4301_v21, 16  ;;  %v419_v60 = vshrl.u32 %v4304_v20, 16  ;;  %v4326_v47 = vld [vmem:[%s4035_s26 + $0xa8] sm:$0xf] }
  0x42   : > { %v4318_v2 = vcombine.low %v575_v15, %v585_v35  ;;  %v407_v63 = vsel %vm4080_vm4, %v402_v56, %v406_v33  ;;  %v412_v12 = vrot.slane %v411_v51, 4  ;;  %v598_v11 = vrot.slane %v596_v1, 5  ;;  %5693 = vst [vmem:[#allocation18_spill] sm:$0xff] %v4326_v47 }
  0x43   : > { %v593_v53 = vor.u32 %v592_v45, %v589_v39  ;;  %v602_v50 = vrot.slane %v600_v62, 4  ;;  %v608_v40 = vrot.slane %v606_v5, 5  ;;  %v421_v19 = vrot.slane %v419_v60, 4  ;;  %v4339_v45 = vld [vmem:[%s4035_s26 + $0xac] sm:$0xf] }
  0x44   : > { %5692 = vst [vmem:[#allocation17_spill] sm:$0xff] %v4318_v2  ;;  %3655 = vmatprep.mubr.msk.bf16.mxu1 %vm708_vm3, %v4318_v2  ;;  %v417_v15 = vsel %vm4080_vm4, %v412_v12, %v416_v28  ;;  %v422_v33 = vshll.u32 %v4304_v20, 16  ;;  %v428_v56 = vshll.u32 %v4315_v55, 16  ;;  %v432_v51 = vshrl.u32 %v4315_v55, 16  ;;  %5695 = vst [vmem:[#allocation20_spill] sm:$0xff] %v4339_v45 }
  0x45   : > { %v4335_v1 = vcombine.low %v407_v63, %v417_v15  ;;  %v594_v39 = vrot.slane %v593_v53, 4  ;;  %v603_v62 = vor.u32 %v602_v50, %v598_v11  ;;  %v438_v35 = vshll.u32 %v4323_v36, 16 }
  0x46   : > { %v424_v5 = vrot.slane %v422_v33, 5  ;;  %v430_v60 = vrot.slane %v428_v56, 5  ;;  %v434_v2 = vrot.slane %v432_v51, 4  ;;  %v611_v28 = vshrl.u32 %v4326_v47, 16  ;;  %v4352_v51 = vld [vmem:[%s4035_s26 + $0x54] sm:$0xf] }
  0x47   : > { %5694 = vst [vmem:[#allocation19_spill] sm:$0xff] %v4335_v1  ;;  %3640 = vmatmul.mubr.msk.bf16.gmra.mxu0 %vm708_vm3, %v4335_v1  ;;  %v599_v53 = vsel %vm4080_vm4, %v594_v39, %v598_v11  ;;  %v604_v50 = vrot.slane %v603_v62, 4  ;;  %v440_v63 = vrot.slane %v438_v35, 5  ;;  %v614_v12 = vshll.u32 %v4326_v47, 16  ;;  %v4359_v62 = vld [vmem:[%s4035_s26 + $0x58] sm:$0xf] }
  0x48   : > { %v425_v15 = vor.u32 %v424_v5, %v421_v19  ;;  %v435_v58 = vor.u32 %v434_v2, %v430_v60  ;;  %v613_v33 = vrot.slane %v611_v28, 4  ;;  %v620_v56 = vshll.u32 %v4339_v45, 16 }
  0x49   : > { %v609_v1 = vsel %vm4080_vm4, %v604_v50, %v608_v40  ;;  %v616_v37 = vrot.slane %v614_v12, 5  ;;  %v624_v11 = vshrl.u32 %v4339_v45, 16  ;;  %v630_v39 = vshll.u32 %v4342_v38, 16 }
  0x4a   : > { %v4361_v2 = vcombine.low %v599_v53, %v609_v1  ;;  %v426_v19 = vrot.slane %v425_v15, 4  ;;  %v436_v35 = vrot.slane %v435_v58, 4  ;;  %v622_v5 = vrot.slane %v620_v56, 5 }
  0x4b   : > { %v617_v28 = vor.u32 %v616_v37, %v613_v33  ;;  %v626_v0 = vrot.slane %v624_v11, 4  ;;  %v632_v54 = vrot.slane %v630_v39, 5  ;;  %v443_v40 = vshrl.u32 %v4352_v51, 16  ;;  %v4376_v37 = vld [vmem:[%s4035_s26 + $0xb4] sm:$0xf] }
  0x4c   : > { %5697 = vst [vmem:[#allocation22_spill] sm:$0xff] %v4361_v2  ;;  %3656 = vmatmul.mubr.msk.bf16.gmra.mxu1 %vm708_vm3, %v4361_v2  ;;  %v431_v50 = vsel %vm4080_vm4, %v426_v19, %v430_v60  ;;  %v441_v1 = vsel %vm4080_vm4, %v436_v35, %v440_v63  ;;  %v446_v58 = vshll.u32 %v4352_v51, 16  ;;  %v452_v53 = vshll.u32 %v4359_v62, 16  ;;  %5698 = vst [vmem:[#allocation23_spill] sm:$0xff] %v4376_v37  ;;  %v4381_v11 = vld [vmem:[%s4035_s26 + $0xb8] sm:$0xf] }
  0x4d   : > { %v4378_v12 = vcombine.low %v431_v50, %v441_v1  ;;  %v618_v15 = vrot.slane %v617_v28, 4  ;;  %v627_v33 = vor.u32 %v626_v0, %v622_v5  ;;  %v445_v56 = vrot.slane %v443_v40, 4 }
  0x4e   : > { %v448_v39 = vrot.slane %v446_v58, 5  ;;  %v454_v2 = vrot.slane %v452_v53, 5  ;;  %v456_v60 = vshrl.u32 %v4359_v62, 16  ;;  %v462_v63 = vshll.u32 %v4364_v48, 16  ;;  %v4392_v58 = vld [vmem:[%s4035_s26 + $0xbc] sm:$0x1] }
  0x4f   : > { %5699 = vst [vmem:[#allocation24_spill] sm:$0xff] %v4378_v12  ;;  %3643 = vmatprep.mubr.msk.bf16.mxu0 %vm708_vm3, %v4378_v12  ;;  %v623_v19 = vsel %vm4080_vm4, %v618_v15, %v622_v5  ;;  %v628_v35 = vrot.slane %v627_v33, 4  ;;  %v635_v28 = vshrl.u32 %v4376_v37, 16  ;;  %v638_v0 = vshll.u32 %v4376_v37, 16 }
  0x50   : > { %v449_v40 = vor.u32 %v448_v39, %v445_v56  ;;  %v458_v50 = vrot.slane %v456_v60, 4  ;;  %v464_v1 = vrot.slane %v462_v63, 5  ;;  %v644_v53 = vshll.u32 %v4381_v11, 16 }
  0x51   : > { %v633_v38 = vsel %vm4080_vm4, %v628_v35, %v632_v54  ;;  %v637_v47 = vrot.slane %v635_v28, 4  ;;  %v640_v12 = vrot.slane %v638_v0, 5  ;;  %v648_v45 = vshrl.u32 %v4381_v11, 16 }
  0x52   : > { %v4398_v5 = vcombine.low %v623_v19, %v633_v38  ;;  %v450_v15 = vrot.slane %v449_v40, 4  ;;  %v459_v33 = vor.u32 %v458_v50, %v454_v2  ;;  %v646_v21 = vrot.slane %v644_v53, 5 }
  0x53   : > { %v641_v37 = vor.u32 %v640_v12, %v637_v47  ;;  %v650_v56 = vrot.slane %v648_v45, 4  ;;  %v654_v39 = vshll.u32 %v4392_v58, 16  ;;  %v3314_v54 = vrot.slane %v4044_v6, 9 }
  0x54   : > { %3659 = vmatprep.mubr.msk.bf16.mxu1 %vm708_vm3, %v4398_v5  ;;  %v455_v38 = vsel %vm4080_vm4, %v450_v15, %v454_v2  ;;  %v460_v63 = vrot.slane %v459_v33, 4  ;;  %v1235_v47 = vrot.slane %v4047_v7, 5  ;;  %v4415_v45 = vcombine.low %v4073_v30, %v4076_v31 }
  0x55   : > { %v642_v12 = vrot.slane %v641_v37, 4  ;;  %v651_v19 = vor.u32 %v650_v56, %v646_v21  ;;  %v656_v35 = vrot.slane %v654_v39, 5  ;;  %v3315_v28 = vrot.slane %v4073_v30, 9 }
  0x56   : > { %v465_v0 = vsel %vm4080_vm4, %v460_v63, %v464_v1  ;;  %v1236_v40 = vsel %vm4403_vm7, %v3314_v54, %v1235_v47  ;;  %v1237_v50 = vrot.slane %v1235_v47, 4  ;;  %v5702_v2 = vrot.slane %v4076_v31, 5 }
  0x57   : > { %v4424_v15 = vcombine.low %v455_v38, %v465_v0  ;;  %v647_v33 = vsel %vm4080_vm4, %v642_v12, %v646_v21  ;;  %v652_v37 = vrot.slane %v651_v19, 4  ;;  %v5704_v1 = vrot.slane %v4050_v8, 5 }
  0x58   : > { %v1244_v53 = vrot.slane %v5702_v2, 4  ;;  %v5703_v56 = vmov %v5702_v2  ;;  %v5705_v54 = vrot.slane %v4087_v42, 5  ;;  %v4442_v63 = vcombine.low %v4116_v10, %v4125_v23 }
  0x59   : > { %v1243_v30 = vsel %vm4403_vm7, %v3315_v28, %v5703_v56  ;;  %v1239_v39 = vsel %vm4403_vm7, %v1237_v50, %v5704_v1  ;;  %v3316_v21 = vrot.slane %v4116_v10, 9  ;;  %3644 = vmatmul.mubr.msk.bf16.gmra.mxu0 %vm708_vm3, %v4424_v15  ;;  %v657_v8 = vsel %vm4080_vm4, %v652_v37, %v656_v35 }
  0x5a   : > { %v1246_v38 = vsel %vm4403_vm7, %v1244_v53, %v5705_v54  ;;  %v3331_v31 = vcombine.low %v1236_v40, %v1239_v39  ;;  %v1249_v42 = vrot.slane %v4125_v23, 5  ;;  %v4452_v12 = vcombine.low %v647_v33, %v657_v8 }
  0x5b   : > { %v4449_v47 = vcombine.low %v1243_v30, %v1246_v38  ;;  %v1252_v19 = vrot.slane %v4132_v27, 5  ;;  %v1256_v0 = vrot.slane %v4174_v18, 5  ;;  %v3317_v35 = vrot.slane %v4166_v3, 9 }
  0x5c   : > { %5706 = vst [vmem:[#allocation25_spill] sm:$0xff] %v4452_v12  ;;  %3699 = vmatprep.mubr.msk.bf16.mxu0 %vm708_vm3, %v3331_v31  ;;  %v1250_v10 = vsel %vm4403_vm7, %v3316_v21, %v1249_v42  ;;  %v1251_v28 = vrot.slane %v1249_v42, 4  ;;  %3660 = vmatmul.mubr.msk.bf16.gmra.mxu1 %vm708_vm3, %v4452_v12  ;;  %v3318_v40 = vrot.slane %v4221_v9, 9  ;;  %v1263_v23 = vrot.slane %v4226_v22, 5 }
  0x5d   : > { %v5707_v27 = vcombine.low %v4044_v6, %v4047_v7  ;;  %v1258_v2 = vrot.slane %v1256_v0, 4  ;;  %v1259_v53 = vrot.slane %v4187_v29, 5  ;;  %v1266_v33 = vrot.slane %v4237_v46, 5  ;;  %v4487_v46 = vld [vmem:[%s5628_s1 + $0xc] sm:$0x3] }
  0x5e   : > { %v1253_v50 = vsel %vm4403_vm7, %v1251_v28, %v1252_v19  ;;  %v1265_v56 = vrot.slane %v1263_v23, 4  ;;  %v1878_v30 = vsel %vm757_vm0, %v4147_v43, 0  ;;  %v1270_v1 = vrot.slane %v4269_v4, 5  ;;  %v4504_v19 = vld [vmem:[%s5628_s1 + $0xa] sm:$0x3] }
  0x5f   : > { %3665 = vmatprep.mubr.msk.bf16.mxu1 %vm708_vm3, %v5707_v27  ;;  %v4472_v37 = vcombine.low %v1250_v10, %v1253_v50  ;;  %v1650_v6 = vsel %vm757_vm0, %v4182_v24, 0  ;;  %v1257_v7 = vsel %vm4403_vm7, %v3317_v35, %v1256_v0  ;;  %v1264_v39 = vsel %vm4403_vm7, %v3318_v40, %v1263_v23 }
  0x60   : > { %v1277_v29 = vrot.slane %v4315_v55, 5  ;;  %v1260_v43 = vsel %vm4403_vm7, %v1258_v2, %v1259_v53  ;;  %v1267_v24 = vsel %vm4403_vm7, %v1265_v56, %v1266_v33  ;;  %v3319_v54 = vrot.slane %v4264_v44, 9 }
  0x61   : > { %3700 = vmatmul.mubr.msk.bf16.vlgmr.msra.gmra.mxu0 %vm708_vm3, %v4449_v47  ;;  %v1273_v38 = vrot.slane %v4281_v14, 5  ;;  %v1272_v21 = vrot.slane %v1270_v1, 4  ;;  %v3320_v8 = vrot.slane %v4304_v20, 9  ;;  %v1280_v42 = vrot.slane %v4323_v36, 5 }
  0x62   : > { %3766 = vmatpush3.bf16.msra.mxu0 %v1878_v30  ;;  %3703 = vmatprep.mubr.msk.bf16.mxu0 %vm708_vm3, %v4472_v37  ;;  %v1279_v31 = vrot.slane %v1277_v29, 4  ;;  %v4512_v14 = vcombine.low %v1257_v7, %v1260_v43  ;;  %v4514_v10 = vcombine.low %v1264_v39, %v1267_v24  ;;  %v1271_v36 = vsel %vm4403_vm7, %v3319_v54, %v1270_v1 }
  0x63   : > { %3944 = vmatprep.subr.msk.bf16.mxu0 %vm757_vm0, %v4487_v46  ;;  %v1274_v28 = vsel %vm4403_vm7, %v1272_v21, %v1273_v38  ;;  %v1278_v0 = vsel %vm4403_vm7, %v3320_v8, %v1277_v29  ;;  %v1284_v40 = vrot.slane %v4359_v62, 5  ;;  %v1294_v23 = vrot.slane %v4065_v17, 5  ;;  %v5708_v8 = vld [vmem:[#allocation16_spill] sm:$0xff] }
  0x64   : > { %3666 = vmatmul.mubr.msk.bf16.vlgmr.msra.gmra.mxu1 %vm708_vm3, %v4415_v45  ;;  %v1281_v35 = vsel %vm4403_vm7, %v1279_v31, %v1280_v42  ;;  %v3321_v27 = vrot.slane %v4352_v51, 9  ;;  %v3322_v50 = vrot.slane %v4057_v13, 9  ;;  %v1291_v2 = vrot.slane %v4062_v16, 5  ;;  %v5709_v42 = vld [vmem:[#allocation20_spill] sm:$0xff] }
  0x65   : > { %3732 = vmatpush3.bf16.msra.mxu1 %v1650_v6  ;;  %3669 = vmatprep.mubr.msk.bf16.mxu1 %vm708_vm3, %v4442_v63  ;;  %v4533_v53 = vcombine.low %v4166_v3, %v4174_v18  ;;  %v4537_v33 = vcombine.low %v4221_v9, %v4226_v22  ;;  %v4541_v56 = vcombine.low %v4264_v44, %v4269_v4  ;;  %v1287_v3 = vrot.slane %v4364_v48, 5 }
  0x66   : > { %3943 = vmatprep.subr.msk.bf16.mxu1 %vm757_vm0, %v4504_v19  ;;  %v4545_v17 = vcombine.low %v4304_v20, %v4315_v55  ;;  %v4549_v30 = vcombine.low %v1271_v36, %v1274_v28  ;;  %v4551_v1 = vcombine.low %v1278_v0, %v1281_v35  ;;  %v4556_v18 = vcombine.low %v4195_v41, %v4202_v49  ;;  %v5710_v36 = vld [vmem:[#allocation18_spill] sm:$0xff] }
  0x67   : > { %v1286_v9 = vrot.slane %v1284_v40, 4  ;;  %v3325_v22 = vrot.slane %v4195_v41, 9  ;;  %v1312_v44 = vrot.slane %v4202_v49, 5  ;;  %v1315_v4 = vrot.slane %v4212_v57, 5 }
  0x68   : > { %v1285_v20 = vsel %vm4403_vm7, %v3321_v27, %v1284_v40  ;;  %v1292_v48 = vsel %vm4403_vm7, %v3322_v50, %v1291_v2  ;;  %v1293_v55 = vrot.slane %v1291_v2, 4  ;;  %v4569_v6 = vcombine.low %v4242_v52, %v4247_v61  ;;  %v5711_v40 = vld [vmem:[#allocation21_spill] sm:$0xff] }
  0x69   : > { %3704 = vmatmul.mubr.msk.bf16.gmra.mxu0 %vm708_vm3, %v4512_v14  ;;  %v1313_v41 = vsel %vm4403_vm7, %v3325_v22, %v1312_v44  ;;  %v1314_v49 = vrot.slane %v1312_v44, 4  ;;  %v3326_v57 = vrot.slane %v4242_v52, 9  ;;  %v1319_v7 = vrot.slane %v4247_v61, 5 }
  0x6a   : > { %3707 = vmatprep.mubr.msk.bf16.mxu0 %vm708_vm3, %v4514_v10  ;;  %v1298_v39 = vrot.slane %v4102_v59, 5  ;;  %v1322_v29 = vrot.slane %v4259_v34, 5  ;;  %v4583_v43 = vcombine.low %v4286_v26, %v4293_v25  ;;  %v3327_v24 = vrot.slane %v4286_v26, 9 }
  0x6b   : > { %v1288_v54 = vsel %vm4403_vm7, %v1286_v9, %v1287_v3  ;;  %v1316_v52 = vsel %vm4403_vm7, %v1314_v49, %v1315_v4  ;;  %v1320_v61 = vsel %vm4403_vm7, %v3326_v57, %v1319_v7  ;;  %v1321_v38 = vrot.slane %v1319_v7, 4  ;;  %v5712_v3 = vld [vmem:[#allocation23_spill] sm:$0xff]  ;;  %v5713_v57 = vld [vmem:[#allocation8_spill] sm:$0xff] }
  0x6c   : > { %3670 = vmatmul.mubr.msk.bf16.gmra.mxu1 %vm708_vm3, %v4533_v53  ;;  %v4592_v21 = vcombine.low %v1313_v41, %v1316_v52  ;;  %v1326_v34 = vrot.slane %v4293_v25, 5  ;;  %v1329_v31 = vrot.slane %v5708_v8, 5  ;;  %v4598_v28 = vcombine.low %v5710_v36, %v5709_v42 }
  0x6d   : > { %3673 = vmatprep.mubr.msk.bf16.mxu1 %vm708_vm3, %v4537_v33  ;;  %v1323_v26 = vsel %vm4403_vm7, %v1321_v38, %v1322_v29  ;;  %v3328_v0 = vrot.slane %v5710_v36, 9  ;;  %v1333_v35 = vrot.slane %v5709_v42, 5  ;;  %v1336_v27 = vrot.slane %v5711_v40, 5  ;;  %v5715_v42 = vld [vmem:[#allocation4_spill] sm:$0xff] }
  0x6e   : > { %v4607_v50 = vcombine.low %v1320_v61, %v1323_v26  ;;  %v1327_v25 = vsel %vm4403_vm7, %v3327_v24, %v1326_v34  ;;  %v1328_v2 = vrot.slane %v1326_v34, 4  ;;  %v4613_v9 = vcombine.low %v5712_v3, %v4381_v11 }
  0x6f   : > { %v1334_v22 = vsel %vm4403_vm7, %v3328_v0, %v1333_v35  ;;  %v1335_v44 = vrot.slane %v1333_v35, 4  ;;  %v3329_v4 = vrot.slane %v5712_v3, 9  ;;  %v1340_v41 = vrot.slane %v4381_v11, 5  ;;  %v5716_v0 = vld [vmem:[#allocation6_spill] sm:$0xff] }
  0x70   : > { %v1295_v49 = vsel %vm4403_vm7, %v1293_v55, %v1294_v23  ;;  %v1305_v7 = vrot.slane %v5713_v57, 5  ;;  %v1330_v29 = vsel %vm4403_vm7, %v1328_v2, %v1329_v31  ;;  %v1343_v24 = vrot.slane %v4392_v58, 5  ;;  %v5714_v55 = vld [vmem:[#allocation3_spill] sm:$0xff] }
  0x71   : > { %3708 = vmatmul.mubr.msk.bf16.gmra.mxu0 %vm708_vm3, %v4549_v30  ;;  %v4629_v52 = vcombine.low %v1327_v25, %v1330_v29  ;;  %v1337_v61 = vsel %vm4403_vm7, %v1335_v44, %v1336_v27  ;;  %v1341_v11 = vsel %vm4403_vm7, %v3329_v4, %v1340_v41  ;;  %v1342_v38 = vrot.slane %v1340_v41, 4  ;;  %v5717_v27 = vld [vmem:[#allocation9_spill] sm:$0xff]  ;;  %v4716_v4 = vld [vmem:[%s4035_s26 + $0xc0] sm:$0xf]  ;;  %v266_v41 = vld [vmem:[%s4035_s26 + $0xc8] sm:$0x1] }
  0x72   : > { %3711 = vmatprep.mubr.msk.bf16.mxu0 %vm708_vm3, %v4551_v1  ;;  %v4637_v23 = vcombine.low %v1285_v20, %v1288_v54  ;;  %v3323_v34 = vrot.slane %v5714_v55, 9  ;;  %v4640_v58 = vcombine.low %v1334_v22, %v1337_v61  ;;  %v4642_v8 = vcombine.low %v1292_v48, %v1295_v49  ;;  %v5718_v61 = vld [vmem:[#allocation7_spill] sm:$0xff] }
  0x73   : > { %v1300_v31 = vrot.slane %v1298_v39, 4  ;;  %v1301_v36 = vrot.slane %v5715_v42, 5  ;;  %v1344_v26 = vsel %vm4403_vm7, %v1342_v38, %v1343_v24  ;;  %v3324_v35 = vrot.slane %v5716_v0, 9  ;;  %v5720_v42 = vld [vmem:[#allocation13_spill] sm:$0xff] }
  0x74   : > { %3674 = vmatmul.mubr.msk.bf16.gmra.mxu1 %vm708_vm3, %v4541_v56  ;;  %v1307_v40 = vrot.slane %v1305_v7, 4  ;;  %v1308_v25 = vrot.slane %v5717_v27, 5  ;;  %v4649_v2 = vcombine.low %v1341_v11, %v1344_v26  ;;  %v4653_v20 = vcombine.low %v4352_v51, %v4359_v62  ;;  %v5724_v26 = vld [vmem:[#allocation5_spill] sm:$0xff] }
  0x75   : > { %3677 = vmatprep.mubr.msk.bf16.mxu1 %vm708_vm3, %v4545_v17  ;;  %v4659_v48 = vcombine.low %v4057_v13, %v4062_v16  ;;  %v1299_v54 = vsel %vm4403_vm7, %v3323_v34, %v1298_v39  ;;  %v1302_v3 = vsel %vm4403_vm7, %v1300_v31, %v1301_v36  ;;  %v1306_v51 = vsel %vm4403_vm7, %v3324_v35, %v1305_v7  ;;  %v5719_v34 = vld [vmem:[#allocation11_spill] sm:$0xff]  ;;  %v5723_v36 = vld [vmem:[#allocation24_spill] sm:$0xff] }
  0x76   : > { %v1309_v62 = vsel %vm4403_vm7, %v1307_v40, %v1308_v25  ;;  %v4675_v13 = vcombine.low %v1299_v54, %v1302_v3  ;;  %v4681_v39 = vcombine.low %v5714_v55, %v4102_v59  ;;  %v4687_v22 = vcombine.low %v5716_v0, %v5713_v57  ;;  %v4710_v59 = vld [vmem:[%s4035_s26 + $0xc4] sm:$0xf]  ;;  %v3455_v55 = vld [vmem:[%s5628_s1 + $0x10] sm:$0x3] }
  0x77   : > { %v4677_v16 = vcombine.low %v1306_v51, %v1309_v62  ;;  %v2076_v44 = vrot.slane %v4710_v59, 5  ;;  %v3399_v49 = vrot.slane %v4716_v4, 9  ;;  %v2079_v7 = vrot.slane %v266_v41, 5  ;;  %v5725_v0 = vld [vmem:[#allocation10_spill] sm:$0xff]  ;;  %v5726_v35 = vld [vmem:[#allocation12_spill] sm:$0xff] }
  0x78   : > { %v2296_v38 = vsel %vm757_vm0, %v4487_v46, 0  ;;  %v2090_v31 = vsel %vm757_vm0, %v4504_v19, 0  ;;  %v5721_v46 = vld [vmem:[#allocation15_spill] sm:$0xff]  ;;  %v5727_v40 = vld [vmem:[#allocation14_spill] sm:$0xff]  ;;  %v1846_v27 = vshrl.u32 %v4716_v4, 16  ;;  %v1849_v25 = vshll.u32 %v4716_v4, 16 }
  0x79   : > { %3712 = vmatmul.mubr.msk.bf16.gmra.mxu0 %vm708_vm3, %v4637_v23  ;;  %v2078_v57 = vrot.slane %v2076_v44, 4  ;;  %v2077_v29 = vsel %vm4403_vm7, %v3399_v49, %v2076_v44  ;;  %v5722_v19 = vld [vmem:[#allocation19_spill] sm:$0xff]  ;;  %v1859_v54 = vshrl.u32 %v4710_v59, 16  ;;  %v1855_v3 = vshll.u32 %v4710_v59, 16 }
  0x7a   : > { %3715 = vmatprep.mubr.msk.bf16.mxu0 %vm708_vm3, %v4642_v8  ;;  %v1848_v51 = vrot.slane %v1846_v27, 4  ;;  %v1851_v62 = vrot.slane %v1849_v25, 5 }
  0x7b   : > { %v2080_v24 = vsel %vm4403_vm7, %v2078_v57, %v2079_v7  ;;  %v1857_v44 = vrot.slane %v1855_v3, 5  ;;  %v1861_v49 = vrot.slane %v1859_v54, 4  ;;  %v5728_v57 = vld [vmem:[#allocation17_spill] sm:$0xff]  ;;  %v5729_v7 = vld [vmem:[#allocation22_spill] sm:$0xff]  ;;  %v3364_v3 = vcombine.low %v4716_v4, %v4710_v59 }
  0x7c   : > { %3678 = vmatmul.mubr.msk.bf16.gmra.mxu1 %vm708_vm3, %v4653_v20  ;;  %v4728_v11 = vcombine.low %v2077_v29, %v2080_v24  ;;  %v1852_v29 = vor.u32 %v1851_v62, %v1848_v51  ;;  %v2736_v51 = vsel %vm757_vm0, %v3455_v55, 0 }
  0x7d   : > { %3681 = vmatprep.mubr.msk.bf16.mxu1 %vm708_vm3, %v4659_v48  ;;  %v1862_v24 = vor.u32 %v1861_v49, %v1857_v44 }
  0x81   : > { %3716 = vmatmul.mubr.msk.bf16.gmra.mxu0 %vm708_vm3, %v4675_v13 }
  0x82   : > { %3719 = vmatprep.mubr.msk.bf16.mxu0 %vm708_vm3, %v4677_v16 }
  0x84   : > { %3682 = vmatmul.mubr.msk.bf16.gmra.mxu1 %vm708_vm3, %v4681_v39 }
  0x85   : > { %3685 = vmatprep.mubr.msk.bf16.mxu1 %vm708_vm3, %v4687_v22 }
  0x89   : > { %3720 = vmatmul.mubr.msk.bf16.gmra.mxu0 %vm708_vm3, %v4592_v21 }
  0x8a   : > { %3723 = vmatprep.mubr.msk.bf16.mxu0 %vm708_vm3, %v4607_v50 }
  0x8c   : > { %3686 = vmatmul.mubr.msk.bf16.gmra.mxu1 %vm708_vm3, %v4556_v18 }
  0x8d   : > { %3689 = vmatprep.mubr.msk.bf16.mxu1 %vm708_vm3, %v4569_v6 }
  0x91   : > { %3724 = vmatmul.mubr.msk.bf16.gmra.mxu0 %vm708_vm3, %v4629_v52 }
  0x92   : > { %3727 = vmatprep.mubr.msk.bf16.mxu0 %vm708_vm3, %v4640_v58 }
  0x94   : > { %3690 = vmatmul.mubr.msk.bf16.gmra.mxu1 %vm708_vm3, %v4583_v43 }
  0x95   : > { %3693 = vmatprep.mubr.msk.bf16.mxu1 %vm708_vm3, %v4598_v28 }
  0x99   : > { %3728 = vmatmul.mubr.msk.bf16.gmra.mxu0 %vm708_vm3, %v4649_v2 }
  0x9a   : > { %3767 = vmatprep.mubr.msk.bf16.mxu0 %vm708_vm3, %v5718_v61  ;;  %v1865_v61 = vshll.u32 %v266_v41, 16 }
  0x9c   : > { %3694 = vmatmul.mubr.msk.bf16.gmra.mxu1 %vm708_vm3, %v4613_v9  ;;  %v1867_v27 = vrot.slane %v1865_v61, 5  ;;  %v4920_v61 = vld [vmem:[%s4035_s26 + $0xd0] sm:$0xf] }
  0x9d   : > { %3733 = vmatprep.mubr.msk.bf16.mxu1 %vm708_vm3, %v4415_v45  ;;  %v3436_v45 = vld [vmem:[%s5628_s1 + $0xe] sm:$0x3] }
  0x9e   : > { %v2524_v62 = vsel %vm757_vm0, %v3436_v45, 0 }
  0xa1   : > { %3768 = vmatmul.mubr.msk.bf16.vlgmr.msra.gmra.mxu0 %vm708_vm3, %v5719_v34 }
  0xa2   : > { %3834 = vmatpush3.bf16.msra.mxu0 %v2296_v38  ;;  %3771 = vmatprep.mubr.msk.bf16.mxu0 %vm708_vm3, %v5720_v42  ;;  %v1853_v38 = vrot.slane %v1852_v29, 4 }
  0xa3   : > { %3946 = vmatprep.subr.msk.bf16.mxu0 %vm757_vm0, %v3455_v55 }
  0xa4   : > { %3734 = vmatmul.mubr.msk.bf16.vlgmr.msra.gmra.mxu1 %vm708_vm3, %v4442_v63  ;;  %v1858_v25 = vsel %vm4080_vm4, %v1853_v38, %v1857_v44 }
  0xa5   : > { %3800 = vmatpush3.bf16.msra.mxu1 %v2090_v31  ;;  %3737 = vmatprep.mubr.msk.bf16.mxu1 %vm708_vm3, %v4533_v53  ;;  %v1863_v31 = vrot.slane %v1862_v24, 4 }
  0xa6   : > { %3945 = vmatprep.subr.msk.bf16.mxu1 %vm757_vm0, %v3436_v45 }
  0xa7   : > { %v1868_v41 = vsel %vm4080_vm4, %v1863_v31, %v1867_v27 }
  0xa8   : > { %v4810_v54 = vcombine.low %v1858_v25, %v1868_v41 }
  0xa9   : > { %3772 = vmatmul.mubr.msk.bf16.gmra.mxu0 %vm708_vm3, %v5721_v46 }
  0xaa   : > { %3775 = vmatprep.mubr.msk.bf16.mxu0 %vm708_vm3, %v5722_v19  ;;  %5730 = vst [vmem:[#allocation16_spill] sm:$0xff] %v4810_v54 }
  0xac   : > { %3738 = vmatmul.mubr.msk.bf16.gmra.mxu1 %vm708_vm3, %v4537_v33 }
  0xad   : > { %3741 = vmatprep.mubr.msk.bf16.mxu1 %vm708_vm3, %v4541_v56 }
  0xb1   : > { %3776 = vmatmul.mubr.msk.bf16.gmra.mxu0 %vm708_vm3, %v5723_v36 }
  0xb2   : > { %3779 = vmatprep.mubr.msk.bf16.mxu0 %vm708_vm3, %v4424_v15 }
  0xb4   : > { %3742 = vmatmul.mubr.msk.bf16.gmra.mxu1 %vm708_vm3, %v4545_v17 }
  0xb5   : > { %3745 = vmatprep.mubr.msk.bf16.mxu1 %vm708_vm3, %v4653_v20 }
  0xb9   : > { %3780 = vmatmul.mubr.msk.bf16.gmra.mxu0 %vm708_vm3, %v5724_v26 }
  0xba   : > { %3783 = vmatprep.mubr.msk.bf16.mxu0 %vm708_vm3, %v5725_v0 }
  0xbc   : > { %3746 = vmatmul.mubr.msk.bf16.gmra.mxu1 %vm708_vm3, %v4659_v48 }
  0xbd   : > { %3749 = vmatprep.mubr.msk.bf16.mxu1 %vm708_vm3, %v4681_v39 }
  0xc1   : > { %3784 = vmatmul.mubr.msk.bf16.gmra.mxu0 %vm708_vm3, %v5726_v35 }
  0xc2   : > { %3787 = vmatprep.mubr.msk.bf16.mxu0 %vm708_vm3, %v5727_v40 }
  0xc4   : > { %3750 = vmatmul.mubr.msk.bf16.gmra.mxu1 %vm708_vm3, %v4687_v22 }
  0xc5   : > { %3753 = vmatprep.mubr.msk.bf16.mxu1 %vm708_vm3, %v4556_v18 }
  0xc9   : > { %3788 = vmatmul.mubr.msk.bf16.gmra.mxu0 %vm708_vm3, %v5728_v57 }
  0xca   : > { %3791 = vmatprep.mubr.msk.bf16.mxu0 %vm708_vm3, %v5729_v7 }
  0xcc   : > { %3754 = vmatmul.mubr.msk.bf16.gmra.mxu1 %vm708_vm3, %v4569_v6 }
  0xcd   : > { %3757 = vmatprep.mubr.msk.bf16.mxu1 %vm708_vm3, %v4583_v43 }
  0xd1   : > { %3792 = vmatmul.mubr.msk.bf16.gmra.mxu0 %vm708_vm3, %v4398_v5 }
  0xd2   : > { %3795 = vmatprep.mubr.msk.bf16.mxu0 %vm708_vm3, %v4452_v12 }
  0xd4   : > { %3758 = vmatmul.mubr.msk.bf16.gmra.mxu1 %vm708_vm3, %v4598_v28 }
  0xd5   : > { %3761 = vmatprep.mubr.msk.bf16.mxu1 %vm708_vm3, %v4613_v9 }
  0xd9   : > { %3796 = vmatmul.mubr.msk.bf16.gmra.mxu0 %vm708_vm3, %v4810_v54 }
  0xda   : > { %3835 = vmatprep.mubr.msk.bf16.mxu0 %vm708_vm3, %v4442_v63 }
  0xdc   : > { %3762 = vmatmul.mubr.msk.bf16.gmra.mxu1 %vm708_vm3, %v3364_v3 }
  0xdd   : > { %3801 = vmatprep.mubr.msk.bf16.mxu1 %vm708_vm3, %v4449_v47 }
  0xe1   : > { %3836 = vmatmul.mubr.msk.bf16.vlgmr.msra.gmra.mxu0 %vm708_vm3, %v4533_v53 }
  0xe2   : > { %3902 = vmatpush3.bf16.msra.mxu0 %v2736_v51  ;;  %3839 = vmatprep.mubr.msk.bf16.mxu0 %vm708_vm3, %v4537_v33 }
  0xe4   : > { %3802 = vmatmul.mubr.msk.bf16.vlgmr.msra.gmra.mxu1 %vm708_vm3, %v4472_v37 }
  0xe5   : > { %3868 = vmatpush3.bf16.msra.mxu1 %v2524_v62  ;;  %3805 = vmatprep.mubr.msk.bf16.mxu1 %vm708_vm3, %v4512_v14  ;;  %v4833_v63 = vpop.f32.mrf.mxu0 }
  0xe7   : > { %v4843_v53 = vpop.f32.mrf.mxu0 }
  0xe9   : > { %3840 = vmatmul.mubr.msk.bf16.gmra.mxu0 %vm708_vm3, %v4541_v56  ;;  %v4849_v56 = vpop.f32.mrf.mxu0 }
  0xea   : > { %3843 = vmatprep.mubr.msk.bf16.mxu0 %vm708_vm3, %v4545_v17  ;;  %v4839_v47 = vpop.f32.mrf.mxu1 }
  0xeb   : > { %v4859_v59 = vpop.f32.mrf.mxu0 }
  0xec   : > { %3806 = vmatmul.mubr.msk.bf16.gmra.mxu1 %vm708_vm3, %v4514_v10  ;;  %v4845_v33 = vpop.f32.mrf.mxu1 }
  0xed   : > { %3809 = vmatprep.mubr.msk.bf16.mxu1 %vm708_vm3, %v4549_v30 }
  0xee   : > { %v4855_v17 = vpop.f32.mrf.mxu1 }
  0xf0   : > { %v4861_v4 = vpop.f32.mrf.mxu1 }
  0xf1   : > { %3844 = vmatmul.mubr.msk.bf16.gmra.mxu0 %vm708_vm3, %v4653_v20 }
  0xf2   : > { %3847 = vmatprep.mubr.msk.bf16.mxu0 %vm708_vm3, %v4659_v48 }
  0xf4   : > { %3810 = vmatmul.mubr.msk.bf16.gmra.mxu1 %vm708_vm3, %v4551_v1 }
  0xf5   : > { %3813 = vmatprep.mubr.msk.bf16.mxu1 %vm708_vm3, %v4637_v23 }
  0xf6   : > { %v4865_v20 = vpop.f32.mrf.mxu0 }
  0xf8   : > { %v4875_v55 = vpop.f32.mrf.mxu0 }
  0xf9   : > { %3848 = vmatmul.mubr.msk.bf16.gmra.mxu0 %vm708_vm3, %v4681_v39 }
  0xfa   : > { %3851 = vmatprep.mubr.msk.bf16.mxu0 %vm708_vm3, %v4687_v22  ;;  %v4871_v48 = vpop.f32.mrf.mxu1  ;;  %v4881_v39 = vpop.f32.mrf.mxu0 }
  0xfc   : > { %3814 = vmatmul.mubr.msk.bf16.gmra.mxu1 %vm708_vm3, %v4642_v8  ;;  %v4877_v45 = vpop.f32.mrf.mxu1  ;;  %v4891_v44 = vpop.f32.mrf.mxu0 }
  0xfd   : > { %3817 = vmatprep.mubr.msk.bf16.mxu1 %vm708_vm3, %v4675_v13 }
  0xfe   : > { %v4887_v22 = vpop.f32.mrf.mxu1 }
 0x100   : > { %v4893_v49 = vpop.f32.mrf.mxu1 }
 0x101   : > { %3852 = vmatmul.mubr.msk.bf16.gmra.mxu0 %vm708_vm3, %v4556_v18 }
 0x102   : > { %3855 = vmatprep.mubr.msk.bf16.mxu0 %vm708_vm3, %v4569_v6 }
 0x104   : > { %3818 = vmatmul.mubr.msk.bf16.gmra.mxu1 %vm708_vm3, %v4677_v16 }
 0x105   : > { %3821 = vmatprep.mubr.msk.bf16.mxu1 %vm708_vm3, %v4592_v21 }
 0x107   : > { %v4897_v18 = vpop.f32.mrf.mxu0 }
 0x109   : > { %3856 = vmatmul.mubr.msk.bf16.gmra.mxu0 %vm708_vm3, %v4583_v43  ;;  %v4907_v29 = vpop.f32.mrf.mxu0 }
 0x10a   : > { %3859 = vmatprep.mubr.msk.bf16.mxu0 %vm708_vm3, %v4598_v28  ;;  %v4917_v28 = vld [vmem:[%s4035_s26 + $0xcc] sm:$0xf] }
 0x10b   : > { %v4913_v43 = vpop.f32.mrf.mxu0 }
 0x10c   : > { %3822 = vmatmul.mubr.msk.bf16.gmra.mxu1 %vm708_vm3, %v4607_v50  ;;  %v4903_v6 = vpop.f32.mrf.mxu1 }
 0x10d   : > { %5731 = vst [vmem:[#allocation20_spill] sm:$0xff] %v4903_v6  ;;  %3825 = vmatprep.mubr.msk.bf16.mxu1 %vm708_vm3, %v4629_v52  ;;  %v4926_v31 = vpop.f32.mrf.mxu0 }
 0x10e   : > { %v4909_v24 = vpop.f32.mrf.mxu1 }
 0x10f   : > { %5732 = vst [vmem:[#allocation18_spill] sm:$0xff] %v4909_v24 }
 0x110   : > { %v4924_v38 = vpop.f32.mrf.mxu1 }
 0x111   : > { %3860 = vmatmul.mubr.msk.bf16.gmra.mxu0 %vm708_vm3, %v4613_v9  ;;  %5733 = vst [vmem:[#allocation21_spill] sm:$0xff] %v4924_v38  ;;  %v3419_v9 = vcombine.low %v4917_v28, %v4920_v61 }
 0x112   : > { %3863 = vmatprep.mubr.msk.bf16.mxu0 %vm708_vm3, %v3364_v3  ;;  %v4932_v27 = vpop.f32.mrf.mxu1 }
 0x113   : > { %5734 = vst [vmem:[#allocation23_spill] sm:$0xff] %v4932_v27 }
 0x114   : > { %3826 = vmatmul.mubr.msk.bf16.gmra.mxu1 %vm708_vm3, %v4640_v58 }
 0x115   : > { %3829 = vmatprep.mubr.msk.bf16.mxu1 %vm708_vm3, %v4649_v2 }
 0x119   : > { %v4934_v25 = vpop.f32.mrf.mxu0  ;;  %3864 = vmatmul.mubr.msk.bf16.gmra.mxu0 %vm708_vm3, %v3419_v9 }
 0x11a   : > { %3903 = vmatprep.mubr.msk.bf16.mxu0 %vm708_vm3, %v4472_v37 }
 0x11b   : > { %v4939_v41 = vpop.f32.mrf.mxu0 }
 0x11c   : > { %v4941_v3 = vpop.f32.mrf.mxu1  ;;  %3830 = vmatmul.mubr.msk.bf16.gmra.mxu1 %vm708_vm3, %v4728_v11 }
 0x11d   : > { %5735 = vst [vmem:[#allocation8_spill] sm:$0xff] %v4941_v3  ;;  %v4945_v51 = vpop.f32.mrf.mxu0  ;;  %3869 = vmatprep.mubr.msk.bf16.mxu1 %vm708_vm3, %v5719_v34 }
 0x11e   : > { %v4949_v62 = vpop.f32.mrf.mxu1 }
 0x11f   : > { %5736 = vst [vmem:[#allocation3_spill] sm:$0xff] %v4949_v62  ;;  %v4951_v27 = vpop.f32.mrf.mxu0 }
 0x120   : > { %v4953_v9 = vpop.f32.mrf.mxu1 }
 0x121   : > { %5737 = vst [vmem:[#allocation4_spill] sm:$0xff] %v4953_v9  ;;  %v3701_v38 = vpop.f32.mrf.mxu0  ;;  %3904 = vmatmul.mubr.msk.bf16.vlgmr.msra.gmra.mxu0 %vm708_vm3, %v4512_v14 }
 0x122   : > { %v4957_v37 = vpop.f32.mrf.mxu1  ;;  %3907 = vmatprep.mubr.msk.bf16.mxu0 %vm708_vm3, %v4514_v10 }
 0x123   : > { %5738 = vst [vmem:[#allocation6_spill] sm:$0xff] %v4957_v37  ;;  %v1480_v3 = vpop.f32.mrf.mxu0 }
 0x124   : > { %v3667_v24 = vpop.f32.mrf.mxu1  ;;  %3870 = vmatmul.mubr.msk.bf16.vlgmr.msra.gmra.mxu1 %vm708_vm3, %v5720_v42 }
 0x125   : > { %v1096_v34 = vadd.f32 %v3667_v24, %v4833_v63  ;;  %v3702_v62 = vpop.f32.mrf.mxu0  ;;  %3873 = vmatprep.mubr.msk.bf16.mxu1 %vm708_vm3, %v5721_v46 }
 0x126   : > { %v1087_v9 = vpop.f32.mrf.mxu1 }
 0x127   : > { %v4966_v54 = vadd.f32 %v3701_v38, %v1096_v34  ;;  %v1088_v14 = vadd.f32 %v1087_v9, %v4843_v53  ;;  %v1483_v37 = vpop.f32.mrf.mxu0 }
 0x128   : > { %v3668_v6 = vpop.f32.mrf.mxu1 }
 0x129   : > { %v4969_v32 = vadd.f32 %v1480_v3, %v1088_v14  ;;  %v1099_v10 = vadd.f32 %v3668_v6, %v4849_v56  ;;  %v3705_v12 = vpop.f32.mrf.mxu0  ;;  %3908 = vmatmul.mubr.msk.bf16.gmra.mxu0 %vm708_vm3, %v4549_v30 }
 0x12a   : > { %v1090_v42 = vpop.f32.mrf.mxu1  ;;  %3911 = vmatprep.mubr.msk.bf16.mxu0 %vm708_vm3, %v4551_v1 }
 0x12b   : > { %v4976_v46 = vadd.f32 %v3702_v62, %v1099_v10  ;;  %v1091_v63 = vadd.f32 %v1090_v42, %v4859_v59  ;;  %v1496_v24 = vpop.f32.mrf.mxu0 }
 0x12c   : > { %v3671_v53 = vpop.f32.mrf.mxu1  ;;  %3874 = vmatmul.mubr.msk.bf16.gmra.mxu1 %vm708_vm3, %v5722_v19 }
 0x12d   : > { %v4981_v38 = vadd.f32 %v1483_v37, %v1091_v63  ;;  %v1112_v56 = vadd.f32 %v3671_v53, %v4865_v20  ;;  %v3706_v6 = vpop.f32.mrf.mxu0  ;;  %3877 = vmatprep.mubr.msk.bf16.mxu1 %vm708_vm3, %v5723_v36 }
 0x12e   : > { %v1103_v30 = vpop.f32.mrf.mxu1 }
 0x12f   : > { %v4986_v3 = vadd.f32 %v3705_v12, %v1112_v56  ;;  %v1104_v1 = vadd.f32 %v1103_v30, %v4875_v55  ;;  %v1499_v62 = vpop.f32.mrf.mxu0 }
 0x130   : > { %v3672_v59 = vpop.f32.mrf.mxu1 }
 0x131   : > { %v4989_v9 = vadd.f32 %v1496_v24, %v1104_v1  ;;  %v1115_v34 = vadd.f32 %v3672_v59, %v4881_v39  ;;  %v3709_v19 = vpop.f32.mrf.mxu0  ;;  %3912 = vmatmul.mubr.msk.bf16.gmra.mxu0 %vm708_vm3, %v4637_v23 }
 0x132   : > { %v1106_v20 = vpop.f32.mrf.mxu1  ;;  %3915 = vmatprep.mubr.msk.bf16.mxu0 %vm708_vm3, %v4642_v8 }
 0x133   : > { %v4996_v36 = vadd.f32 %v3706_v6, %v1115_v34  ;;  %v1107_v12 = vadd.f32 %v1106_v20, %v4891_v44  ;;  %v1512_v37 = vpop.f32.mrf.mxu0 }
 0x134   : > { %v3675_v55 = vpop.f32.mrf.mxu1  ;;  %3878 = vmatmul.mubr.msk.bf16.gmra.mxu1 %vm708_vm3, %v4424_v15 }
 0x135   : > { %v5001_v14 = vadd.f32 %v1499_v62, %v1107_v12  ;;  %v1128_v39 = vadd.f32 %v3675_v55, %v4897_v18  ;;  %v3710_v10 = vpop.f32.mrf.mxu0  ;;  %3881 = vmatprep.mubr.msk.bf16.mxu1 %vm708_vm3, %v5724_v26 }
 0x136   : > { %v1119_v23 = vpop.f32.mrf.mxu1 }
 0x137   : > { %v5006_v42 = vadd.f32 %v3709_v19, %v1128_v39  ;;  %v1120_v8 = vadd.f32 %v1119_v23, %v4907_v29  ;;  %v1515_v63 = vpop.f32.mrf.mxu0 }
 0x138   : > { %v3676_v44 = vpop.f32.mrf.mxu1 }
 0x139   : > { %v5009_v24 = vadd.f32 %v1512_v37, %v1120_v8  ;;  %v1131_v53 = vadd.f32 %v3676_v44, %v4913_v43  ;;  %v3713_v15 = vpop.f32.mrf.mxu0  ;;  %3916 = vmatmul.mubr.msk.bf16.gmra.mxu0 %vm708_vm3, %v4675_v13  ;;  %v2495_v37 = vshll.u32 %v4917_v28, 16 }
 0x13a   : > { %v1122_v18 = vpop.f32.mrf.mxu1  ;;  %3919 = vmatprep.mubr.msk.bf16.mxu0 %vm708_vm3, %v4677_v16 }
 0x13b   : > { %v5016_v26 = vadd.f32 %v3710_v10, %v1131_v53  ;;  %v1123_v56 = vadd.f32 %v1122_v18, %v4926_v31  ;;  %v1528_v6 = vpop.f32.mrf.mxu0  ;;  %v2497_v44 = vrot.slane %v2495_v37, 5 }
 0x13c   : > { %v3679_v29 = vpop.f32.mrf.mxu1  ;;  %3882 = vmatmul.mubr.msk.bf16.gmra.mxu1 %vm708_vm3, %v5725_v0 }
 0x13d   : > { %v5021_v30 = vadd.f32 %v1515_v63, %v1123_v56  ;;  %v1144_v43 = vadd.f32 %v3679_v29, %v4934_v25  ;;  %v3714_v1 = vpop.f32.mrf.mxu0  ;;  %3885 = vmatprep.mubr.msk.bf16.mxu1 %vm708_vm3, %v5726_v35 }
 0x13e   : > { %v1135_v13 = vpop.f32.mrf.mxu1 }
 0x13f   : > { %v5026_v62 = vadd.f32 %v3713_v15, %v1144_v43  ;;  %v1136_v16 = vadd.f32 %v1135_v13, %v4939_v41  ;;  %v1531_v59 = vpop.f32.mrf.mxu0  ;;  %v2492_v41 = vshrl.u32 %v4917_v28, 16 }
 0x140   : > { %v3680_v31 = vpop.f32.mrf.mxu1 }
 0x141   : > { %v5029_v34 = vadd.f32 %v1528_v6, %v1136_v16  ;;  %v1147_v19 = vadd.f32 %v3680_v31, %v4945_v51  ;;  %v3717_v0 = vpop.f32.mrf.mxu0  ;;  %3920 = vmatmul.mubr.msk.bf16.gmra.mxu0 %vm708_vm3, %v4592_v21  ;;  %v2501_v51 = vshll.u32 %v4920_v61, 16  ;;  %v2505_v21 = vshrl.u32 %v4920_v61, 16 }
 0x142   : > { %v1138_v25 = vpop.f32.mrf.mxu1  ;;  %3923 = vmatprep.mubr.msk.bf16.mxu0 %vm708_vm3, %v4607_v50 }
 0x143   : > { %v5036_v35 = vadd.f32 %v3714_v1, %v1147_v19  ;;  %v1139_v20 = vadd.f32 %v1138_v25, %v4951_v27  ;;  %v1544_v12 = vpop.f32.mrf.mxu0  ;;  %v2503_v15 = vrot.slane %v2501_v51, 5  ;;  %v2507_v18 = vrot.slane %v2505_v21, 4 }
 0x144   : > { %v3683_v55 = vpop.f32.mrf.mxu1  ;;  %3886 = vmatmul.mubr.msk.bf16.gmra.mxu1 %vm708_vm3, %v5727_v40  ;;  %v2494_v40 = vrot.slane %v2492_v41, 4  ;;  %v3454_v19 = vrot.slane %v4917_v28, 9 }
 0x145   : > { %v5045_v39 = vadd.f32 %v1531_v59, %v1139_v20  ;;  %v1160_v50 = vadd.f32 %v3683_v55, %v4839_v47  ;;  %v3718_v10 = vpop.f32.mrf.mxu0  ;;  %3889 = vmatprep.mubr.msk.bf16.mxu1 %vm708_vm3, %v5728_v57  ;;  %v2722_v57 = vrot.slane %v4920_v61, 5 }
 0x146   : > { %v1151_v27 = vpop.f32.mrf.mxu1 }
 0x147   : > { %v5050_v23 = vadd.f32 %v3717_v0, %v1160_v50  ;;  %v1152_v8 = vadd.f32 %v1151_v27, %v4845_v33  ;;  %v1547_v63 = vpop.f32.mrf.mxu0  ;;  %v269_v33 = vld [vmem:[%s4035_s26 + $0xd4] sm:$0x1] }
 0x148   : > { %v3684_v53 = vpop.f32.mrf.mxu1  ;;  %v2511_v31 = vshll.u32 %v269_v33, 16  ;;  %v2725_v25 = vrot.slane %v269_v33, 5 }
 0x149   : > { %v5053_v56 = vadd.f32 %v1544_v12, %v1152_v8  ;;  %v1163_v47 = vadd.f32 %v3684_v53, %v4855_v17  ;;  %v3721_v6 = vpop.f32.mrf.mxu0  ;;  %3924 = vmatmul.mubr.msk.bf16.gmra.mxu0 %vm708_vm3, %v4629_v52  ;;  %v2498_v17 = vor.u32 %v2497_v44, %v2494_v40 }
 0x14a   : > { %v1154_v29 = vpop.f32.mrf.mxu1  ;;  %3927 = vmatprep.mubr.msk.bf16.mxu0 %vm708_vm3, %v4640_v58  ;;  %v2508_v58 = vor.u32 %v2507_v18, %v2503_v15  ;;  %v2513_v28 = vrot.slane %v2511_v31, 5 }
 0x14b   : > { %v5062_v43 = vadd.f32 %v3718_v10, %v1163_v47  ;;  %v1155_v1 = vadd.f32 %v1154_v29, %v4861_v4  ;;  %v1560_v13 = vpop.f32.mrf.mxu0  ;;  %v2724_v4 = vrot.slane %v2722_v57, 4  ;;  %v2499_v37 = vrot.slane %v2498_v17, 4  ;;  %v5742_v47 = vld [vmem:[#allocation16_spill] sm:$0xff]  ;;  %v5743_v29 = vld [vmem:[#allocation18_spill] sm:$0xff]  ;;  %v5744_v17 = vld [vmem:[#allocation21_spill] sm:$0xff] }
 0x14c   : > { %v3687_v16 = vpop.f32.mrf.mxu1  ;;  %3890 = vmatmul.mubr.msk.bf16.gmra.mxu1 %vm708_vm3, %v5729_v7 }
 0x14d   : > { %v5067_v59 = vadd.f32 %v1547_v63, %v1155_v1  ;;  %v1176_v52 = vadd.f32 %v3687_v16, %v4871_v48  ;;  %v3722_v61 = vpop.f32.mrf.mxu0  ;;  %3893 = vmatprep.mubr.msk.bf16.mxu1 %vm708_vm3, %v4398_v5  ;;  %v2509_v5 = vrot.slane %v2508_v58, 4  ;;  %v2726_v50 = vsel %vm4403_vm7, %v2724_v4, %v2725_v25  ;;  %v5739_v63 = vld [vmem:[#allocation25_spill] sm:$0xff] }
 0x14e   : > { %v1167_v0 = vpop.f32.mrf.mxu1  ;;  %v2504_v40 = vsel %vm4080_vm4, %v2499_v37, %v2503_v15 }
 0x14f   : > { %v5073_v20 = vadd.f32 %v3721_v6, %v1176_v52  ;;  %v1168_v7 = vadd.f32 %v1167_v0, %v4877_v45  ;;  %v1563_v12 = vpop.f32.mrf.mxu0  ;;  %v2723_v45 = vsel %vm4403_vm7, %v3454_v19, %v2722_v57  ;;  %v2514_v60 = vsel %vm4080_vm4, %v2509_v5, %v2513_v28  ;;  %v5745_v19 = vld [vmem:[#allocation23_spill] sm:$0xff] }
 0x150   : > { %v3688_v41 = vpop.f32.mrf.mxu1  ;;  %v3437_v15 = vcombine.low %v2504_v40, %v2514_v60  ;;  %v5747_v5 = vld [vmem:[#allocation3_spill] sm:$0xff]  ;;  %v5749_v40 = vld [vmem:[#allocation6_spill] sm:$0xff] }
 0x151   : > { %v5076_v55 = vadd.f32 %v1560_v13, %v1168_v7  ;;  %v1179_v48 = vadd.f32 %v3688_v41, %v4887_v22  ;;  %v3725_v51 = vpop.f32.mrf.mxu0  ;;  %3928 = vmatmul.mubr.msk.bf16.gmra.mxu0 %vm708_vm3, %v4649_v2 }
 0x152   : > { %v1170_v21 = vpop.f32.mrf.mxu1  ;;  %3931 = vmatprep.mubr.msk.bf16.mxu0 %vm708_vm3, %v4728_v11  ;;  %v5741_v11 = vld [vmem:[#allocation20_spill] sm:$0xff] }
 0x153   : > { %v5087_v10 = vadd.f32 %v3722_v61, %v1179_v48  ;;  %v1171_v22 = vadd.f32 %v1170_v21, %v4893_v49  ;;  %v1576_v27 = vpop.f32.mrf.mxu0  ;;  %v3456_v49 = vcombine.low %v2723_v45, %v2726_v50 }
 0x154   : > { %v3691_v8 = vpop.f32.mrf.mxu1  ;;  %3894 = vmatmul.mubr.msk.bf16.gmra.mxu1 %vm708_vm3, %v5739_v63 }
 0x155   : > { %v5094_v44 = vadd.f32 %v1563_v12, %v1171_v22  ;;  %v1192_v53 = vadd.f32 %v3691_v8, %v5741_v11  ;;  %v3726_v18 = vpop.f32.mrf.mxu0  ;;  %3897 = vmatprep.mubr.msk.bf16.mxu1 %vm708_vm3, %v5742_v47  ;;  %v5746_v12 = vld [vmem:[#allocation8_spill] sm:$0xff] }
 0x156   : > { %v1183_v6 = vpop.f32.mrf.mxu1  ;;  %v5748_v22 = vld [vmem:[#allocation4_spill] sm:$0xff] }
 0x157   : > { %v5101_v57 = vadd.f32 %v3725_v51, %v1192_v53  ;;  %v1184_v33 = vadd.f32 %v1183_v6, %v5743_v29  ;;  %v1579_v1 = vpop.f32.mrf.mxu0 }
 0x158   : > { %v3692_v13 = vpop.f32.mrf.mxu1 }
 0x159   : > { %v5104_v16 = vadd.f32 %v1576_v27, %v1184_v33  ;;  %v1195_v52 = vadd.f32 %v3692_v13, %v5744_v17  ;;  %v3729_v61 = vpop.f32.mrf.mxu0  ;;  %3932 = vmatmul.mubr.msk.bf16.gmra.mxu0 %vm708_vm3, %v3456_v49 }
 0x15a   : > { %v1186_v58 = vpop.f32.mrf.mxu1 }
 0x15b   : > { %v5108_v31 = vadd.f32 %v3726_v18, %v1195_v52  ;;  %v1187_v0 = vadd.f32 %v1186_v58, %v5745_v19  ;;  %v1592_v4 = vpop.f32.mrf.mxu0 }
 0x15c   : > { %v3695_v25 = vpop.f32.mrf.mxu1  ;;  %3898 = vmatmul.mubr.msk.bf16.gmra.mxu1 %vm708_vm3, %v3437_v15 }
 0x15d   : > { %v5112_v7 = vadd.f32 %v1579_v1, %v1187_v0  ;;  %v1208_v41 = vadd.f32 %v3695_v25, %v5746_v12  ;;  %v3730_v37 = vpop.f32.mrf.mxu0 }
 0x15e   : > { %v1199_v48 = vpop.f32.mrf.mxu1 }
 0x15f   : > { %v5115_v51 = vadd.f32 %v3729_v61, %v1208_v41  ;;  %v1200_v28 = vadd.f32 %v1199_v48, %v5747_v5  ;;  %v1595_v21 = vpop.f32.mrf.mxu0 }
 0x160   : > { %v3696_v45 = vpop.f32.mrf.mxu1 }
 0x161   : > { %v5118_v50 = vadd.f32 %v1592_v4, %v1200_v28  ;;  %v1211_v27 = vadd.f32 %v3696_v45, %v5748_v22  ;;  %v3769_v8 = vpop.f32.mrf.mxu0 }
 0x162   : > { %v1202_v63 = vpop.f32.mrf.mxu1 }
 0x163   : > { %v5121_v2 = vadd.f32 %v3730_v37, %v1211_v27  ;;  %v1203_v11 = vadd.f32 %v1202_v63, %v5749_v40  ;;  %v1914_v53 = vpop.f32.mrf.mxu0 }
 0x164   : > { %v3735_v18 = vpop.f32.mrf.mxu1 }
 0x165   : > { %v5124_v47 = vadd.f32 %v1595_v21, %v1203_v11  ;;  %v1815_v60 = vadd.f32 %v3735_v18, %v4966_v54  ;;  %v3770_v49 = vpop.f32.mrf.mxu0 }
 0x166   : > { %v1686_v6 = vpop.f32.mrf.mxu1 }
 0x167   : > { %v5127_v29 = vadd.f32 %v3769_v8, %v1815_v60  ;;  %v1813_v33 = vadd.f32 %v1686_v6, %v4969_v32  ;;  %v1917_v1 = vpop.f32.mrf.mxu0 }
 0x168   : > { %v3736_v13 = vpop.f32.mrf.mxu1 }
 0x169   : > { %v5130_v15 = vadd.f32 %v1914_v53, %v1813_v33  ;;  %v1816_v17 = vadd.f32 %v3736_v13, %v4976_v46  ;;  %v3773_v52 = vpop.f32.mrf.mxu0 }
 0x16a   : > { %v1689_v61 = vpop.f32.mrf.mxu1 }
 0x16b   : > { %v5133_v58 = vadd.f32 %v3770_v49, %v1816_v17  ;;  %v1814_v19 = vadd.f32 %v1689_v61, %v4981_v38  ;;  %v1930_v0 = vpop.f32.mrf.mxu0 }
 0x16c   : > { %v3739_v54 = vpop.f32.mrf.mxu1 }
 0x16d   : > { %v5136_v4 = vadd.f32 %v1917_v1, %v1814_v19  ;;  %v1819_v25 = vadd.f32 %v3739_v54, %v4986_v3  ;;  %v3774_v12 = vpop.f32.mrf.mxu0 }
 0x16e   : > { %v1702_v32 = vpop.f32.mrf.mxu1 }
 0x16f   : > { %v5139_v41 = vadd.f32 %v3773_v52, %v1819_v25  ;;  %v1817_v37 = vadd.f32 %v1702_v32, %v4989_v9  ;;  %v1933_v48 = vpop.f32.mrf.mxu0 }
 0x170   : > { %v3740_v46 = vpop.f32.mrf.mxu1 }
 0x171   : > { %v5142_v5 = vadd.f32 %v1930_v0, %v1817_v37  ;;  %v1820_v28 = vadd.f32 %v3740_v46, %v4996_v36  ;;  %v3777_v21 = vpop.f32.mrf.mxu0 }
 0x172   : > { %v1705_v38 = vpop.f32.mrf.mxu1 }
 0x173   : > { %v5145_v45 = vadd.f32 %v3774_v12, %v1820_v28  ;;  %v1818_v22 = vadd.f32 %v1705_v38, %v5001_v14  ;;  %v1946_v27 = vpop.f32.mrf.mxu0 }
 0x174   : > { %v3743_v3 = vpop.f32.mrf.mxu1 }
 0x175   : > { %v5148_v8 = vadd.f32 %v1933_v48, %v1818_v22  ;;  %v1823_v63 = vadd.f32 %v3743_v3, %v5006_v42  ;;  %v3778_v40 = vpop.f32.mrf.mxu0 }
 0x176   : > { %v1718_v9 = vpop.f32.mrf.mxu1 }
 0x177   : > { %v5151_v11 = vadd.f32 %v3777_v21, %v1823_v63  ;;  %v1821_v53 = vadd.f32 %v1718_v9, %v5009_v24  ;;  %v1949_v18 = vpop.f32.mrf.mxu0 }
 0x178   : > { %v3744_v36 = vpop.f32.mrf.mxu1 }
 0x179   : > { %v5154_v60 = vadd.f32 %v1946_v27, %v1821_v53  ;;  %v1824_v49 = vadd.f32 %v3744_v36, %v5016_v26  ;;  %v3781_v6 = vpop.f32.mrf.mxu0 }
 0x17a   : > { %v1721_v14 = vpop.f32.mrf.mxu1 }
 0x17b   : > { %v5157_v33 = vadd.f32 %v3778_v40, %v1824_v49  ;;  %v1822_v1 = vadd.f32 %v1721_v14, %v5021_v30  ;;  %v1962_v13 = vpop.f32.mrf.mxu0 }
 0x17c   : > { %v3747_v42 = vpop.f32.mrf.mxu1 }
 0x17d   : > { %v5160_v17 = vadd.f32 %v1949_v18, %v1822_v1  ;;  %v1827_v52 = vadd.f32 %v3747_v42, %v5026_v62  ;;  %v3782_v61 = vpop.f32.mrf.mxu0 }
 0x17e   : > { %v1734_v24 = vpop.f32.mrf.mxu1 }
 0x17f   : > { %v5163_v19 = vadd.f32 %v3781_v6, %v1827_v52  ;;  %v1825_v0 = vadd.f32 %v1734_v24, %v5029_v34  ;;  %v1965_v54 = vpop.f32.mrf.mxu0 }
 0x180   : > { %v3748_v26 = vpop.f32.mrf.mxu1 }
 0x181   : > { %v5166_v25 = vadd.f32 %v1962_v13, %v1825_v0  ;;  %v1828_v12 = vadd.f32 %v3748_v26, %v5036_v35  ;;  %v3785_v32 = vpop.f32.mrf.mxu0 }
 0x182   : > { %v1737_v30 = vpop.f32.mrf.mxu1 }
 0x183   : > { %v5169_v37 = vadd.f32 %v3782_v61, %v1828_v12  ;;  %v1826_v48 = vadd.f32 %v1737_v30, %v5045_v39  ;;  %v1978_v46 = vpop.f32.mrf.mxu0 }
 0x184   : > { %v3751_v62 = vpop.f32.mrf.mxu1 }
 0x185   : > { %v5172_v28 = vadd.f32 %v1965_v54, %v1826_v48  ;;  %v1831_v21 = vadd.f32 %v3751_v62, %v5050_v23  ;;  %v3786_v38 = vpop.f32.mrf.mxu0 }
 0x186   : > { %v1750_v34 = vpop.f32.mrf.mxu1 }
 0x187   : > { %v5175_v22 = vadd.f32 %v3785_v32, %v1831_v21  ;;  %v1829_v27 = vadd.f32 %v1750_v34, %v5053_v56  ;;  %v1981_v3 = vpop.f32.mrf.mxu0 }
 0x188   : > { %v3752_v35 = vpop.f32.mrf.mxu1 }
 0x189   : > { %v5178_v63 = vadd.f32 %v1978_v46, %v1829_v27  ;;  %v1832_v40 = vadd.f32 %v3752_v35, %v5062_v43  ;;  %v3789_v9 = vpop.f32.mrf.mxu0 }
 0x18a   : > { %v1753_v39 = vpop.f32.mrf.mxu1 }
 0x18b   : > { %v5181_v53 = vadd.f32 %v3786_v38, %v1832_v40  ;;  %v1830_v18 = vadd.f32 %v1753_v39, %v5067_v59  ;;  %v1994_v36 = vpop.f32.mrf.mxu0 }
 0x18c   : > { %v3755_v23 = vpop.f32.mrf.mxu1 }
 0x18d   : > { %v5184_v49 = vadd.f32 %v1981_v3, %v1830_v18  ;;  %v1835_v6 = vadd.f32 %v3755_v23, %v5073_v20  ;;  %v3790_v14 = vpop.f32.mrf.mxu0 }
 0x18e   : > { %v1766_v56 = vpop.f32.mrf.mxu1 }
 0x18f   : > { %5750 = vst [vmem:[#allocation9_spill] sm:$0xff] %v5184_v49  ;;  %v5187_v1 = vadd.f32 %v3789_v9, %v1835_v6  ;;  %v1833_v13 = vadd.f32 %v1766_v56, %v5076_v55  ;;  %v1997_v42 = vpop.f32.mrf.mxu0 }
 0x190   : > { %v3756_v43 = vpop.f32.mrf.mxu1 }
 0x191   : > { %5751 = vst [vmem:[#allocation7_spill] sm:$0xff] %v5187_v1  ;;  %v5190_v52 = vadd.f32 %v1994_v36, %v1833_v13  ;;  %v1836_v61 = vadd.f32 %v3756_v43, %v5087_v10  ;;  %v3793_v24 = vpop.f32.mrf.mxu0 }
 0x192   : > { %v1769_v59 = vpop.f32.mrf.mxu1 }
 0x193   : > { %5752 = vst [vmem:[#allocation11_spill] sm:$0xff] %v5190_v52  ;;  %v5193_v0 = vadd.f32 %v3790_v14, %v1836_v61  ;;  %v1834_v54 = vadd.f32 %v1769_v59, %v5094_v44  ;;  %v2010_v26 = vpop.f32.mrf.mxu0 }
 0x194   : > { %v3759_v20 = vpop.f32.mrf.mxu1 }
 0x195   : > { %5753 = vst [vmem:[#allocation13_spill] sm:$0xff] %v5193_v0  ;;  %v5196_v12 = vadd.f32 %v1997_v42, %v1834_v54  ;;  %v1839_v32 = vadd.f32 %v3759_v20, %v5101_v57  ;;  %v3794_v30 = vpop.f32.mrf.mxu0 }
 0x196   : > { %v1782_v55 = vpop.f32.mrf.mxu1 }
 0x197   : > { %5754 = vst [vmem:[#allocation15_spill] sm:$0xff] %v5196_v12  ;;  %v5199_v48 = vadd.f32 %v3793_v24, %v1839_v32  ;;  %v1837_v46 = vadd.f32 %v1782_v55, %v5104_v16  ;;  %v2013_v62 = vpop.f32.mrf.mxu0 }
 0x198   : > { %v3760_v10 = vpop.f32.mrf.mxu1 }
 0x199   : > { %5755 = vst [vmem:[#allocation19_spill] sm:$0xff] %v5199_v48  ;;  %v5202_v21 = vadd.f32 %v2010_v26, %v1837_v46  ;;  %v1840_v38 = vadd.f32 %v3760_v10, %v5108_v31  ;;  %v3797_v34 = vpop.f32.mrf.mxu0 }
 0x19a   : > { %v1785_v44 = vpop.f32.mrf.mxu1 }
 0x19b   : > { %5756 = vst [vmem:[#allocation24_spill] sm:$0xff] %v5202_v21  ;;  %v5205_v27 = vadd.f32 %v3794_v30, %v1840_v38  ;;  %v1838_v3 = vadd.f32 %v1785_v44, %v5112_v7  ;;  %v2026_v35 = vpop.f32.mrf.mxu0 }
 0x19c   : > { %v3763_v57 = vpop.f32.mrf.mxu1 }
 0x19d   : > { %5757 = vst [vmem:[#allocation5_spill] sm:$0xff] %v5205_v27  ;;  %v5208_v40 = vadd.f32 %v2013_v62, %v1838_v3  ;;  %v1843_v9 = vadd.f32 %v3763_v57, %v5115_v51  ;;  %v3798_v39 = vpop.f32.mrf.mxu0 }
 0x19e   : > { %v1798_v16 = vpop.f32.mrf.mxu1 }
 0x19f   : > { %5758 = vst [vmem:[#allocation10_spill] sm:$0xff] %v5208_v40  ;;  %v5211_v18 = vadd.f32 %v3797_v34, %v1843_v9  ;;  %v1841_v36 = vadd.f32 %v1798_v16, %v5118_v50  ;;  %v2029_v23 = vpop.f32.mrf.mxu0 }
 0x1a0   : > { %v3764_v31 = vpop.f32.mrf.mxu1 }
 0x1a1   : > { %5759 = vst [vmem:[#allocation12_spill] sm:$0xff] %v5211_v18  ;;  %v5214_v6 = vadd.f32 %v2026_v35, %v1841_v36  ;;  %v1844_v14 = vadd.f32 %v3764_v31, %v5121_v2  ;;  %v5217_v56 = vpop.f32.mrf.mxu0 }
 0x1a2   : > { %v1801_v7 = vpop.f32.mrf.mxu1 }
 0x1a3   : > { %5760 = vst [vmem:[#allocation14_spill] sm:$0xff] %v5214_v6  ;;  %v5219_v13 = vadd.f32 %v3798_v39, %v1844_v14  ;;  %v1842_v42 = vadd.f32 %v1801_v7, %v5124_v47  ;;  %v5222_v51 = vpop.f32.mrf.mxu0 }
 0x1a4   : > { %v3803_v43 = vpop.f32.mrf.mxu1 }
 0x1a5   : > { %5761 = vst [vmem:[#allocation17_spill] sm:$0xff] %v5219_v13  ;;  %v5224_v61 = vadd.f32 %v2029_v23, %v1842_v42  ;;  %v5226_v24 = vpop.f32.mrf.mxu0 }
 0x1a6   : > { %v2126_v50 = vpop.f32.mrf.mxu1 }
 0x1a7   : > { %5762 = vst [vmem:[#allocation22_spill] sm:$0xff] %v5224_v61  ;;  %v5228_v59 = vpop.f32.mrf.mxu0 }
 0x1a8   : > { %v3804_v54 = vpop.f32.mrf.mxu1 }
 0x1a9   : > { %v5230_v26 = vpop.f32.mrf.mxu0 }
 0x1aa   : > { %v2129_v2 = vpop.f32.mrf.mxu1 }
 0x1ab   : > { %v5232_v20 = vpop.f32.mrf.mxu0 }
 0x1ac   : > { %v3807_v32 = vpop.f32.mrf.mxu1 }
 0x1ad   : > { %v5234_v30 = vpop.f32.mrf.mxu0 }
 0x1ae   : > { %v2142_v47 = vpop.f32.mrf.mxu1 }
 0x1af   : > { %v5236_v55 = vpop.f32.mrf.mxu0 }
 0x1b0   : > { %v5238_v46 = vpop.f32.mrf.mxu1 }
 0x1b1   : > { %v5240_v62 = vpop.f32.mrf.mxu0 }
 0x1b2   : > { %v5242_v10 = vpop.f32.mrf.mxu1 }
 0x1b3   : > { %v5244_v38 = vpop.f32.mrf.mxu0 }
 0x1b4   : > { %v5246_v34 = vpop.f32.mrf.mxu1 }
 0x1b5   : > { %v5248_v44 = vpop.f32.mrf.mxu0 }
 0x1b6   : > { %v5250_v3 = vpop.f32.mrf.mxu1 }
 0x1b7   : > { %v5252_v35 = vpop.f32.mrf.mxu0 }
 0x1b8   : > { %v5254_v57 = vpop.f32.mrf.mxu1 }
 0x1b9   : > { %v5256_v9 = vpop.f32.mrf.mxu0 }
 0x1ba   : > { %v5258_v39 = vpop.f32.mrf.mxu1 }
 0x1bb   : > { %v5260_v16 = vpop.f32.mrf.mxu0 }
 0x1bc   : > { %v5262_v36 = vpop.f32.mrf.mxu1 }
 0x1bd   : > { %v5264_v23 = vpop.f32.mrf.mxu0 }
 0x1be   : > { %v5266_v31 = vpop.f32.mrf.mxu1 }
 0x1bf   : > { %v5268_v14 = vpop.f32.mrf.mxu0 }
 0x1c0   : > { %5763 = vst [vmem:[#allocation25_spill] sm:$0xff] %v5268_v14  ;;  %v5270_v7 = vpop.f32.mrf.mxu1 }
 0x1c1   : > { %v5272_v42 = vpop.f32.mrf.mxu0 }
 0x1c2   : > { %5764 = vst [vmem:[#allocation2_spill] sm:$0xff] %v5272_v42  ;;  %v5274_v61 = vpop.f32.mrf.mxu1 }
 0x1c3   : > { %v5276_v13 = vpop.f32.mrf.mxu0 }
 0x1c4   : > { %5765 = vst [vmem:[#allocation20_spill] sm:$0xff] %v5276_v13  ;;  %v5278_v6 = vpop.f32.mrf.mxu1 }
 0x1c5   : > { %v5280_v18 = vpop.f32.mrf.mxu0 }
 0x1c6   : > { %5766 = vst [vmem:[#allocation16_spill] sm:$0xff] %v5280_v18  ;;  %v5282_v40 = vpop.f32.mrf.mxu1 }
 0x1c7   : > { %v5284_v27 = vpop.f32.mrf.mxu0 }
 0x1c8   : > { %5767 = vst [vmem:[#allocation18_spill] sm:$0xff] %v5284_v27  ;;  %v5286_v21 = vpop.f32.mrf.mxu1 }
 0x1c9   : > { %v5288_v48 = vpop.f32.mrf.mxu0 }
 0x1ca   : > { %5768 = vst [vmem:[#allocation21_spill] sm:$0xff] %v5288_v48  ;;  %v5290_v12 = vpop.f32.mrf.mxu1 }
 0x1cb   : > { %5769 = vst [vmem:[#allocation23_spill] sm:$0xff] %v5290_v12  ;;  %v5292_v0 = vpop.f32.mrf.mxu0 }
 0x1cc   : > { %5770 = vst [vmem:[#allocation8_spill] sm:$0xff] %v5292_v0  ;;  %v5294_v52 = vpop.f32.mrf.mxu1 }
 0x1cd   : > { %5771 = vst [vmem:[#allocation3_spill] sm:$0xff] %v5294_v52  ;;  %v5296_v1 = vpop.f32.mrf.mxu0 }
 0x1ce   : > { %5772 = vst [vmem:[#allocation4_spill] sm:$0xff] %v5296_v1  ;;  %v5298_v49 = vpop.f32.mrf.mxu1 }
 0x1cf   : > { %5773 = vst [vmem:[#allocation6_spill] sm:$0xff] %v5298_v49  ;;  %v5300_v13 = vpop.f32.mrf.mxu0 }
 0x1d0   : > { %5774 = vst [vmem:[#allocation26_spill] sm:$0xff] %v5300_v13  ;;  %v5302_v18 = vpop.f32.mrf.mxu1 }
 0x1d1   : > { %5775 = vst [vmem:[#allocation27_spill] sm:$0xff] %v5302_v18  ;;  %v5304_v42 = vpop.f32.mrf.mxu0 }
 0x1d2   : > { %5776 = vst [vmem:[#allocation28_spill] sm:$0xff] %v5304_v42  ;;  %v5306_v27 = vpop.f32.mrf.mxu1 }
 0x1d3   : > { %5777 = vst [vmem:[#allocation29_spill] sm:$0xff] %v5306_v27  ;;  %v5308_v14 = vpop.f32.mrf.mxu0 }
 0x1d4   : > { %5778 = vst [vmem:[#allocation30_spill] sm:$0xff] %v5308_v14  ;;  %v5310_v48 = vpop.f32.mrf.mxu1 }
 0x1d5   : > { %5779 = vst [vmem:[#allocation31_spill] sm:$0xff] %v5310_v48  ;;  %v5312_v12 = vpop.f32.mrf.mxu0 }
 0x1d6   : > { %5780 = vst [vmem:[#allocation32_spill] sm:$0xff] %v5312_v12  ;;  %v5314_v0 = vpop.f32.mrf.mxu1  ;;  %v2255_v12 = vadd.f32 %v3803_v43, %v5127_v29  ;;  %v2257_v29 = vadd.f32 %v2142_v47, %v5142_v5  ;;  %v2263_v5 = vadd.f32 %v5246_v34, %v5151_v11  ;;  %v2262_v11 = vadd.f32 %v5258_v39, %v5160_v17  ;;  %v5794_v39 = vld [vmem:[#allocation9_spill] sm:$0xff] }
 0x1d7   : > { %5781 = vst [vmem:[#allocation33_spill] sm:$0xff] %v5314_v0  ;;  %v5316_v52 = vpop.f32.mrf.mxu0 }
 0x1d8   : > { %5782 = vst [vmem:[#allocation34_spill] sm:$0xff] %v5316_v52  ;;  %v5318_v1 = vpop.f32.mrf.mxu1  ;;  %v5394_v47 = vadd.f32 %v5252_v35, %v2262_v11 }
 0x1d9   : > { %5783 = vst [vmem:[#allocation35_spill] sm:$0xff] %v5318_v1  ;;  %v5320_v49 = vpop.f32.mrf.mxu0  ;;  %v2253_v1 = vadd.f32 %v2126_v50, %v5130_v15 }
 0x1da   : > { %5784 = vst [vmem:[#allocation36_spill] sm:$0xff] %v5320_v49  ;;  %v5322_v13 = vpop.f32.mrf.mxu1  ;;  %v2256_v49 = vadd.f32 %v3804_v54, %v5133_v58 }
 0x1db   : > { %5785 = vst [vmem:[#allocation37_spill] sm:$0xff] %v5322_v13  ;;  %v5324_v42 = vpop.f32.mrf.mxu0  ;;  %v2254_v13 = vadd.f32 %v2129_v2, %v5136_v4 }
 0x1dc   : > { %5786 = vst [vmem:[#allocation38_spill] sm:$0xff] %v5324_v42  ;;  %v5326_v27 = vpop.f32.mrf.mxu1  ;;  %v2259_v42 = vadd.f32 %v3807_v32, %v5139_v41  ;;  %v2462_v15 = vadd.f32 %v5226_v24, %v2256_v49  ;;  %v2260_v41 = vadd.f32 %v5238_v46, %v5145_v45  ;;  %v2267_v24 = vadd.f32 %v5262_v36, %v5163_v19 }
 0x1dd   : > { %5787 = vst [vmem:[#allocation39_spill] sm:$0xff] %v5326_v27  ;;  %v5328_v14 = vpop.f32.mrf.mxu0  ;;  %v2460_v58 = vadd.f32 %v5228_v59, %v2254_v13  ;;  %v2265_v59 = vadd.f32 %v5266_v31, %v5166_v25  ;;  %v2271_v25 = vadd.f32 %v5278_v6, %v5175_v22  ;;  %v2469_v32 = vadd.f32 %v5240_v62, %v2263_v5  ;;  %v5791_v62 = vld [vmem:[#allocation25_spill] sm:$0xff] }
 0x1de   : > { %5788 = vst [vmem:[#allocation40_spill] sm:$0xff] %v5328_v14  ;;  %v5330_v48 = vpop.f32.mrf.mxu1  ;;  %v2461_v14 = vadd.f32 %v5217_v56, %v2255_v12  ;;  %v2465_v54 = vadd.f32 %v5230_v26, %v2259_v42  ;;  %v2258_v12 = vadd.f32 %v5242_v10, %v5148_v8  ;;  %v2264_v56 = vadd.f32 %v5254_v57, %v5157_v33  ;;  %v5796_v42 = vld [vmem:[#allocation16_spill] sm:$0xff] }
 0x1df   : > { %5789 = vst [vmem:[#allocation41_spill] sm:$0xff] %v5330_v48  ;;  %v5333_v0 = vpop.f32.mrf.mxu0  ;;  %v2463_v8 = vadd.f32 %v5232_v20, %v2257_v29  ;;  %v2266_v33 = vadd.f32 %v5274_v61, %v5172_v28  ;;  %v2466_v17 = vadd.f32 %v5234_v30, %v2260_v41  ;;  %v2269_v20 = vadd.f32 %v5282_v40, %v5178_v63 }
 0x1e0   : > { %5790 = vst [vmem:[#allocation42_spill] sm:$0xff] %v5333_v0  ;;  %v5335_v52 = vpop.f32.mrf.mxu1  ;;  %v2459_v0 = vadd.f32 %v5222_v51, %v2253_v1  ;;  %v2261_v1 = vadd.f32 %v5250_v3, %v5154_v60  ;;  %v2268_v60 = vadd.f32 %v5270_v7, %v5169_v37  ;;  %v2464_v19 = vadd.f32 %v5236_v55, %v2258_v12 }
 0x1e1   : > { %v3905_v18 = vpop.f32.mrf.mxu0  ;;  %v5397_v22 = vadd.f32 %v5256_v9, %v2267_v24  ;;  %v2272_v63 = vadd.f32 %v5286_v21, %v5181_v53  ;;  %v5402_v55 = vadd.f32 %v5260_v16, %v2265_v59  ;;  %v5408_v10 = vadd.f32 %v5791_v62, %v2266_v33  ;;  %v5793_v53 = vld [vmem:[#allocation20_spill] sm:$0xff]  ;;  %v5795_v16 = vld [vmem:[#allocation23_spill] sm:$0xff]  ;;  %v5799_v24 = vld [vmem:[#allocation18_spill] sm:$0xff] }
 0x1e2   : > { %v5341_v27 = vpop.f32.mrf.mxu1  ;;  %v5386_v28 = vadd.f32 %v5244_v38, %v2261_v1  ;;  %v5405_v46 = vadd.f32 %v5264_v23, %v2268_v60  ;;  %v5416_v21 = vadd.f32 %v5793_v53, %v2269_v20  ;;  %v2270_v36 = vadd.f32 %v5795_v16, %v5794_v39 }
 0x1e3   : > { %v2772_v48 = vpop.f32.mrf.mxu0  ;;  %v5421_v29 = vadd.f32 %v5796_v42, %v2272_v63 }
 0x1e4   : > { %v3871_v43 = vpop.f32.mrf.mxu1  ;;  %v5435_v59 = vadd.f32 %v5799_v24, %v2270_v36 }
 0x1e5   : > { %v2689_v50 = vadd.f32 %v3871_v43, %v2461_v14  ;;  %v3906_v4 = vpop.f32.mrf.mxu0 }
 0x1e6   : > { %v2560_v49 = vpop.f32.mrf.mxu1 }
 0x1e7   : > { %v2901_v45 = vadd.f32 %v3905_v18, %v2689_v50  ;;  %v2687_v13 = vadd.f32 %v2560_v49, %v2459_v0  ;;  %v2775_v51 = vpop.f32.mrf.mxu0 }
 0x1e8   : > { %v3872_v26 = vpop.f32.mrf.mxu1 }
 0x1e9   : > { %2933 = vst.msk [vmem:[%s5359_s18 + $0x10] sm:$0xff] %vm708_vm3, %v2901_v45  ;;  %v2899_v0 = vadd.f32 %v2772_v48, %v2687_v13  ;;  %v2690_v18 = vadd.f32 %v3872_v26, %v2462_v15  ;;  %v3909_v2 = vpop.f32.mrf.mxu0  ;;  %v5389_v48 = vadd.f32 %v5248_v44, %v2264_v56  ;;  %v5792_v44 = vld [vmem:[#allocation2_spill] sm:$0xff]  ;;  %v3036_v23 = vmul.f32 %v2901_v45, %v2901_v45 }
 0x1ea   : > { %v2563_v37 = vpop.f32.mrf.mxu1  ;;  %v5413_v3 = vadd.f32 %v5792_v44, %v2271_v25  ;;  %v2966_v12 = vsel %vm708_vm3, %v2901_v45, 0.0 }
 0x1eb   : > { %2931 = vst.msk [vmem:[%s5359_s18] sm:$0xff] %vm708_vm3, %v2899_v0  ;;  %v2902_v61 = vadd.f32 %v3906_v4, %v2690_v18  ;;  %v2788_v30 = vpop.f32.mrf.mxu0  ;;  %v2688_v40 = vadd.f32 %v2563_v37, %v2460_v58  ;;  %v3034_v35 = vmul.f32 %v2899_v0, %v2899_v0  ;;  %v2963_v43 = vsel %vm708_vm3, %v2899_v0, 0.0  ;;  %v5797_v4 = vld [vmem:[#allocation7_spill] sm:$0xff] }
 0x1ec   : > { %v3875_v6 = vpop.f32.mrf.mxu1  ;;  %v3069_v26 = vsel %vm708_vm3, %v3036_v23, 0.0  ;;  %v5800_v37 = vld [vmem:[#allocation11_spill] sm:$0xff] }
 0x1ed   : > { %2934 = vst.msk [vmem:[%s5359_s18 + $0x18] sm:$0xff] %vm708_vm3, %v2902_v61  ;;  %v2693_v38 = vadd.f32 %v3875_v6, %v2465_v54  ;;  %v3910_v34 = vpop.f32.mrf.mxu0  ;;  %v2900_v57 = vadd.f32 %v2775_v51, %v2688_v40  ;;  %v5798_v54 = vld [vmem:[#allocation3_spill] sm:$0xff]  ;;  %v3066_v56 = vsel %vm708_vm3, %v3034_v35, 0.0  ;;  %v3037_v13 = vmul.f32 %v2902_v61, %v2902_v61 }
 0x1ee   : > { %v2576_v9 = vpop.f32.mrf.mxu1  ;;  %v2275_v41 = vadd.f32 %v5798_v54, %v5797_v4  ;;  %v2968_v0 = vsel %vm708_vm3, %v2902_v61, 0.0 }
 0x1ef   : > { %v2905_v31 = vadd.f32 %v3909_v2, %v2693_v38  ;;  %v2691_v14 = vadd.f32 %v2576_v9, %v2463_v8  ;;  %v2791_v7 = vpop.f32.mrf.mxu0  ;;  %2932 = vst.msk [vmem:[%s5359_s18 + $0x8] sm:$0xff] %vm708_vm3, %v2900_v57  ;;  %v2964_v15 = vsel %vm708_vm3, %v2900_v57, 0.0  ;;  %v3035_v58 = vmul.f32 %v2900_v57, %v2900_v57  ;;  %v5802_v38 = vld [vmem:[#allocation21_spill] sm:$0xff] }
 0x1f0   : > { %v3876_v50 = vpop.f32.mrf.mxu1  ;;  %v2965_v5 = vadd.f32 %v2964_v15, %v2963_v43  ;;  %v5444_v44 = vadd.f32 %v5802_v38, %v2275_v41  ;;  %v3071_v53 = vsel %vm708_vm3, %v3037_v13, 0.0  ;;  %v5803_v43 = vld [vmem:[#allocation8_spill] sm:$0xff] }
 0x1f1   : > { %2937 = vst.msk [vmem:[%s5359_s18 + $0x30] sm:$0xff] %vm708_vm3, %v2905_v31  ;;  %v2903_v49 = vadd.f32 %v2788_v30, %v2691_v14  ;;  %v3913_v1 = vpop.f32.mrf.mxu0  ;;  %v3067_v51 = vsel %vm708_vm3, %v3035_v58, 0.0  ;;  %v2694_v8 = vadd.f32 %v3876_v50, %v2466_v17  ;;  %v5801_v17 = vld [vmem:[#allocation6_spill] sm:$0xff] }
 0x1f2   : > { %v2579_v11 = vpop.f32.mrf.mxu1  ;;  %v2967_v60 = vadd.f32 %v2966_v12, %v2965_v5  ;;  %v3068_v33 = vadd.f32 %v3067_v51, %v3066_v56  ;;  %v2273_v30 = vadd.f32 %v5801_v17, %v5800_v37  ;;  %v5808_v17 = vld [vmem:[#allocation19_spill] sm:$0xff] }
 0x1f3   : > { %2935 = vst.msk [vmem:[%s5359_s18 + $0x20] sm:$0xff] %vm708_vm3, %v2903_v49  ;;  %v2804_v45 = vpop.f32.mrf.mxu0  ;;  %v3038_v18 = vmul.f32 %v2903_v49, %v2903_v49  ;;  %v2906_v2 = vadd.f32 %v3910_v34, %v2694_v8  ;;  %v2692_v25 = vadd.f32 %v2579_v11, %v2464_v19  ;;  %v2970_v35 = vsel %vm708_vm3, %v2903_v49, 0.0  ;;  %v5804_v49 = vld [vmem:[#allocation13_spill] sm:$0xff] }
 0x1f4   : > { %v3879_v20 = vpop.f32.mrf.mxu1  ;;  %v3070_v63 = vadd.f32 %v3069_v26, %v3068_v33  ;;  %v2969_v40 = vadd.f32 %v2968_v0, %v2967_v60  ;;  %v5456_v15 = vadd.f32 %v5803_v43, %v2273_v30  ;;  %v5809_v30 = vld [vmem:[#allocation31_spill] sm:$0xff] }
 0x1f5   : > { %v2697_v6 = vadd.f32 %v3879_v20, %v2469_v32  ;;  %v3914_v62 = vpop.f32.mrf.mxu0  ;;  %2938 = vst.msk [vmem:[%s5359_s18 + $0x38] sm:$0xff] %vm708_vm3, %v2906_v2  ;;  %v2904_v61 = vadd.f32 %v2791_v7, %v2692_v25  ;;  %v3040_v32 = vmul.f32 %v2905_v31, %v2905_v31  ;;  %v3073_v36 = vsel %vm708_vm3, %v3038_v18, 0.0  ;;  %v5806_v20 = vld [vmem:[#allocation15_spill] sm:$0xff] }
 0x1f6   : > { %v2592_v19 = vpop.f32.mrf.mxu1  ;;  %v2971_v34 = vadd.f32 %v2970_v35, %v2969_v40  ;;  %v3072_v57 = vadd.f32 %v3071_v53, %v3070_v63  ;;  %v2974_v7 = vsel %vm708_vm3, %v2905_v31, 0.0  ;;  %v3041_v4 = vmul.f32 %v2906_v2, %v2906_v2 }
 0x1f7   : > { %v2909_v9 = vadd.f32 %v3913_v1, %v2697_v6  ;;  %v2695_v39 = vadd.f32 %v2592_v19, %v5386_v28  ;;  %v2807_v16 = vpop.f32.mrf.mxu0  ;;  %2936 = vst.msk [vmem:[%s5359_s18 + $0x28] sm:$0xff] %vm708_vm3, %v2904_v61  ;;  %v2972_v23 = vsel %vm708_vm3, %v2904_v61, 0.0  ;;  %v3039_v14 = vmul.f32 %v2904_v61, %v2904_v61  ;;  %v5805_v1 = vld [vmem:[#allocation27_spill] sm:$0xff] }
 0x1f8   : > { %v3880_v42 = vpop.f32.mrf.mxu1  ;;  %v3074_v58 = vadd.f32 %v3073_v36, %v3072_v57  ;;  %v2973_v50 = vadd.f32 %v2972_v23, %v2971_v34  ;;  %v2276_v56 = vadd.f32 %v5805_v1, %v5804_v49  ;;  %v3077_v11 = vsel %vm708_vm3, %v3040_v32, 0.0 }
 0x1f9   : > { %2941 = vst.msk [vmem:[%s5359_s18 + $0x50] sm:$0xff] %vm708_vm3, %v2909_v9  ;;  %v3917_v28 = vpop.f32.mrf.mxu0  ;;  %v3075_v54 = vsel %vm708_vm3, %v3039_v14, 0.0  ;;  %v2907_v41 = vadd.f32 %v2804_v45, %v2695_v39  ;;  %v2698_v12 = vadd.f32 %v3880_v42, %v5389_v48  ;;  %v2976_v24 = vsel %vm708_vm3, %v2906_v2, 0.0  ;;  %v5810_v42 = vld [vmem:[#allocation4_spill] sm:$0xff] }
 0x1fa   : > { %v2595_v5 = vpop.f32.mrf.mxu1  ;;  %v2975_v13 = vadd.f32 %v2974_v7, %v2973_v50  ;;  %v3076_v51 = vadd.f32 %v3075_v54, %v3074_v58  ;;  %v2279_v63 = vadd.f32 %v5809_v30, %v5808_v17  ;;  %v3079_v2 = vsel %vm708_vm3, %v3041_v4, 0.0 }
 0x1fb   : > { %v2696_v31 = vadd.f32 %v2595_v5, %v5394_v47  ;;  %v2820_v8 = vpop.f32.mrf.mxu0  ;;  %2939 = vst.msk [vmem:[%s5359_s18 + $0x40] sm:$0xff] %vm708_vm3, %v2907_v41  ;;  %v3042_v26 = vmul.f32 %v2907_v41, %v2907_v41  ;;  %v2910_v60 = vadd.f32 %v3914_v62, %v2698_v12  ;;  %v5807_v47 = vld [vmem:[#allocation29_spill] sm:$0xff]  ;;  %v2978_v40 = vsel %vm708_vm3, %v2907_v41, 0.0 }
 0x1fc   : > { %v3883_v48 = vpop.f32.mrf.mxu1  ;;  %v3078_v33 = vadd.f32 %v3077_v11, %v3076_v51  ;;  %v2977_v45 = vadd.f32 %v2976_v24, %v2975_v13  ;;  %v2274_v37 = vadd.f32 %v5807_v47, %v5806_v20  ;;  %v3044_v61 = vmul.f32 %v2909_v9, %v2909_v9  ;;  %v5812_v13 = vld [vmem:[#allocation28_spill] sm:$0xff] }
 0x1fd   : > { %v2908_v0 = vadd.f32 %v2807_v16, %v2696_v31  ;;  %v2701_v18 = vadd.f32 %v3883_v48, %v5397_v22  ;;  %v3918_v25 = vpop.f32.mrf.mxu0  ;;  %2942 = vst.msk [vmem:[%s5359_s18 + $0x58] sm:$0xff] %vm708_vm3, %v2910_v60  ;;  %v3081_v19 = vsel %vm708_vm3, %v3042_v26, 0.0  ;;  %v5487_v43 = vadd.f32 %v5810_v42, %v2276_v56  ;;  %v5813_v31 = vld [vmem:[#allocation24_spill] sm:$0xff] }
 0x1fe   : > { %v2608_v6 = vpop.f32.mrf.mxu1  ;;  %v2979_v62 = vadd.f32 %v2978_v40, %v2977_v45  ;;  %v3080_v38 = vadd.f32 %v3079_v2, %v3078_v33  ;;  %v2982_v7 = vsel %vm708_vm3, %v2909_v9, 0.0  ;;  %v3045_v58 = vmul.f32 %v2910_v60, %v2910_v60 }
 0x1ff   : > { %2940 = vst.msk [vmem:[%s5359_s18 + $0x48] sm:$0xff] %vm708_vm3, %v2908_v0  ;;  %v2980_v22 = vsel %vm708_vm3, %v2908_v0, 0.0  ;;  %v3043_v53 = vmul.f32 %v2908_v0, %v2908_v0  ;;  %v2823_v35 = vpop.f32.mrf.mxu0  ;;  %v2913_v34 = vadd.f32 %v3917_v28, %v2701_v18  ;;  %v2699_v57 = vadd.f32 %v2608_v6, %v5402_v55 }
 0x200   : > { %v3884_v39 = vpop.f32.mrf.mxu1  ;;  %v3082_v16 = vadd.f32 %v3081_v19, %v3080_v38  ;;  %v2981_v32 = vadd.f32 %v2980_v22, %v2979_v62  ;;  %v3085_v49 = vsel %vm708_vm3, %v3044_v61, 0.0  ;;  %v2984_v1 = vsel %vm708_vm3, %v2910_v60, 0.0 }
 0x201   : > { %v3083_v36 = vsel %vm708_vm3, %v3043_v53, 0.0  ;;  %v2702_v23 = vadd.f32 %v3884_v39, %v5405_v46  ;;  %v3921_v14 = vpop.f32.mrf.mxu0  ;;  %2945 = vst.msk [vmem:[%s5359_s18 + $0x70] sm:$0xff] %vm708_vm3, %v2913_v34  ;;  %v2911_v50 = vadd.f32 %v2820_v8, %v2699_v57  ;;  %v5811_v46 = vld [vmem:[#allocation26_spill] sm:$0xff]  ;;  %v5501_v51 = vadd.f32 %v5812_v13, %v2279_v63  ;;  %v5814_v8 = vld [vmem:[#allocation33_spill] sm:$0xff] }
 0x202   : > { %v2611_v28 = vpop.f32.mrf.mxu1  ;;  %v2983_v55 = vadd.f32 %v2982_v7, %v2981_v32  ;;  %v3084_v4 = vadd.f32 %v3083_v36, %v3082_v16  ;;  %v5494_v5 = vadd.f32 %v5811_v46, %v2274_v37  ;;  %v2277_v11 = vadd.f32 %v5814_v8, %v5813_v31  ;;  %v5815_v53 = vld [vmem:[#allocation5_spill] sm:$0xff]  ;;  %v5817_v16 = vld [vmem:[#allocation30_spill] sm:$0xff] }
 0x203   : > { %v2914_v54 = vadd.f32 %v3918_v25, %v2702_v23  ;;  %v2700_v41 = vadd.f32 %v2611_v28, %v5408_v10  ;;  %v2836_v12 = vpop.f32.mrf.mxu0  ;;  %2943 = vst.msk [vmem:[%s5359_s18 + $0x60] sm:$0xff] %vm708_vm3, %v2911_v50  ;;  %v3046_v9 = vmul.f32 %v2911_v50, %v2911_v50  ;;  %v3087_v48 = vsel %vm708_vm3, %v3045_v58, 0.0  ;;  %v5818_v28 = vld [vmem:[#allocation10_spill] sm:$0xff] }
 0x204   : > { %v3887_v56 = vpop.f32.mrf.mxu1  ;;  %v3086_v10 = vadd.f32 %v3085_v49, %v3084_v4  ;;  %v2985_v24 = vadd.f32 %v2984_v1, %v2983_v55  ;;  %v2986_v60 = vsel %vm708_vm3, %v2911_v50, 0.0  ;;  %v3048_v18 = vmul.f32 %v2913_v34, %v2913_v34  ;;  %v5819_v55 = vld [vmem:[#allocation37_spill] sm:$0xff]  ;;  %v5820_v1 = vld [vmem:[#allocation32_spill] sm:$0xff] }
 0x205   : > { %2946 = vst.msk [vmem:[%s5359_s18 + $0x78] sm:$0xff] %vm708_vm3, %v2914_v54  ;;  %v3922_v26 = vpop.f32.mrf.mxu0  ;;  %v2912_v33 = vadd.f32 %v2823_v35, %v2700_v41  ;;  %v2705_v45 = vadd.f32 %v3887_v56, %v5413_v3  ;;  %v3089_v17 = vsel %vm708_vm3, %v3046_v9, 0.0  ;;  %v2990_v61 = vsel %vm708_vm3, %v2913_v34, 0.0 }
 0x206   : > { %v2624_v0 = vpop.f32.mrf.mxu1  ;;  %v2987_v25 = vadd.f32 %v2986_v60, %v2985_v24  ;;  %v3088_v20 = vadd.f32 %v3087_v48, %v3086_v10  ;;  %v3049_v19 = vmul.f32 %v2914_v54, %v2914_v54  ;;  %v5523_v32 = vadd.f32 %v5817_v16, %v2277_v11 }
 0x207   : > { %v2703_v47 = vadd.f32 %v2624_v0, %v5416_v21  ;;  %v2839_v37 = vpop.f32.mrf.mxu0  ;;  %2944 = vst.msk [vmem:[%s5359_s18 + $0x68] sm:$0xff] %vm708_vm3, %v2912_v33  ;;  %v2988_v30 = vsel %vm708_vm3, %v2912_v33, 0.0  ;;  %v3047_v63 = vmul.f32 %v2912_v33, %v2912_v33  ;;  %v2917_v2 = vadd.f32 %v3921_v14, %v2705_v45  ;;  %v5816_v21 = vld [vmem:[#allocation35_spill] sm:$0xff]  ;;  %v5821_v45 = vld [vmem:[#allocation34_spill] sm:$0xff] }
 0x208   : > { %v3888_v40 = vpop.f32.mrf.mxu1  ;;  %v3090_v6 = vadd.f32 %v3089_v17, %v3088_v20  ;;  %v2989_v3 = vadd.f32 %v2988_v30, %v2987_v25  ;;  %v2280_v35 = vadd.f32 %v5816_v21, %v5815_v53  ;;  %v3093_v36 = vsel %vm708_vm3, %v3048_v18, 0.0 }
 0x209   : > { %v2915_v62 = vadd.f32 %v2836_v12, %v2703_v47  ;;  %v2706_v38 = vadd.f32 %v3888_v40, %v5421_v29  ;;  %v3925_v22 = vpop.f32.mrf.mxu0  ;;  %v3091_v57 = vsel %vm708_vm3, %v3047_v63, 0.0  ;;  %2949 = vst.msk [vmem:[%s5359_s18 + $0x90] sm:$0xff] %vm708_vm3, %v2917_v2  ;;  %v2992_v42 = vsel %vm708_vm3, %v2914_v54, 0.0  ;;  %v5822_v40 = vld [vmem:[#allocation12_spill] sm:$0xff] }
 0x20a   : > { %v2627_v39 = vpop.f32.mrf.mxu1  ;;  %v2991_v23 = vadd.f32 %v2990_v61, %v2989_v3  ;;  %v3092_v14 = vadd.f32 %v3091_v57, %v3090_v6  ;;  %v2278_v4 = vadd.f32 %v5819_v55, %v5818_v28  ;;  %v5534_v9 = vadd.f32 %v5820_v1, %v2280_v35  ;;  %v5823_v6 = vld [vmem:[#allocation39_spill] sm:$0xff] }
 0x20b   : > { %2947 = vst.msk [vmem:[%s5359_s18 + $0x80] sm:$0xff] %vm708_vm3, %v2915_v62  ;;  %v2852_v29 = vpop.f32.mrf.mxu0  ;;  %v3050_v34 = vmul.f32 %v2915_v62, %v2915_v62  ;;  %v2918_v7 = vadd.f32 %v3922_v26, %v2706_v38  ;;  %v2704_v58 = vadd.f32 %v2627_v39, %v5435_v59  ;;  %v3095_v56 = vsel %vm708_vm3, %v3049_v19, 0.0 }
 0x20c   : > { %v3891_v50 = vpop.f32.mrf.mxu1  ;;  %v3094_v41 = vadd.f32 %v3093_v36, %v3092_v14  ;;  %v2993_v12 = vadd.f32 %v2992_v42, %v2991_v23  ;;  %v2994_v54 = vsel %vm708_vm3, %v2915_v62, 0.0  ;;  %v2484_v0 = vadd.f32 %v5821_v45, %v2278_v4  ;;  %v5824_v23 = vld [vmem:[#allocation14_spill] sm:$0xff] }
 0x20d   : > { %v2709_v46 = vadd.f32 %v3891_v50, %v5444_v44  ;;  %v3926_v49 = vpop.f32.mrf.mxu0  ;;  %2950 = vst.msk [vmem:[%s5359_s18 + $0x98] sm:$0xff] %vm708_vm3, %v2918_v7  ;;  %v2916_v59 = vadd.f32 %v2839_v37, %v2704_v58  ;;  %v3052_v44 = vmul.f32 %v2917_v2, %v2917_v2  ;;  %v3097_v26 = vsel %vm708_vm3, %v3050_v34, 0.0  ;;  %v5828_v45 = vld [vmem:[#allocation38_spill] sm:$0xff] }
 0x20e   : > { %v2640_v13 = vpop.f32.mrf.mxu1  ;;  %v2995_v31 = vadd.f32 %v2994_v54, %v2993_v12  ;;  %v3096_v8 = vadd.f32 %v3095_v56, %v3094_v41  ;;  %v2998_v18 = vsel %vm708_vm3, %v2917_v2, 0.0  ;;  %v3053_v47 = vmul.f32 %v2918_v7, %v2918_v7 }
 0x20f   : > { %v2921_v11 = vadd.f32 %v3925_v22, %v2709_v46  ;;  %v2707_v10 = vadd.f32 %v2640_v13, %v5456_v15  ;;  %v2855_v24 = vpop.f32.mrf.mxu0  ;;  %2948 = vst.msk [vmem:[%s5359_s18 + $0x88] sm:$0xff] %vm708_vm3, %v2916_v59  ;;  %v2996_v48 = vsel %vm708_vm3, %v2916_v59, 0.0  ;;  %v3051_v60 = vmul.f32 %v2916_v59, %v2916_v59 }
 0x210   : > { %v3892_v33 = vpop.f32.mrf.mxu1  ;;  %v3098_v25 = vadd.f32 %v3097_v26, %v3096_v8  ;;  %v2997_v20 = vadd.f32 %v2996_v48, %v2995_v31  ;;  %v2283_v3 = vadd.f32 %v5823_v6, %v5822_v40  ;;  %v3101_v53 = vsel %vm708_vm3, %v3052_v44, 0.0  ;;  %v5827_v31 = vld [vmem:[#allocation36_spill] sm:$0xff] }
 0x211   : > { %2953 = vst.msk [vmem:[%s5359_s18 + $0xb0] sm:$0xff] %vm708_vm3, %v2921_v11  ;;  %v3929_v15 = vpop.f32.mrf.mxu0  ;;  %v3099_v37 = vsel %vm708_vm3, %v3051_v60, 0.0  ;;  %v2919_v17 = vadd.f32 %v2852_v29, %v2707_v10  ;;  %v2710_v30 = vadd.f32 %v3892_v33, %v5487_v43  ;;  %v3000_v21 = vsel %vm708_vm3, %v2918_v7, 0.0  ;;  %v5826_v29 = vld [vmem:[#allocation17_spill] sm:$0xff] }
 0x212   : > { %v2643_v63 = vpop.f32.mrf.mxu1  ;;  %v2999_v62 = vadd.f32 %v2998_v18, %v2997_v20  ;;  %v3100_v38 = vadd.f32 %v3099_v37, %v3098_v25  ;;  %v2284_v42 = vadd.f32 %v5335_v52, %v5826_v29  ;;  %v3103_v34 = vsel %vm708_vm3, %v3053_v47, 0.0  ;;  %v5830_v37 = vld [vmem:[#allocation22_spill] sm:$0xff] }
 0x213   : > { %v2708_v2 = vadd.f32 %v2643_v63, %v5494_v5  ;;  %v2868_v22 = vpop.f32.mrf.mxu0  ;;  %2951 = vst.msk [vmem:[%s5359_s18 + $0xa0] sm:$0xff] %vm708_vm3, %v2919_v17  ;;  %v3054_v35 = vmul.f32 %v2919_v17, %v2919_v17  ;;  %v2922_v61 = vadd.f32 %v3926_v49, %v2710_v30  ;;  %v5825_v5 = vld [vmem:[#allocation41_spill] sm:$0xff]  ;;  %v3002_v7 = vsel %vm708_vm3, %v2919_v17, 0.0 }
 0x214   : > { %v3895_v43 = vpop.f32.mrf.mxu1  ;;  %v3102_v19 = vadd.f32 %v3101_v53, %v3100_v38  ;;  %v3001_v57 = vadd.f32 %v3000_v21, %v2999_v62  ;;  %v2281_v14 = vadd.f32 %v5825_v5, %v5824_v23  ;;  %v3056_v41 = vmul.f32 %v2921_v11, %v2921_v11  ;;  %v5831_v5 = vld [vmem:[#allocation42_spill] sm:$0xff] }
 0x215   : > { %v2920_v39 = vadd.f32 %v2855_v24, %v2708_v2  ;;  %v2713_v16 = vadd.f32 %v3895_v43, %v5501_v51  ;;  %v3930_v36 = vpop.f32.mrf.mxu0  ;;  %2954 = vst.msk [vmem:[%s5359_s18 + $0xb8] sm:$0xff] %vm708_vm3, %v2922_v61  ;;  %v3105_v12 = vsel %vm708_vm3, %v3054_v35, 0.0  ;;  %v2489_v8 = vadd.f32 %v5827_v31, %v2283_v3 }
 0x216   : > { %v2656_v58 = vpop.f32.mrf.mxu1  ;;  %v3003_v50 = vadd.f32 %v3002_v7, %v3001_v57  ;;  %v3104_v28 = vadd.f32 %v3103_v34, %v3102_v19  ;;  %v3006_v10 = vsel %vm708_vm3, %v2921_v11, 0.0  ;;  %v3057_v24 = vmul.f32 %v2922_v61, %v2922_v61 }
 0x217   : > { %2952 = vst.msk [vmem:[%s5359_s18 + $0xa8] sm:$0xff] %vm708_vm3, %v2920_v39  ;;  %v3004_v51 = vsel %vm708_vm3, %v2920_v39, 0.0  ;;  %v3055_v55 = vmul.f32 %v2920_v39, %v2920_v39  ;;  %v2871_v4 = vpop.f32.mrf.mxu0  ;;  %v2925_v52 = vadd.f32 %v3929_v15, %v2713_v16  ;;  %v2711_v46 = vadd.f32 %v2656_v58, %v5523_v32  ;;  %v5829_v15 = vld [vmem:[#allocation40_spill] sm:$0xff] }
 0x218   : > { %v3896_v49 = vpop.f32.mrf.mxu1  ;;  %v3106_v1 = vadd.f32 %v3105_v12, %v3104_v28  ;;  %v3005_v56 = vadd.f32 %v3004_v51, %v3003_v50  ;;  %v2487_v18 = vadd.f32 %v5828_v45, %v2281_v14  ;;  %v3109_v25 = vsel %vm708_vm3, %v3056_v41, 0.0 }
 0x219   : > { %v3107_v54 = vsel %vm708_vm3, %v3055_v55, 0.0  ;;  %v2714_v59 = vadd.f32 %v3896_v49, %v5534_v9  ;;  %v3933_v13 = vpop.f32.mrf.mxu0  ;;  %2957 = vst.msk [vmem:[%s5359_s18 + $0xd0] sm:$0xff] %vm708_vm3, %v2925_v52  ;;  %v2923_v44 = vadd.f32 %v2868_v22, %v2711_v46  ;;  %v3008_v9 = vsel %vm708_vm3, %v2922_v61, 0.0 }
 0x21a   : > { %v2659_v26 = vpop.f32.mrf.mxu1  ;;  %v3007_v32 = vadd.f32 %v3006_v10, %v3005_v56  ;;  %v3108_v48 = vadd.f32 %v3107_v54, %v3106_v1  ;;  %v2490_v47 = vadd.f32 %v5829_v15, %v2284_v42  ;;  %v2282_v17 = vadd.f32 %v5341_v27, %v5830_v37 }
 0x21b   : > { %v2926_v60 = vadd.f32 %v3930_v36, %v2714_v59  ;;  %v2712_v33 = vadd.f32 %v2659_v26, %v2484_v0  ;;  %2955 = vst.msk [vmem:[%s5359_s18 + $0xc0] sm:$0xff] %vm708_vm3, %v2923_v44  ;;  %v3058_v20 = vmul.f32 %v2923_v44, %v2923_v44  ;;  %v2884_v0 = vpop.f32.mrf.mxu0  ;;  %v3111_v40 = vsel %vm708_vm3, %v3057_v24, 0.0 }
 0x21c   : > { %v3899_v11 = vpop.f32.mrf.mxu1  ;;  %v3110_v30 = vadd.f32 %v3109_v25, %v3108_v48  ;;  %v3009_v63 = vadd.f32 %v3008_v9, %v3007_v32  ;;  %v3010_v6 = vsel %vm708_vm3, %v2923_v44, 0.0  ;;  %v3060_v2 = vmul.f32 %v2925_v52, %v2925_v52 }
 0x21d   : > { %2958 = vst.msk [vmem:[%s5359_s18 + $0xd8] sm:$0xff] %vm708_vm3, %v2926_v60  ;;  %v2924_v3 = vadd.f32 %v2871_v4, %v2712_v33  ;;  %v2717_v62 = vadd.f32 %v3899_v11, %v2489_v8  ;;  %v3113_v35 = vsel %vm708_vm3, %v3058_v20, 0.0  ;;  %v3934_v23 = vpop.f32.mrf.mxu0  ;;  %v2488_v14 = vadd.f32 %v5831_v5, %v2282_v17 }
 0x21e   : > { %v2672_v38 = vpop.f32.mrf.mxu1  ;;  %v3011_v22 = vadd.f32 %v3010_v6, %v3009_v63  ;;  %v3112_v53 = vadd.f32 %v3111_v40, %v3110_v30  ;;  %v3014_v29 = vsel %vm708_vm3, %v2925_v52, 0.0  ;;  %v3061_v42 = vmul.f32 %v2926_v60, %v2926_v60 }
 0x21f   : > { %v2715_v21 = vadd.f32 %v2672_v38, %v2487_v18  ;;  %2956 = vst.msk [vmem:[%s5359_s18 + $0xc8] sm:$0xff] %vm708_vm3, %v2924_v3  ;;  %v3012_v27 = vsel %vm708_vm3, %v2924_v3, 0.0  ;;  %v3059_v61 = vmul.f32 %v2924_v3, %v2924_v3  ;;  %v2929_v43 = vadd.f32 %v3933_v13, %v2717_v62  ;;  %v2887_v46 = vpop.f32.mrf.mxu0 }
 0x220   : > { %v3900_v19 = vpop.f32.mrf.mxu1  ;;  %v3114_v57 = vadd.f32 %v3113_v35, %v3112_v53  ;;  %v3013_v39 = vadd.f32 %v3012_v27, %v3011_v22  ;;  %v3117_v58 = vsel %vm708_vm3, %v3060_v2, 0.0  ;;  %v3016_v51 = vsel %vm708_vm3, %v2926_v60, 0.0 }
 0x221   : > { %v2927_v16 = vadd.f32 %v2884_v0, %v2715_v21  ;;  %v2718_v36 = vadd.f32 %v3900_v19, %v2490_v47  ;;  %v3115_v34 = vsel %vm708_vm3, %v3059_v61, 0.0  ;;  %2961 = vst.msk [vmem:[%s5359_s18 + $0xf0] sm:$0xff] %vm708_vm3, %v2929_v43  ;;  %v3119_v49 = vsel %vm708_vm3, %v3061_v42, 0.0 }
 0x222   : > { %v2675_v7 = vpop.f32.mrf.mxu1  ;;  %v3015_v50 = vadd.f32 %v3014_v29, %v3013_v39  ;;  %v3116_v28 = vadd.f32 %v3115_v34, %v3114_v57  ;;  %v3064_v13 = vmul.f32 %v2929_v43, %v2929_v43  ;;  %v3022_v26 = vsel %vm708_vm3, %v2929_v43, 0.0 }
 0x223   : > { %2959 = vst.msk [vmem:[%s5359_s18 + $0xe0] sm:$0xff] %vm708_vm3, %v2927_v16  ;;  %v3062_v55 = vmul.f32 %v2927_v16, %v2927_v16  ;;  %v2930_v4 = vadd.f32 %v3934_v23, %v2718_v36  ;;  %v2716_v41 = vadd.f32 %v2675_v7, %v2488_v14  ;;  %v3018_v1 = vsel %vm708_vm3, %v2927_v16, 0.0 }
 0x224   : > { %v3118_v12 = vadd.f32 %v3117_v58, %v3116_v28  ;;  %v3017_v52 = vadd.f32 %v3016_v51, %v3015_v50  ;;  %v3125_v45 = vsel %vm708_vm3, %v3064_v13, 0.0 }
 0x225   : > { %2962 = vst.msk [vmem:[%s5359_s18 + $0xf8] sm:$0xff] %vm708_vm3, %v2930_v4  ;;  %v2928_v56 = vadd.f32 %v2887_v46, %v2716_v41  ;;  %v3121_v31 = vsel %vm708_vm3, %v3062_v55, 0.0  ;;  %v3065_v32 = vmul.f32 %v2930_v4, %v2930_v4  ;;  %v3024_v18 = vsel %vm708_vm3, %v2930_v4, 0.0 }
 0x226   : > { %v3019_v54 = vadd.f32 %v3018_v1, %v3017_v52  ;;  %v3120_v59 = vadd.f32 %v3119_v49, %v3118_v12 }
 0x227   : > { %2960 = vst.msk [vmem:[%s5359_s18 + $0xe8] sm:$0xff] %vm708_vm3, %v2928_v56  ;;  %v3020_v8 = vsel %vm708_vm3, %v2928_v56, 0.0  ;;  %v3063_v10 = vmul.f32 %v2928_v56, %v2928_v56  ;;  %v3127_v20 = vsel %vm708_vm3, %v3065_v32, 0.0 }
 0x228   : > { %v3122_v24 = vadd.f32 %v3121_v31, %v3120_v59  ;;  %v3021_v44 = vadd.f32 %v3020_v8, %v3019_v54 }
 0x229   : > { %v3123_v48 = vsel %vm708_vm3, %v3063_v10, 0.0 }
 0x22a   : > { %v3023_v60 = vadd.f32 %v3022_v26, %v3021_v44  ;;  %v3124_v33 = vadd.f32 %v3123_v48, %v3122_v24 }
 0x22c   : > { %v3025_v25 = vadd.f32 %v3024_v18, %v3023_v60  ;;  %v3126_v9 = vadd.f32 %v3125_v45, %v3124_v33 }
 0x22e   : > { %v3026_v11 = vrot.slane %v3025_v25, 4  ;;  %v3128_v15 = vadd.f32 %v3127_v20, %v3126_v9 }
 0x230   : > { %v3027_v47 = vadd.f32 %v3026_v11, %v3025_v25  ;;  %v3129_v37 = vrot.slane %v3128_v15, 4 }
 0x232   : > { %v3028_v17 = vrot.slane %v3027_v47, 2  ;;  %v3130_v30 = vadd.f32 %v3129_v37, %v3128_v15 }
 0x234   : > { %v3029_v63 = vadd.f32 %v3028_v17, %v3027_v47  ;;  %v3131_v0 = vrot.slane %v3130_v30, 2 }
 0x236   : > { %v3030_v40 = vrot.slane %v3029_v63, 1  ;;  %v3132_v6 = vadd.f32 %v3131_v0, %v3130_v30 }
 0x238   : > { %v3031_v3 = vadd.f32 %v3030_v40, %v3029_v63  ;;  %v3133_v62 = vrot.slane %v3132_v6, 1 }
 0x23a   : > { %3033 = vst.msk [vmem:[%s211_s21] sm:$0x1] %vm3032_vm8, %v3031_v3  ;;  %v3134_v38 = vadd.f32 %v3133_v62, %v3132_v6 }
 0x23c   : > { %3135 = vst.msk [vmem:[%s214_s24] sm:$0x1] %vm3032_vm8, %v3134_v38 }
 0x23d PF: > { %s15_s15 = sadd.s32 1, %s3980_s15  }
 0x23e   : > { %p12_p4 = scmp.ge.s32.totalorder %s15_s15, 4  }
 0x240   :  { %14 = sbr.rel (!%p12_p4) target bundleno = 1 (0x1), region = 90 }

</bundles_post_ra>
